<compile_context>
chip_gen: v5e
topology: v5e:2x2
jax: 0.10.0
libtpu: 0.0.40
codegen_flags: <defaults>
</compile_context>

<pallas_src>
import functools

import jax
import jax.numpy as jnp
from jax.experimental import pallas as pl
from jax.experimental.pallas import tpu as pltpu


# ---------------------------------------------------------------------------
# helpers
# ---------------------------------------------------------------------------
def _round_up(x, m):
    return (x + m - 1) // m * m


def _pad2d(a, rows, cols):
    return jnp.pad(a, ((0, rows - a.shape[0]), (0, cols - a.shape[1])))


def normalize_adjacency(S):
    """S_norm = D^{-1/2} (S + I) D^{-1/2}  (mirrors standard_gcnn_layer.__init__)."""
    S = S + jnp.eye(S.shape[0], dtype=S.dtype)
    d = S.sum(axis=1)
    d_inv_sqrt = 1.0 / jnp.sqrt(d)
    return S * d_inv_sqrt[:, None] * d_inv_sqrt[None, :]


def layer_dims(n_layers, in_dim, hid_dim, out_dim):
    if n_layers == 1:
        return [(in_dim, out_dim)]
    dims = [(in_dim, hid_dim)]
    dims += [(hid_dim, hid_dim)] * (n_layers - 2)
    dims += [(hid_dim, out_dim)]
    return dims


def choose_tiles(n, *, target_tm=512, max_tk=4096):
    """Pick (n_pad, tm, tk).

    Pads N up to a multiple of the chosen row tile instead of collapsing the tile
    to 128 (512-tiles reach ~85% of HBM roofline vs ~29% for 128-tiles); zero rows /
    columns of S contribute nothing.  For n_pad <= max_tk the whole S row strip is
    a single k block (no reduction axis, no per-step overhead)."""
    n_pad = _round_up(n, 128)
    if n_pad <= target_tm:
        return n_pad, n_pad, n_pad            # one row tile, one k strip
    tm = target_tm
    n_pad = _round_up(n_pad, tm)
    if n_pad <= max_tk:
        return n_pad, tm, n_pad               # full row strip of S per tile
    tk = (max_tk // tm) * tm
    while n_pad % tk:
        tk -= tm
    return n_pad, tm, tk


# ---------------------------------------------------------------------------
# Fused GCN layer kernel (all time steps, projection fused, f32 accumulator)
#   grid = (T, row tiles, k tiles);  out = S @ (h @ W) + b  (+ optional LeakyReLU)
# ---------------------------------------------------------------------------
def gcn_layer_kernel(s_ref, h_ref, w_ref, b_ref, o_ref, acc_ref, *,
                     apply_nonlin, negative_slope):
    k = pl.program_id(2)

    @pl.when(k == 0)
    def _init():
        acc_ref[...] = jnp.zeros_like(acc_ref)

    # fused projection: xw_k = h_k @ W  (recomputed per row tile; slack, HBM-bound)
    xw = jnp.dot(h_ref[...], w_ref[...], preferred_element_type=jnp.float32)
    acc_ref[...] += jnp.dot(s_ref[...], xw.astype(jnp.bfloat16),
                            preferred_element_type=jnp.float32)

    @pl.when(k == pl.num_programs(2) - 1)
    def _finalize():
        y = acc_ref[...] + b_ref[...]                 # bias once, at finalize
        if apply_nonlin:
            y = jnp.where(y >= 0.0, y, negative_slope * y)
        o_ref[...] = y.astype(o_ref.dtype)


def gcn_layer_fused(s_stack, h_stack, w_stack, b_stack, tm, tk, *,
                    apply_nonlin, negative_slope, out_dtype):
    """s: (T,N_pad,N_pad) bf16, h: (T,N_pad,Din_pad) bf16, w: (T,Din_pad,Dout_pad) bf16,
    b: (T,1,Dout_pad) f32  ->  (T, N_pad, Dout_pad) out_dtype."""
    T, n_pad, _ = s_stack.shape
    din_pad = h_stack.shape[2]
    dout_pad = w_stack.shape[2]
    grid = (T, n_pad // tm, n_pad // tk)

    out_bytes = 2 if out_dtype == jnp.bfloat16 else 4
    est = (2 * tm * tk * 2                 # S block, double-buffered, bf16
           + 2 * tk * din_pad * 2          # h block
           + 2 * din_pad * dout_pad * 2    # W block
           + 2 * dout_pad * 4              # bias
           + 2 * tm * dout_pad * out_bytes # out block
           + tm * dout_pad * 4)            # f32 accumulator scratch
    # cap at 56 MiB so the same tiling is safe on v7x's 64 MiB physical VMEM
    vmem_limit = min(max(32 * 1024 * 1024, int(est * 1.5)), 56 * 1024 * 1024)

    kern = functools.partial(gcn_layer_kernel, apply_nonlin=apply_nonlin,
                             negative_slope=negative_slope)
    return pl.pallas_call(
        kern,
        out_shape=jax.ShapeDtypeStruct((T, n_pad, dout_pad), out_dtype),
        grid_spec=pltpu.PrefetchScalarGridSpec(
            num_scalar_prefetch=0,
            grid=grid,
            in_specs=[
                pl.BlockSpec((None, tm, tk), lambda t, i, k: (t, i, k)),          # S tile
                pl.BlockSpec((None, tk, din_pad), lambda t, i, k: (t, k, 0)),     # h strip
                pl.BlockSpec((None, din_pad, dout_pad), lambda t, i, k: (t, 0, 0)),  # W (resident per t)
                pl.BlockSpec((None, 1, dout_pad), lambda t, i, k: (t, 0, 0)),     # bias
            ],
            out_specs=pl.BlockSpec((None, tm, dout_pad), lambda t, i, k: (t, i, 0)),
            scratch_shapes=[pltpu.VMEM((tm, dout_pad), jnp.float32)],
        ),
        compiler_params=pltpu.CompilerParams(
            dimension_semantics=("parallel", "parallel", "arbitrary"),
            vmem_limit_bytes=vmem_limit,
        ),
    )(s_stack, h_stack, w_stack, b_stack)


# ---------------------------------------------------------------------------
# Final Linear + sigmoid (row-tiled, operates on the already-padded fused slab)
# ---------------------------------------------------------------------------
def fc_sigmoid_kernel(e_ref, w_ref, b_ref, o_ref):
    y = jnp.dot(e_ref[...].astype(jnp.bfloat16), w_ref[...],
                preferred_element_type=jnp.float32) + b_ref[...]
    o_ref[...] = jax.nn.sigmoid(y).astype(o_ref.dtype)


def fc_sigmoid_padded(fused_pad, wfc_pad, bfc_pad, tm):
    """fused: (N_pad, E_pad) f32, wfc: (E_pad, P_pad) bf16, bfc: (1, P_pad) f32."""
    n_pad, e_pad = fused_pad.shape
    p_pad = wfc_pad.shape[1]
    return pl.pallas_call(
        fc_sigmoid_kernel,
        out_shape=jax.ShapeDtypeStruct((n_pad, p_pad), jnp.float32),
        grid=(n_pad // tm,),
        in_specs=[
            pl.BlockSpec((tm, e_pad), lambda i: (i, 0)),
            pl.BlockSpec((e_pad, p_pad), lambda i: (0, 0)),
            pl.BlockSpec((1, p_pad), lambda i: (0, 0)),
        ],
        out_specs=pl.BlockSpec((tm, p_pad), lambda i: (i, 0)),
        compiler_params=pltpu.CompilerParams(dimension_semantics=("parallel",)),
    )(fused_pad, wfc_pad, bfc_pad)


# ---------------------------------------------------------------------------
# MultiStepGNN forward
# ---------------------------------------------------------------------------
@functools.partial(jax.jit, static_argnames=("aggregation", "negative_slope"))
def multi_step_gnn_forward(S_list, x_list, gnn_params, w_fc, b_fc, *,
                           aggregation="mean", negative_slope=0.01):
    T = len(S_list)
    n, in_dim = x_list[0].shape
    n_layers = len(gnn_params[0])
    out_dim = gnn_params[0][-1][0].shape[1]
    p = w_fc.shape[1]

    n_pad, tm, tk = choose_tiles(n)

    # normalize S once per step; pad + cast to bf16 once (reused for every layer)
    s_stack = jnp.stack(
        [_pad2d(normalize_adjacency(S_list[t].astype(jnp.float32)), n_pad, n_pad)
         for t in range(T)], axis=0).astype(jnp.bfloat16)

    din0_pad = _round_up(in_dim, 128)
    h = jnp.stack(
        [_pad2d(x_list[t].astype(jnp.float32), n_pad, din0_pad) for t in range(T)],
        axis=0).astype(jnp.bfloat16)

    for li in range(n_layers):
        d_in, d_out = gnn_params[0][li][0].shape
        din_pad = _round_up(d_in, 128)
        dout_pad = _round_up(d_out, 128)
        w_stack = jnp.stack(
            [_pad2d(gnn_params[t][li][0].astype(jnp.float32), din_pad, dout_pad)
             for t in range(T)], axis=0).astype(jnp.bfloat16)
        b_stack = jnp.stack(
            [jnp.pad(gnn_params[t][li][1].astype(jnp.float32),
                     (0, dout_pad - d_out)).reshape(1, dout_pad)
             for t in range(T)], axis=0)
        last = li == n_layers - 1
        h = gcn_layer_fused(
            s_stack, h, w_stack, b_stack, tm, tk,
            apply_nonlin=not last, negative_slope=negative_slope,
            out_dtype=jnp.float32 if last else jnp.bfloat16)
        # TODO(synk): F.dropout between layers omitted (identity in eval mode).

    dout_pad = h.shape[2]                      # h: (T, N_pad, Dout_pad) f32
    embeddings = h[:, :n, :out_dim]            # (T, N, out_dim)

    p_pad = _round_up(p, 128)
    bfc_pad = jnp.pad(b_fc.astype(jnp.float32), (0, p_pad - p)).reshape(1, p_pad)

    # aggregate on the padded stack; feed the padded slab straight into the FC kernel
    if aggregation == "mean":
        fused_pad = jnp.mean(h, axis=0)
        wfc_pad = _pad2d(w_fc.astype(jnp.float32), dout_pad, p_pad).astype(jnp.bfloat16)
    elif aggregation == "sum":
        fused_pad = jnp.sum(h, axis=0)
        wfc_pad = _pad2d(w_fc.astype(jnp.float32), dout_pad, p_pad).astype(jnp.bfloat16)
    elif aggregation == "concat":
        fused_pad = jnp.transpose(h, (1, 0, 2)).reshape(n_pad, T * dout_pad)
        wfc_pad = jnp.pad(
            w_fc.astype(jnp.float32).reshape(T, out_dim, p),
            ((0, 0), (0, dout_pad - out_dim), (0, p_pad - p)),
        ).reshape(T * dout_pad, p_pad).astype(jnp.bfloat16)
    else:
        raise ValueError("Invalid aggregation method. Use 'mean', 'sum', or 'concat'.")

    out_pad = fc_sigmoid_padded(fused_pad, wfc_pad, bfc_pad, tm)
    return out_pad[:n, :p], embeddings


# ---------------------------------------------------------------------------
# Pure-JAX reference (mirrors kernel numerics: bf16 MXU inputs, f32 accumulation)
# ---------------------------------------------------------------------------
def reference_forward(S_list, x_list, gnn_params, w_fc, b_fc, *,
                      aggregation="mean", negative_slope=0.01):
    bf16 = jnp.bfloat16
    embs = []
    for t in range(len(S_list)):
        S = normalize_adjacency(S_list[t].astype(jnp.float32)).astype(bf16)
        h = x_list[t].astype(jnp.float32)
        n_layers = len(gnn_params[t])
        for li, (W, b) in enumerate(gnn_params[t]):
            xw = jnp.dot(h.astype(bf16), W.astype(bf16),
                         preferred_element_type=jnp.float32)
            y = jnp.dot(S, xw.astype(bf16),
                        preferred_element_type=jnp.float32) + b[None, :]
            if li < n_layers - 1:
                y = jnp.where(y >= 0.0, y, negative_slope * y)
            h = y
        embs.append(h)
    embs = jnp.stack(embs, axis=0)
    if aggregation == "mean":
        fused = jnp.mean(embs, axis=0)
    elif aggregation == "sum":
        fused = jnp.sum(embs, axis=0)
    else:
        fused = jnp.concatenate([embs[t] for t in range(embs.shape[0])], axis=-1)
    logits = jnp.dot(fused.astype(bf16), w_fc.astype(bf16),
                     preferred_element_type=jnp.float32) + b_fc[None, :]
    return jax.nn.sigmoid(logits), embs


# ---------------------------------------------------------------------------
# demo
# ---------------------------------------------------------------------------
if __name__ == "__main__":
    N, T = 300, 3                       # nodes, time steps
    n_layers, in_dim, hid_dim, out_dim, P = 2, 8, 16, 12, 4
    aggregation = "mean"

    key = jax.random.PRNGKey(0)
    k_adj, k_w, k_b, k_wfc, k_bfc, k_x = jax.random.split(key, 6)

    # adjacency matrices (symmetric 0/1), one per time step
    S_list = []
    for t in range(T):
        kA = jax.random.fold_in(k_adj, t)
        A = (jax.random.uniform(kA, (N, N)) > 0.9).astype(jnp.float32)
        A = jnp.triu(A, 1)
        S_list.append(A + A.T)

    # per-step, per-layer GCN params (kaiming-uniform-style W, uniform small b)
    dims = layer_dims(n_layers, in_dim, hid_dim, out_dim)
    gnn_params = []
    for t in range(T):
        layers = []
        for li, (di, do) in enumerate(dims):
            kw = jax.random.fold_in(k_w, t * 16 + li)
            kb = jax.random.fold_in(k_b, t * 16 + li)
            bound = (6.0 / do) ** 0.5
            W = jax.random.uniform(kw, (di, do), minval=-bound, maxval=bound,
                                   dtype=jnp.float32)
            std = 1.0 / (di * do)
            b = jax.random.uniform(kb, (do,), minval=-std, maxval=std,
                                   dtype=jnp.float32)
            layers.append((W, b))
        gnn_params.append(layers)

    # final FC layer (stored already transposed: (embedding_dim, P))
    fc_in = out_dim if aggregation in ("mean", "sum") else T * out_dim
    W_fc = 0.1 * jax.random.normal(k_wfc, (fc_in, P), dtype=jnp.float32)
    b_fc = 0.1 * jax.random.normal(k_bfc, (P,), dtype=jnp.float32)

    # inputs, one per time step
    x_list = [
        jax.random.normal(jax.random.fold_in(k_x, t), (N, in_dim), dtype=jnp.float32)
        for t in range(T)
    ]

    out, embs = multi_step_gnn_forward(
        S_list, x_list, gnn_params, W_fc, b_fc, aggregation=aggregation
    )
    out = jax.block_until_ready(out)
    embs = jax.block_until_ready(embs)

    ref_out, ref_embs = reference_forward(
        S_list, x_list, gnn_params, W_fc, b_fc, aggregation=aggregation
    )

    assert out.shape == (N, P)
    assert embs.shape == (T, N, out_dim)
    assert jnp.allclose(embs, ref_embs, atol=2e-3, rtol=2e-3), float(
        jnp.max(jnp.abs(embs - ref_embs)))
    assert jnp.allclose(out, ref_out, atol=2e-3, rtol=2e-3), float(
        jnp.max(jnp.abs(out - ref_out)))

    print("KERNEL_OK")
</pallas_src>

<mosaic_0001>
module attributes {stable_mosaic.version = 11 : i64} {
  func.func @gcn_layer_kernel(%arg0: i32, %arg1: i32, %arg2: i32, %arg3: memref<1x384x384xbf16, #tpu.memory_space<vmem>>, %arg4: memref<1x384x128xbf16, #tpu.memory_space<vmem>>, %arg5: memref<1x128x128xbf16, #tpu.memory_space<vmem>>, %arg6: memref<1x1x128xf32, #tpu.memory_space<vmem>>, %arg7: memref<1x384x128xbf16, #tpu.memory_space<vmem>>, %arg8: memref<384x128xf32, #tpu.memory_space<vmem>>) attributes {dimension_semantics = [#tpu.dimension_semantics<parallel>, #tpu.dimension_semantics<parallel>, #tpu.dimension_semantics<arbitrary>], iteration_bounds = array<i64: 3, 1, 1>, scalar_prefetch = 0 : i64, scratch_operands = 1 : i64, tpu.core_type = #tpu.core_type<tc>, window_params = [{transform_indices = @transform_0, window_bounds = array<i64: 1, 384, 384>}, {transform_indices = @transform_1, window_bounds = array<i64: 1, 384, 128>}, {transform_indices = @transform_2, window_bounds = array<i64: 1, 128, 128>}, {transform_indices = @transform_3, window_bounds = array<i64: 1, 1, 128>}, {transform_indices = @transform_4, window_bounds = array<i64: 1, 384, 128>}]} {
    %c0_i32 = arith.constant 0 : i32
    %0 = arith.cmpi eq, %arg2, %c0_i32 : i32
    %1 = arith.extui %0 : i1 to i32
    %c0_i32_0 = arith.constant 0 : i32
    %2 = arith.cmpi ne, %1, %c0_i32_0 : i32
    scf.if %2 {
      %cst_16 = arith.constant 0.000000e+00 : f32
      %18 = vector.broadcast %cst_16 : f32 to vector<384x128xf32>
      %c0_17 = arith.constant 0 : index
      %c0_18 = arith.constant 0 : index
      %19 = vector.load %arg8[%c0_17, %c0_18] : memref<384x128xf32, #tpu.memory_space<vmem>>, vector<384x128xf32>
      tpu.vector_store %arg8[%c0_17, %c0_18], %18 {strides = array<i32>} : memref<384x128xf32, #tpu.memory_space<vmem>>, vector<384x128xf32>,
    } else {
    }
    %c0 = arith.constant 0 : index
    %c0_1 = arith.constant 0 : index
    %c0_2 = arith.constant 0 : index
    %3 = vector.load %arg4[%c0, %c0_1, %c0_2] : memref<1x384x128xbf16, #tpu.memory_space<vmem>>, vector<1x384x128xbf16>
    %4 = vector.shape_cast %3 : vector<1x384x128xbf16> to vector<384x128xbf16>
    %c0_3 = arith.constant 0 : index
    %c0_4 = arith.constant 0 : index
    %c0_5 = arith.constant 0 : index
    %5 = vector.load %arg5[%c0_3, %c0_4, %c0_5] : memref<1x128x128xbf16, #tpu.memory_space<vmem>>, vector<1x128x128xbf16>
    %6 = vector.shape_cast %5 : vector<1x128x128xbf16> to vector<128x128xbf16>
    %cst = arith.constant dense<0.000000e+00> : vector<384x128xf32>
    %7 = tpu.matmul %4, %6, %cst {dimension_numbers = #tpu.dot_dimension_numbers<[1], [0], [0], [1], [0, 0, 1, 1], [], []>} : vector<384x128xbf16>, vector<128x128xbf16>, vector<384x128xf32> -> vector<384x128xf32>
    %c0_6 = arith.constant 0 : index
    %c0_7 = arith.constant 0 : index
    %8 = vector.load %arg8[%c0_6, %c0_7] : memref<384x128xf32, #tpu.memory_space<vmem>>, vector<384x128xf32>
    %c0_8 = arith.constant 0 : index
    %c0_9 = arith.constant 0 : index
    %c0_10 = arith.constant 0 : index
    %9 = vector.load %arg3[%c0_8, %c0_9, %c0_10] : memref<1x384x384xbf16, #tpu.memory_space<vmem>>, vector<1x384x384xbf16>
    %10 = vector.shape_cast %9 : vector<1x384x384xbf16> to vector<384x384xbf16>
    %11 = arith.truncf %7 : vector<384x128xf32> to vector<384x128xbf16>
    %cst_11 = arith.constant dense<0.000000e+00> : vector<384x128xf32>
    %12 = tpu.matmul %10, %11, %cst_11 {dimension_numbers = #tpu.dot_dimension_numbers<[1], [0], [0], [1], [0, 0, 1, 1], [], []>} : vector<384x384xbf16>, vector<384x128xbf16>, vector<384x128xf32> -> vector<384x128xf32>
    %13 = arith.addf %8, %12 : vector<384x128xf32>
    %c0_12 = arith.constant 0 : index
    %c0_13 = arith.constant 0 : index
    %14 = vector.load %arg8[%c0_12, %c0_13] : memref<384x128xf32, #tpu.memory_space<vmem>>, vector<384x128xf32>
    tpu.vector_store %arg8[%c0_12, %c0_13], %13 {strides = array<i32>} : memref<384x128xf32, #tpu.memory_space<vmem>>, vector<384x128xf32>,
    %c0_i32_14 = arith.constant 0 : i32
    %15 = arith.cmpi eq, %arg2, %c0_i32_14 : i32
    %16 = arith.extui %15 : i1 to i32
    %c0_i32_15 = arith.constant 0 : i32
    %17 = arith.cmpi ne, %16, %c0_i32_15 : i32
    scf.if %17 {
      %c0_16 = arith.constant 0 : index
      %c0_17 = arith.constant 0 : index
      %18 = vector.load %arg8[%c0_16, %c0_17] : memref<384x128xf32, #tpu.memory_space<vmem>>, vector<384x128xf32>
      %c0_18 = arith.constant 0 : index
      %c0_19 = arith.constant 0 : index
      %c0_20 = arith.constant 0 : index
      %19 = vector.load %arg6[%c0_18, %c0_19, %c0_20] : memref<1x1x128xf32, #tpu.memory_space<vmem>>, vector<1x1x128xf32>
      %20 = vector.shape_cast %19 : vector<1x1x128xf32> to vector<1x128xf32>
      %21 = vector.broadcast %20 : vector<1x128xf32> to vector<384x128xf32>
      %22 = arith.addf %18, %21 : vector<384x128xf32>
      %cst_21 = arith.constant 0.000000e+00 : f32
      %23 = vector.broadcast %cst_21 : f32 to vector<384x128xf32>
      %24 = arith.cmpf oge, %22, %23 : vector<384x128xf32>
      %cst_22 = arith.constant 0.00999999977 : f32
      %25 = vector.broadcast %cst_22 : f32 to vector<384x128xf32>
      %26 = arith.mulf %25, %22 : vector<384x128xf32>
      %27 = arith.select %24, %22, %26 : vector<384x128xi1>, vector<384x128xf32>
      %28 = arith.truncf %27 : vector<384x128xf32> to vector<384x128xbf16>
      %c0_23 = arith.constant 0 : index
      %c0_24 = arith.constant 0 : index
      %c0_25 = arith.constant 0 : index
      %29 = vector.load %arg7[%c0_23, %c0_24, %c0_25] : memref<1x384x128xbf16, #tpu.memory_space<vmem>>, vector<1x384x128xbf16>
      %30 = vector.shape_cast %29 : vector<1x384x128xbf16> to vector<384x128xbf16>
      %31 = vector.shape_cast %28 : vector<384x128xbf16> to vector<1x384x128xbf16>
      tpu.vector_store %arg7[%c0_23, %c0_24, %c0_25], %31 {strides = array<i32>} : memref<1x384x128xbf16, #tpu.memory_space<vmem>>, vector<1x384x128xbf16>,
    } else {
    }
    return
  }
  func.func @transform_0(%arg0: i32, %arg1: i32, %arg2: i32) -> (i32, i32, i32) {
    %c0_i32 = arith.constant 0 : i32
    return %arg0, %arg1, %arg2 : i32, i32, i32
  }
  func.func @transform_1(%arg0: i32, %arg1: i32, %arg2: i32) -> (i32, i32, i32) {
    %c0_i32 = arith.constant 0 : i32
    %c0_i32_0 = arith.constant 0 : i32
    return %arg0, %arg2, %c0_i32 : i32, i32, i32
  }
  func.func @transform_2(%arg0: i32, %arg1: i32, %arg2: i32) -> (i32, i32, i32) {
    %c0_i32 = arith.constant 0 : i32
    %c0_i32_0 = arith.constant 0 : i32
    %c0_i32_1 = arith.constant 0 : i32
    return %arg0, %c0_i32, %c0_i32_0 : i32, i32, i32
  }
  func.func @transform_3(%arg0: i32, %arg1: i32, %arg2: i32) -> (i32, i32, i32) {
    %c0_i32 = arith.constant 0 : i32
    %c0_i32_0 = arith.constant 0 : i32
    %c0_i32_1 = arith.constant 0 : i32
    return %arg0, %c0_i32, %c0_i32_0 : i32, i32, i32
  }
  func.func @transform_4(%arg0: i32, %arg1: i32, %arg2: i32) -> (i32, i32, i32) {
    %c0_i32 = arith.constant 0 : i32
    %c0_i32_0 = arith.constant 0 : i32
    return %arg0, %arg1, %c0_i32 : i32, i32, i32
  }
}

module attributes {stable_mosaic.version = 11 : i64} {
  func.func @gcn_layer_kernel(%arg0: i32, %arg1: i32, %arg2: i32, %arg3: memref<1x384x384xbf16, #tpu.memory_space<vmem>>, %arg4: memref<1x384x128xbf16, #tpu.memory_space<vmem>>, %arg5: memref<1x128x128xbf16, #tpu.memory_space<vmem>>, %arg6: memref<1x1x128xf32, #tpu.memory_space<vmem>>, %arg7: memref<1x384x128xf32, #tpu.memory_space<vmem>>, %arg8: memref<384x128xf32, #tpu.memory_space<vmem>>) attributes {dimension_semantics = [#tpu.dimension_semantics<parallel>, #tpu.dimension_semantics<parallel>, #tpu.dimension_semantics<arbitrary>], iteration_bounds = array<i64: 3, 1, 1>, scalar_prefetch = 0 : i64, scratch_operands = 1 : i64, tpu.core_type = #tpu.core_type<tc>, window_params = [{transform_indices = @transform_0, window_bounds = array<i64: 1, 384, 384>}, {transform_indices = @transform_1, window_bounds = array<i64: 1, 384, 128>}, {transform_indices = @transform_2, window_bounds = array<i64: 1, 128, 128>}, {transform_indices = @transform_3, window_bounds = array<i64: 1, 1, 128>}, {transform_indices = @transform_4, window_bounds = array<i64: 1, 384, 128>}]} {
    %c0_i32 = arith.constant 0 : i32
    %0 = arith.cmpi eq, %arg2, %c0_i32 : i32
    %1 = arith.extui %0 : i1 to i32
    %c0_i32_0 = arith.constant 0 : i32
    %2 = arith.cmpi ne, %1, %c0_i32_0 : i32
    scf.if %2 {
      %cst_16 = arith.constant 0.000000e+00 : f32
      %18 = vector.broadcast %cst_16 : f32 to vector<384x128xf32>
      %c0_17 = arith.constant 0 : index
      %c0_18 = arith.constant 0 : index
      %19 = vector.load %arg8[%c0_17, %c0_18] : memref<384x128xf32, #tpu.memory_space<vmem>>, vector<384x128xf32>
      tpu.vector_store %arg8[%c0_17, %c0_18], %18 {strides = array<i32>} : memref<384x128xf32, #tpu.memory_space<vmem>>, vector<384x128xf32>,
    } else {
    }
    %c0 = arith.constant 0 : index
    %c0_1 = arith.constant 0 : index
    %c0_2 = arith.constant 0 : index
    %3 = vector.load %arg4[%c0, %c0_1, %c0_2] : memref<1x384x128xbf16, #tpu.memory_space<vmem>>, vector<1x384x128xbf16>
    %4 = vector.shape_cast %3 : vector<1x384x128xbf16> to vector<384x128xbf16>
    %c0_3 = arith.constant 0 : index
    %c0_4 = arith.constant 0 : index
    %c0_5 = arith.constant 0 : index
    %5 = vector.load %arg5[%c0_3, %c0_4, %c0_5] : memref<1x128x128xbf16, #tpu.memory_space<vmem>>, vector<1x128x128xbf16>
    %6 = vector.shape_cast %5 : vector<1x128x128xbf16> to vector<128x128xbf16>
    %cst = arith.constant dense<0.000000e+00> : vector<384x128xf32>
    %7 = tpu.matmul %4, %6, %cst {dimension_numbers = #tpu.dot_dimension_numbers<[1], [0], [0], [1], [0, 0, 1, 1], [], []>} : vector<384x128xbf16>, vector<128x128xbf16>, vector<384x128xf32> -> vector<384x128xf32>
    %c0_6 = arith.constant 0 : index
    %c0_7 = arith.constant 0 : index
    %8 = vector.load %arg8[%c0_6, %c0_7] : memref<384x128xf32, #tpu.memory_space<vmem>>, vector<384x128xf32>
    %c0_8 = arith.constant 0 : index
    %c0_9 = arith.constant 0 : index
    %c0_10 = arith.constant 0 : index
    %9 = vector.load %arg3[%c0_8, %c0_9, %c0_10] : memref<1x384x384xbf16, #tpu.memory_space<vmem>>, vector<1x384x384xbf16>
    %10 = vector.shape_cast %9 : vector<1x384x384xbf16> to vector<384x384xbf16>
    %11 = arith.truncf %7 : vector<384x128xf32> to vector<384x128xbf16>
    %cst_11 = arith.constant dense<0.000000e+00> : vector<384x128xf32>
    %12 = tpu.matmul %10, %11, %cst_11 {dimension_numbers = #tpu.dot_dimension_numbers<[1], [0], [0], [1], [0, 0, 1, 1], [], []>} : vector<384x384xbf16>, vector<384x128xbf16>, vector<384x128xf32> -> vector<384x128xf32>
    %13 = arith.addf %8, %12 : vector<384x128xf32>
    %c0_12 = arith.constant 0 : index
    %c0_13 = arith.constant 0 : index
    %14 = vector.load %arg8[%c0_12, %c0_13] : memref<384x128xf32, #tpu.memory_space<vmem>>, vector<384x128xf32>
    tpu.vector_store %arg8[%c0_12, %c0_13], %13 {strides = array<i32>} : memref<384x128xf32, #tpu.memory_space<vmem>>, vector<384x128xf32>,
    %c0_i32_14 = arith.constant 0 : i32
    %15 = arith.cmpi eq, %arg2, %c0_i32_14 : i32
    %16 = arith.extui %15 : i1 to i32
    %c0_i32_15 = arith.constant 0 : i32
    %17 = arith.cmpi ne, %16, %c0_i32_15 : i32
    scf.if %17 {
      %c0_16 = arith.constant 0 : index
      %c0_17 = arith.constant 0 : index
      %18 = vector.load %arg8[%c0_16, %c0_17] : memref<384x128xf32, #tpu.memory_space<vmem>>, vector<384x128xf32>
      %c0_18 = arith.constant 0 : index
      %c0_19 = arith.constant 0 : index
      %c0_20 = arith.constant 0 : index
      %19 = vector.load %arg6[%c0_18, %c0_19, %c0_20] : memref<1x1x128xf32, #tpu.memory_space<vmem>>, vector<1x1x128xf32>
      %20 = vector.shape_cast %19 : vector<1x1x128xf32> to vector<1x128xf32>
      %21 = vector.broadcast %20 : vector<1x128xf32> to vector<384x128xf32>
      %22 = arith.addf %18, %21 : vector<384x128xf32>
      %c0_21 = arith.constant 0 : index
      %c0_22 = arith.constant 0 : index
      %c0_23 = arith.constant 0 : index
      %23 = vector.load %arg7[%c0_21, %c0_22, %c0_23] : memref<1x384x128xf32, #tpu.memory_space<vmem>>, vector<1x384x128xf32>
      %24 = vector.shape_cast %23 : vector<1x384x128xf32> to vector<384x128xf32>
      %25 = vector.shape_cast %22 : vector<384x128xf32> to vector<1x384x128xf32>
      tpu.vector_store %arg7[%c0_21, %c0_22, %c0_23], %25 {strides = array<i32>} : memref<1x384x128xf32, #tpu.memory_space<vmem>>, vector<1x384x128xf32>,
    } else {
    }
    return
  }
  func.func @transform_0(%arg0: i32, %arg1: i32, %arg2: i32) -> (i32, i32, i32) {
    %c0_i32 = arith.constant 0 : i32
    return %arg0, %arg1, %arg2 : i32, i32, i32
  }
  func.func @transform_1(%arg0: i32, %arg1: i32, %arg2: i32) -> (i32, i32, i32) {
    %c0_i32 = arith.constant 0 : i32
    %c0_i32_0 = arith.constant 0 : i32
    return %arg0, %arg2, %c0_i32 : i32, i32, i32
  }
  func.func @transform_2(%arg0: i32, %arg1: i32, %arg2: i32) -> (i32, i32, i32) {
    %c0_i32 = arith.constant 0 : i32
    %c0_i32_0 = arith.constant 0 : i32
    %c0_i32_1 = arith.constant 0 : i32
    return %arg0, %c0_i32, %c0_i32_0 : i32, i32, i32
  }
  func.func @transform_3(%arg0: i32, %arg1: i32, %arg2: i32) -> (i32, i32, i32) {
    %c0_i32 = arith.constant 0 : i32
    %c0_i32_0 = arith.constant 0 : i32
    %c0_i32_1 = arith.constant 0 : i32
    return %arg0, %c0_i32, %c0_i32_0 : i32, i32, i32
  }
  func.func @transform_4(%arg0: i32, %arg1: i32, %arg2: i32) -> (i32, i32, i32) {
    %c0_i32 = arith.constant 0 : i32
    %c0_i32_0 = arith.constant 0 : i32
    return %arg0, %arg1, %c0_i32 : i32, i32, i32
  }
}

module attributes {stable_mosaic.version = 11 : i64} {
  func.func @fc_sigmoid_kernel(%arg0: i32, %arg1: memref<384x128xf32, #tpu.memory_space<vmem>>, %arg2: memref<128x128xbf16, #tpu.memory_space<vmem>>, %arg3: memref<1x128xf32, #tpu.memory_space<vmem>>, %arg4: memref<384x128xf32, #tpu.memory_space<vmem>>) attributes {dimension_semantics = [#tpu.dimension_semantics<parallel>], iteration_bounds = array<i64: 1>, scalar_prefetch = 0 : i64, scratch_operands = 0 : i64, tpu.core_type = #tpu.core_type<tc>, window_params = [{transform_indices = @transform_0, window_bounds = array<i64: 384, 128>}, {pipeline_mode = #tpu.pipeline_mode<synchronous>, transform_indices = @transform_1, window_bounds = array<i64: 128, 128>}, {pipeline_mode = #tpu.pipeline_mode<synchronous>, transform_indices = @transform_2, window_bounds = array<i64: 1, 128>}, {transform_indices = @transform_3, window_bounds = array<i64: 384, 128>}]} {
    %c0 = arith.constant 0 : index
    %c0_0 = arith.constant 0 : index
    %0 = vector.load %arg1[%c0, %c0_0] : memref<384x128xf32, #tpu.memory_space<vmem>>, vector<384x128xf32>
    %1 = arith.truncf %0 : vector<384x128xf32> to vector<384x128xbf16>
    %c0_1 = arith.constant 0 : index
    %c0_2 = arith.constant 0 : index
    %2 = vector.load %arg2[%c0_1, %c0_2] : memref<128x128xbf16, #tpu.memory_space<vmem>>, vector<128x128xbf16>
    %cst = arith.constant dense<0.000000e+00> : vector<384x128xf32>
    %3 = tpu.matmul %1, %2, %cst {dimension_numbers = #tpu.dot_dimension_numbers<[1], [0], [0], [1], [0, 0, 1, 1], [], []>} : vector<384x128xbf16>, vector<128x128xbf16>, vector<384x128xf32> -> vector<384x128xf32>
    %c0_3 = arith.constant 0 : index
    %c0_4 = arith.constant 0 : index
    %4 = vector.load %arg3[%c0_3, %c0_4] : memref<1x128xf32, #tpu.memory_space<vmem>>, vector<1x128xf32>
    %5 = vector.broadcast %4 : vector<1x128xf32> to vector<384x128xf32>
    %6 = arith.addf %3, %5 : vector<384x128xf32>
    %7 = arith.negf %6 : vector<384x128xf32>
    %8 = math.exp %7 : vector<384x128xf32>
    %cst_5 = arith.constant 1.000000e+00 : f32
    %9 = vector.broadcast %cst_5 : f32 to vector<384x128xf32>
    %10 = arith.addf %9, %8 : vector<384x128xf32>
    %11 = arith.divf %9, %10 : vector<384x128xf32>
    %c0_6 = arith.constant 0 : index
    %c0_7 = arith.constant 0 : index
    %12 = vector.load %arg4[%c0_6, %c0_7] : memref<384x128xf32, #tpu.memory_space<vmem>>, vector<384x128xf32>
    tpu.vector_store %arg4[%c0_6, %c0_7], %11 {strides = array<i32>} : memref<384x128xf32, #tpu.memory_space<vmem>>, vector<384x128xf32>,
    return
  }
  func.func @transform_0(%arg0: i32) -> (i32, i32) {
    %c0_i32 = arith.constant 0 : i32
    %c0_i32_0 = arith.constant 0 : i32
    return %arg0, %c0_i32 : i32, i32
  }
  func.func @transform_1(%arg0: i32) -> (i32, i32) {
    %c0_i32 = arith.constant 0 : i32
    %c0_i32_0 = arith.constant 0 : i32
    %c0_i32_1 = arith.constant 0 : i32
    return %c0_i32, %c0_i32_0 : i32, i32
  }
  func.func @transform_2(%arg0: i32) -> (i32, i32) {
    %c0_i32 = arith.constant 0 : i32
    %c0_i32_0 = arith.constant 0 : i32
    %c0_i32_1 = arith.constant 0 : i32
    return %c0_i32, %c0_i32_0 : i32, i32
  }
  func.func @transform_3(%arg0: i32) -> (i32, i32) {
    %c0_i32 = arith.constant 0 : i32
    %c0_i32_0 = arith.constant 0 : i32
    return %arg0, %c0_i32 : i32, i32
  }
}

</mosaic_0001>

<bundles_post_ra>
// kernel: multi_step_gnn_forward.5
= control target key start
LH: loop header
LB: loop body
LE: loop exit
PB: predicated region body
PF: predicated region fallthrough
CT: control target
= control target key end

     0   :  { %s2616_s1 = inlined_call_operand.vmem [shape: bf16[128,128], index: 1, kind: input, shape index: {}]   ;;  %s2617_s2 = inlined_call_operand.vmem [shape: f32[1,128], index: 2, kind: input, shape index: {}]   ;;  %s2618_s0 = inlined_call_operand.vmem [shape: f32[384,128], index: 0, kind: input, shape index: {}]   ;;  %s2619_s3 = inlined_call_operand.vmem [shape: f32[384,128], index: 3, kind: output, shape index: {}]  }
   0x1   :  { %v1334_v0 = vld [vmem:[%s2616_s1 + $0x38] sm:$0xff]  ;;  %v1333_v1 = vld [vmem:[%s2616_s1 + $0x30] sm:$0xff]  ;;  %v1332_v2 = vld [vmem:[%s2616_s1 + $0x28] sm:$0xff] }
   0x2   :  { %154 = vmatpush.bf16.msra.mxu0 %v1334_v0  ;;  %1335 = vmatpush.bf16.msra.mxu1 %v1334_v0  ;;  %v1331_v3 = vld [vmem:[%s2616_s1 + $0x20] sm:$0xff]  ;;  %v1330_v4 = vld [vmem:[%s2616_s1 + $0x18] sm:$0xff]  ;;  %v1329_v5 = vld [vmem:[%s2616_s1 + $0x10] sm:$0xff] }
   0x3   :  { %1336 = vmatpush.bf16.msra.mxu2 %v1334_v0  ;;  %1337 = vmatpush.bf16.msra.mxu3 %v1334_v0  ;;  %v1328_v6 = vld [vmem:[%s2616_s1 + $0x8] sm:$0xff]  ;;  %v1327_v7 = vld [vmem:[%s2616_s1] sm:$0xff]  ;;  %v16_v20 = vld [vmem:[%s2618_s0 + $0x10] sm:$0xff] }
   0x4   :  { %v14_v8 = vld [vmem:[%s2618_s0] sm:$0xff]  ;;  %v15_v9 = vld [vmem:[%s2618_s0 + $0x8] sm:$0xff]  ;;  %v17_v21 = vld [vmem:[%s2618_s0 + $0x18] sm:$0xff] }
   0x5   :  { %v26_v10 = vld [vmem:[%s2618_s0 + $0x60] sm:$0xff]  ;;  %v27_v11 = vld [vmem:[%s2618_s0 + $0x68] sm:$0xff]  ;;  %v62_v16 = vpack.c.bf16 %v15_v9, %v14_v8  ;;  %v28_v22 = vld [vmem:[%s2618_s0 + $0x70] sm:$0xff]  ;;  %v63_v28 = vpack.c.bf16 %v17_v21, %v16_v20 }
   0x6   :  { %155 = vmatpush.bf16.msra.mxu0 %v1333_v1  ;;  %1338 = vmatpush.bf16.msra.mxu1 %v1333_v1  ;;  %v38_v12 = vld [vmem:[%s2618_s0 + $0xc0] sm:$0xff]  ;;  %v39_v13 = vld [vmem:[%s2618_s0 + $0xc8] sm:$0xff]  ;;  %v68_v17 = vpack.c.bf16 %v27_v11, %v26_v10  ;;  %v29_v23 = vld [vmem:[%s2618_s0 + $0x78] sm:$0xff] }
   0x7   :  { %1339 = vmatpush.bf16.msra.mxu2 %v1333_v1  ;;  %1340 = vmatpush.bf16.msra.mxu3 %v1333_v1  ;;  %v50_v14 = vld [vmem:[%s2618_s0 + $0x120] sm:$0xff]  ;;  %v51_v15 = vld [vmem:[%s2618_s0 + $0x128] sm:$0xff]  ;;  %v74_v18 = vpack.c.bf16 %v39_v13, %v38_v12  ;;  %v40_v24 = vld [vmem:[%s2618_s0 + $0xd0] sm:$0xff]  ;;  %v69_v29 = vpack.c.bf16 %v29_v23, %v28_v22 }
   0x8   :  { %v80_v19 = vpack.c.bf16 %v51_v15, %v50_v14  ;;  %v41_v25 = vld [vmem:[%s2618_s0 + $0xd8] sm:$0xff]  ;;  %v52_v26 = vld [vmem:[%s2618_s0 + $0x130] sm:$0xff]  ;;  %v18_v32 = vld [vmem:[%s2618_s0 + $0x20] sm:$0xff] }
   0x9   :  { %v53_v27 = vld [vmem:[%s2618_s0 + $0x138] sm:$0xff]  ;;  %v75_v30 = vpack.c.bf16 %v41_v25, %v40_v24  ;;  %v19_v33 = vld [vmem:[%s2618_s0 + $0x28] sm:$0xff]  ;;  %v30_v34 = vld [vmem:[%s2618_s0 + $0x80] sm:$0xff] }
   0xa   :  { %156 = vmatpush.bf16.msra.mxu0 %v1332_v2  ;;  %1341 = vmatpush.bf16.msra.mxu1 %v1332_v2  ;;  %v81_v31 = vpack.c.bf16 %v53_v27, %v52_v26  ;;  %v31_v35 = vld [vmem:[%s2618_s0 + $0x88] sm:$0xff]  ;;  %v42_v36 = vld [vmem:[%s2618_s0 + $0xe0] sm:$0xff]  ;;  %v64_v40 = vpack.c.bf16 %v19_v33, %v18_v32  ;;  %v20_v44 = vld [vmem:[%s2618_s0 + $0x30] sm:$0xff] }
   0xb   :  { %1342 = vmatpush.bf16.msra.mxu2 %v1332_v2  ;;  %1343 = vmatpush.bf16.msra.mxu3 %v1332_v2  ;;  %v43_v37 = vld [vmem:[%s2618_s0 + $0xe8] sm:$0xff]  ;;  %v54_v38 = vld [vmem:[%s2618_s0 + $0x140] sm:$0xff]  ;;  %v70_v41 = vpack.c.bf16 %v31_v35, %v30_v34  ;;  %v21_v45 = vld [vmem:[%s2618_s0 + $0x38] sm:$0xff] }
   0xc   :  { %v55_v39 = vld [vmem:[%s2618_s0 + $0x148] sm:$0xff]  ;;  %v76_v42 = vpack.c.bf16 %v43_v37, %v42_v36  ;;  %v32_v46 = vld [vmem:[%s2618_s0 + $0x90] sm:$0xff]  ;;  %v33_v47 = vld [vmem:[%s2618_s0 + $0x98] sm:$0xff]  ;;  %v65_v52 = vpack.c.bf16 %v21_v45, %v20_v44 }
   0xd   :  { %v82_v43 = vpack.c.bf16 %v55_v39, %v54_v38  ;;  %v44_v48 = vld [vmem:[%s2618_s0 + $0xf0] sm:$0xff]  ;;  %v45_v49 = vld [vmem:[%s2618_s0 + $0xf8] sm:$0xff]  ;;  %v71_v53 = vpack.c.bf16 %v33_v47, %v32_v46  ;;  %v22_v56 = vld [vmem:[%s2618_s0 + $0x40] sm:$0xff] }
   0xe   :  { %157 = vmatpush.bf16.msra.mxu0 %v1331_v3  ;;  %1344 = vmatpush.bf16.msra.mxu1 %v1331_v3  ;;  %v56_v50 = vld [vmem:[%s2618_s0 + $0x150] sm:$0xff]  ;;  %v57_v51 = vld [vmem:[%s2618_s0 + $0x158] sm:$0xff]  ;;  %v77_v54 = vpack.c.bf16 %v45_v49, %v44_v48  ;;  %v23_v57 = vld [vmem:[%s2618_s0 + $0x48] sm:$0xff] }
   0xf   :  { %1345 = vmatpush.bf16.msra.mxu2 %v1331_v3  ;;  %1346 = vmatpush.bf16.msra.mxu3 %v1331_v3  ;;  %v83_v55 = vpack.c.bf16 %v57_v51, %v56_v50  ;;  %v34_v58 = vld [vmem:[%s2618_s0 + $0xa0] sm:$0xff]  ;;  %v35_v59 = vld [vmem:[%s2618_s0 + $0xa8] sm:$0xff]  ;;  %v66_v0 = vpack.c.bf16 %v23_v57, %v22_v56  ;;  %v48_v8 = vld [vmem:[%s2618_s0 + $0x110] sm:$0xff] }
  0x10   :  { %v46_v60 = vld [vmem:[%s2618_s0 + $0x100] sm:$0xff]  ;;  %v47_v61 = vld [vmem:[%s2618_s0 + $0x108] sm:$0xff]  ;;  %v72_v1 = vpack.c.bf16 %v35_v59, %v34_v58  ;;  %v49_v9 = vld [vmem:[%s2618_s0 + $0x118] sm:$0xff] }
  0x11   :  { %v58_v62 = vld [vmem:[%s2618_s0 + $0x160] sm:$0xff]  ;;  %v59_v63 = vld [vmem:[%s2618_s0 + $0x168] sm:$0xff]  ;;  %v78_v2 = vpack.c.bf16 %v47_v61, %v46_v60  ;;  %v60_v10 = vld [vmem:[%s2618_s0 + $0x170] sm:$0xff]  ;;  %v79_v14 = vpack.c.bf16 %v49_v9, %v48_v8 }
  0x12   :  { %158 = vmatpush.bf16.msra.mxu0 %v1330_v4  ;;  %1347 = vmatpush.bf16.msra.mxu1 %v1330_v4  ;;  %v84_v3 = vpack.c.bf16 %v59_v63, %v58_v62  ;;  %v61_v11 = vld [vmem:[%s2618_s0 + $0x178] sm:$0xff] }
  0x13   :  { %1348 = vmatpush.bf16.msra.mxu2 %v1330_v4  ;;  %1349 = vmatpush.bf16.msra.mxu3 %v1330_v4  ;;  %v24_v4 = vld [vmem:[%s2618_s0 + $0x50] sm:$0xff]  ;;  %v85_v15 = vpack.c.bf16 %v61_v11, %v60_v10 }
  0x16   :  { %159 = vmatpush.bf16.msra.mxu0 %v1329_v5  ;;  %1350 = vmatpush.bf16.msra.mxu1 %v1329_v5 }
  0x17   :  { %1351 = vmatpush.bf16.msra.mxu2 %v1329_v5  ;;  %1352 = vmatpush.bf16.msra.mxu3 %v1329_v5  ;;  %v25_v5 = vld [vmem:[%s2618_s0 + $0x58] sm:$0xff] }
  0x18   :  { %v67_v12 = vpack.c.bf16 %v25_v5, %v24_v4 }
  0x1a   :  { %160 = vmatpush.bf16.msra.mxu0 %v1328_v6  ;;  %1353 = vmatpush.bf16.msra.mxu1 %v1328_v6 }
  0x1b   :  { %1354 = vmatpush.bf16.msra.mxu2 %v1328_v6  ;;  %1355 = vmatpush.bf16.msra.mxu3 %v1328_v6  ;;  %v36_v6 = vld [vmem:[%s2618_s0 + $0xb0] sm:$0xff] }
  0x1e   :  { %161 = vmatpush.bf16.msra.mxu0 %v1327_v7  ;;  %1356 = vmatpush.bf16.msra.mxu1 %v1327_v7 }
  0x1f   :  { %1357 = vmatpush.bf16.msra.mxu2 %v1327_v7  ;;  %1358 = vmatpush.bf16.msra.mxu3 %v1327_v7  ;;  %v37_v7 = vld [vmem:[%s2618_s0 + $0xb8] sm:$0xff] }
  0x20   :  { %v73_v13 = vpack.c.bf16 %v37_v7, %v36_v6 }
  0x21   :  { %162 = vmatmul.bf16.vlgmr.msra.gmra.mxu0 %v62_v16  ;;  %192 = vmatmul.bf16.vlgmr.msra.gmra.mxu1 %v68_v17  ;;  %v1744_v16 = vld [vmem:[%s2617_s2] ss:$0 sm:$0xff] }
  0x22   :  { %222 = vmatmul.bf16.vlgmr.msra.gmra.mxu2 %v74_v18  ;;  %252 = vmatmul.bf16.vlgmr.msra.gmra.mxu3 %v80_v19 }
  0x31   :  { %167 = vmatmul.bf16.gmra.mxu0 %v63_v28  ;;  %197 = vmatmul.bf16.gmra.mxu1 %v69_v29 }
  0x32   :  { %227 = vmatmul.bf16.gmra.mxu2 %v75_v30  ;;  %257 = vmatmul.bf16.gmra.mxu3 %v81_v31 }
  0x41   :  { %172 = vmatmul.bf16.gmra.mxu0 %v64_v40  ;;  %202 = vmatmul.bf16.gmra.mxu1 %v70_v41 }
  0x42   :  { %232 = vmatmul.bf16.gmra.mxu2 %v76_v42  ;;  %262 = vmatmul.bf16.gmra.mxu3 %v82_v43 }
  0x51   :  { %177 = vmatmul.bf16.gmra.mxu0 %v65_v52  ;;  %207 = vmatmul.bf16.gmra.mxu1 %v71_v53 }
  0x52   :  { %237 = vmatmul.bf16.gmra.mxu2 %v77_v54  ;;  %267 = vmatmul.bf16.gmra.mxu3 %v83_v55 }
  0x61   :  { %182 = vmatmul.bf16.gmra.mxu0 %v66_v0  ;;  %212 = vmatmul.bf16.gmra.mxu1 %v72_v1 }
  0x62   :  { %242 = vmatmul.bf16.gmra.mxu2 %v78_v2  ;;  %272 = vmatmul.bf16.gmra.mxu3 %v84_v3 }
  0x71   :  { %187 = vmatmul.bf16.gmra.mxu0 %v67_v12  ;;  %217 = vmatmul.bf16.gmra.mxu1 %v73_v13 }
  0x72   :  { %247 = vmatmul.bf16.gmra.mxu2 %v79_v14  ;;  %277 = vmatmul.bf16.gmra.mxu3 %v85_v15 }
  0x9e   :  { %v163_v17 = vpop.f32.mrf.mxu0  ;;  %v193_v18 = vpop.f32.mrf.mxu1 }
  0x9f   :  { %v164_v19 = vadd.f32 %v1744_v16, %v163_v17  ;;  %v194_v20 = vadd.f32 %v1744_v16, %v193_v18 }
  0xa1   :  { %v1279_v21 = vmul.f32 -1.442695, %v164_v19  ;;  %v1291_v22 = vmul.f32 -1.442695, %v194_v20 }
  0xa3   :  { %1360 = vpow2.f32 %v1279_v21 }
  0xa4   :  { %1362 = vpow2.f32 %v1291_v22 }
  0xa5   :  { %v223_v23 = vpop.f32.mrf.mxu2  ;;  %v253_v24 = vpop.f32.mrf.mxu3 }
  0xa6   :  { %v224_v25 = vadd.f32 %v1744_v16, %v223_v23  ;;  %v254_v26 = vadd.f32 %v1744_v16, %v253_v24  ;;  %v165_v27 = vpop.f32.mrf.mxu0  ;;  %v195_v28 = vpop.f32.mrf.mxu1 }
  0xa7   :  { %v166_v29 = vadd.f32 %v1744_v16, %v165_v27  ;;  %v196_v30 = vadd.f32 %v1744_v16, %v195_v28 }
  0xa8   :  { %v1303_v31 = vmul.f32 -1.442695, %v224_v25  ;;  %v1315_v32 = vmul.f32 -1.442695, %v254_v26 }
  0xa9   :  { %v1361_v33 = vpop.eup %1360  ;;  %v1280_v36 = vmul.f32 -1.442695, %v166_v29  ;;  %v1292_v38 = vmul.f32 -1.442695, %v196_v30 }
  0xaa   :  { %v1363_v34 = vpop.eup %1362  ;;  %v1752_v35 = vadd.f32 1.0, %v1361_v33  ;;  %1364 = vpow2.f32 %v1303_v31 }
  0xab   :  { %v1754_v37 = vadd.f32 1.0, %v1363_v34  ;;  %1366 = vpow2.f32 %v1315_v32 }
  0xac   :  { %1368 = vrcp.f32 %v1752_v35  ;;  %v484_v42 = vand.u32 2147483647, %v1752_v35  ;;  %v486_v43 = vand.u32 2147483648, %v1752_v35  ;;  %vm480_vm0 = vweird.f32 %v1752_v35 }
  0xad   :  { %1370 = vrcp.f32 %v1754_v37  ;;  %v225_v39 = vpop.f32.mrf.mxu2  ;;  %v255_v40 = vpop.f32.mrf.mxu3  ;;  %v664_v46 = vand.u32 2147483647, %v1754_v37  ;;  %v666_v50 = vand.u32 2147483648, %v1754_v37  ;;  %vm660_vm1 = vweird.f32 %v1754_v37 }
  0xae   :  { %1372 = vpow2.f32 %v1280_v36  ;;  %v226_v41 = vadd.f32 %v1744_v16, %v225_v39  ;;  %v168_v44 = vpop.f32.mrf.mxu0  ;;  %v256_v48 = vadd.f32 %v1744_v16, %v255_v40  ;;  %v198_v55 = vpop.f32.mrf.mxu1  ;;  %vm1772_vm2 = vcmp.eq.f32.partialorder %v484_v42, 8.507059e+37 }
  0xaf   :  { %1374 = vpow2.f32 %v1292_v38  ;;  %v169_v54 = vadd.f32 %v1744_v16, %v168_v44  ;;  %v487_v59 = vor.u32 1.1754944e-38, %v486_v43  ;;  %vm1778_vm3 = vcmp.eq.f32.partialorder %v664_v46, 8.507059e+37 }
  0xb0   :  { %v1365_v45 = vpop.eup %1364  ;;  %v1304_v47 = vmul.f32 -1.442695, %v226_v41  ;;  %v1316_v63 = vmul.f32 -1.442695, %v256_v48  ;;  %v667_v2 = vor.u32 1.1754944e-38, %v666_v50  ;;  %v199_v3 = vadd.f32 %v1744_v16, %v198_v55 }
  0xb1   :  { %v1367_v49 = vpop.eup %1366  ;;  %v1764_v51 = vadd.f32 1.0, %v1365_v45  ;;  %v1281_v6 = vmul.f32 -1.442695, %v169_v54 }
  0xb2   :  { %v1369_v52 = vpop.eup %1368  ;;  %v1768_v53 = vadd.f32 1.0, %v1367_v49  ;;  %v1793_v17 = vmul.f32 -1.442695, %v199_v3 }
  0xb3   :  { %v1371_v56 = vpop.eup %1370  ;;  %v476_v57 = vmul.f32 %v1369_v52, %v1752_v35  ;;  %1376 = vrcp.f32 %v1764_v51  ;;  %vm481_vm4 = vweird.f32 %v1369_v52  ;;  %v844_v5 = vand.u32 2147483647, %v1764_v51 }
  0xb4   :  { %v1373_v60 = vpop.eup %1372  ;;  %v656_v61 = vmul.f32 %v1371_v56, %v1754_v37  ;;  %1378 = vpow2.f32 %v1304_v47  ;;  %v846_v8 = vand.u32 2147483648, %v1764_v51  ;;  %vm661_vm5 = vweird.f32 %v1371_v56  ;;  %vm482_vm6 = vmor %vm480_vm0, %vm481_vm4 }
  0xb5   :  { %v1375_v0 = vpop.eup %1374  ;;  %v477_v1 = vsub.f32 1.0, %v476_v57  ;;  %1380 = vrcp.f32 %v1768_v53  ;;  %v1786_v9 = vadd.f32 1.0, %v1373_v60  ;;  %v1024_v12 = vand.u32 2147483647, %v1768_v53  ;;  %v228_v21 = vpop.f32.mrf.mxu2  ;;  %vm662_vm9 = vmor %vm660_vm1, %vm661_vm5 }
  0xb6   :  { %v657_v4 = vsub.f32 1.0, %v656_v61  ;;  %v1788_v10 = vadd.f32 1.0, %v1375_v0  ;;  %1382 = vpow2.f32 %v1316_v63  ;;  %v1026_v15 = vand.u32 2147483648, %v1768_v53  ;;  %v258_v48 = vpop.f32.mrf.mxu3  ;;  %v170_v3 = vpop.f32.mrf.mxu0 }
  0xb7   :  { %v478_v7 = vmul.f32 %v1369_v52, %v477_v1  ;;  %1384 = vrcp.f32 %v1786_v9  ;;  %vm840_vm7 = vweird.f32 %v1764_v51  ;;  %vm1020_vm8 = vweird.f32 %v1768_v53 }
  0xb8   :  { %v658_v11 = vmul.f32 %v1371_v56, %v657_v4  ;;  %vm1804_vm10 = vcmp.eq.f32.partialorder %v844_v5, 8.507059e+37  ;;  %v847_v25 = vor.u32 1.1754944e-38, %v846_v8  ;;  %1386 = vrcp.f32 %v1788_v10 }
  0xb9   :  { %v1377_v13 = vpop.eup %1376  ;;  %v479_v14 = vadd.f32 %v1369_v52, %v478_v7  ;;  %vm1812_vm11 = vcmp.eq.f32.partialorder %v1024_v12, 8.507059e+37  ;;  %v1027_v32 = vor.u32 1.1754944e-38, %v1026_v15  ;;  %v499_v33 = vand.u32 2147483647, %v1786_v9 }
  0xba   :  { %v1379_v18 = vpop.eup %1378  ;;  %v659_v19 = vadd.f32 %v1371_v56, %v658_v11  ;;  %v836_v20 = vmul.f32 %v1377_v13, %v1764_v51  ;;  %v229_v34 = vadd.f32 %v1744_v16, %v228_v21  ;;  %vm841_vm12 = vweird.f32 %v1377_v13  ;;  %v200_v21 = vpop.f32.mrf.mxu1 }
  0xbb   :  { %v1381_v22 = vpop.eup %1380  ;;  %v483_v23 = vsel %vm482_vm6, %v1369_v52, %v479_v14  ;;  %v1826_v38 = vadd.f32 1.0, %v1379_v18  ;;  %vm495_vm14 = vweird.f32 %v1786_v9  ;;  %v501_v40 = vand.u32 2147483648, %v1786_v9  ;;  %vm842_vm15 = vmor %vm840_vm7, %vm841_vm12 }
  0xbc   :  { %v488_v26 = vsel %vm1772_vm2, %v487_v59, %v483_v23  ;;  %v663_v27 = vsel %vm662_vm9, %v1371_v56, %v659_v19  ;;  %v837_v28 = vsub.f32 1.0, %v836_v20  ;;  %v1016_v29 = vmul.f32 %v1381_v22, %v1768_v53  ;;  %v1383_v35 = vpop.eup %1382 }
  0xbd   :  { %1195 = vst [vmem:[%s2619_s3] sm:$0xff] %v488_v26  ;;  %v668_v31 = vsel %vm1778_vm3, %v667_v2, %v663_v27  ;;  %v1385_v39 = vpop.eup %1384  ;;  %vm1021_vm13 = vweird.f32 %v1381_v22  ;;  %1388 = vpow2.f32 %v1281_v6  ;;  %v1831_v44 = vadd.f32 1.0, %v1383_v35 }
  0xbe   :  { %1207 = vst [vmem:[%s2619_s3 + $0x60] sm:$0xff] %v668_v31  ;;  %v838_v36 = vmul.f32 %v1377_v13, %v837_v28  ;;  %v1017_v37 = vsub.f32 1.0, %v1016_v29  ;;  %v491_v43 = vmul.f32 %v1385_v39, %v1786_v9  ;;  %v1387_v45 = vpop.eup %1386  ;;  %vm1835_vm0 = vcmp.eq.f32.partialorder %v499_v33, 8.507059e+37  ;;  %vm1022_vm2 = vmor %vm1020_vm8, %vm1021_vm13 }
  0xbf   :  { %vm675_vm1 = vweird.f32 %v1788_v10  ;;  %v679_v47 = vand.u32 2147483647, %v1788_v10  ;;  %1390 = vrcp.f32 %v1826_v38  ;;  %v671_v54 = vmul.f32 %v1387_v45, %v1788_v10 }
  0xc0   :  { %v839_v41 = vadd.f32 %v1377_v13, %v838_v36  ;;  %v1018_v42 = vmul.f32 %v1381_v22, %v1017_v37  ;;  %v492_v52 = vsub.f32 1.0, %v491_v43  ;;  %vm496_vm3 = vweird.f32 %v1385_v39 }
  0xc1   :  { %v681_v55 = vand.u32 2147483648, %v1788_v10  ;;  %v859_v56 = vand.u32 2147483647, %v1826_v38  ;;  %v672_v59 = vsub.f32 1.0, %v671_v54  ;;  %1392 = vrcp.f32 %v1831_v44  ;;  %vm497_vm6 = vmor %vm495_vm14, %vm496_vm3 }
  0xc2   :  { %v843_v49 = vsel %vm842_vm15, %v1377_v13, %v839_v41  ;;  %v1019_v50 = vadd.f32 %v1381_v22, %v1018_v42  ;;  %v493_v58 = vmul.f32 %v1385_v39, %v492_v52  ;;  %v502_v53 = vor.u32 1.1754944e-38, %v501_v40 }
  0xc3   :  { %v848_v51 = vsel %vm1804_vm10, %v847_v25, %v843_v49  ;;  %v1389_v60 = vpop.eup %1388  ;;  %vm1856_vm4 = vcmp.eq.f32.partialorder %v679_v47, 8.507059e+37  ;;  %v861_v63 = vand.u32 2147483648, %v1826_v38  ;;  %v673_v1 = vmul.f32 %v1387_v45, %v672_v59  ;;  %v260_v25 = vpop.f32.mrf.mxu3 }
  0xc4   :  { %1219 = vst [vmem:[%s2619_s3 + $0xc0] sm:$0xff] %v848_v51  ;;  %v1023_v57 = vsel %vm1022_vm2, %v1381_v22, %v1019_v50  ;;  %v494_v0 = vadd.f32 %v1385_v39, %v493_v58  ;;  %vm676_vm5 = vweird.f32 %v1387_v45  ;;  %v1864_v2 = vadd.f32 1.0, %v1389_v60  ;;  %v230_v22 = vpop.f32.mrf.mxu2 }
  0xc5   :  { %v1028_v61 = vsel %vm1812_vm11, %v1027_v32, %v1023_v57  ;;  %v1391_v4 = vpop.eup %1390  ;;  %v682_v5 = vor.u32 1.1754944e-38, %v681_v55  ;;  %vm855_vm7 = vweird.f32 %v1826_v38  ;;  %1394 = vpow2.f32 %v1793_v17  ;;  %vm677_vm9 = vmor %vm675_vm1, %vm676_vm5 }
  0xc6   :  { %1231 = vst [vmem:[%s2619_s3 + $0x120] sm:$0xff] %v1028_v61  ;;  %v1305_v6 = vmul.f32 -1.442695, %v229_v34  ;;  %v498_v7 = vsel %vm497_vm6, %v1385_v39, %v494_v0  ;;  %v674_v8 = vadd.f32 %v1387_v45, %v673_v1  ;;  %v851_v11 = vmul.f32 %v1391_v4, %v1826_v38  ;;  %v173_v1 = vpop.f32.mrf.mxu0 }
  0xc7   :  { %vm1872_vm8 = vcmp.eq.f32.partialorder %v859_v56, 8.507059e+37  ;;  %v259_v13 = vadd.f32 %v1744_v16, %v258_v48  ;;  %v503_v9 = vsel %vm1835_vm0, %v502_v53, %v498_v7  ;;  %v862_v14 = vor.u32 1.1754944e-38, %v861_v63  ;;  %v1393_v17 = vpop.eup %1392 }
  0xc8   :  { %1396 = vrcp.f32 %v1864_v2  ;;  %v171_v15 = vadd.f32 %v1744_v16, %v170_v3  ;;  %1196 = vst [vmem:[%s2619_s3 + $0x8] sm:$0xff] %v503_v9  ;;  %v678_v18 = vsel %vm677_vm9, %v1387_v45, %v674_v8  ;;  %v852_v19 = vsub.f32 1.0, %v851_v11 }
  0xc9   :  { %vm1035_vm10 = vweird.f32 %v1831_v44  ;;  %v1039_v20 = vand.u32 2147483647, %v1831_v44  ;;  %v683_v10 = vsel %vm1856_vm4, %v682_v5, %v678_v18  ;;  %v1031_v23 = vmul.f32 %v1393_v17, %v1831_v44 }
  0xca   :  { %v1041_v24 = vand.u32 2147483648, %v1831_v44  ;;  %1398 = vpow2.f32 %v1305_v6  ;;  %1208 = vst [vmem:[%s2619_s3 + $0x68] sm:$0xff] %v683_v10  ;;  %v853_v26 = vmul.f32 %v1391_v4, %v852_v19  ;;  %vm856_vm11 = vweird.f32 %v1391_v4 }
  0xcb   :  { %vm1036_vm12 = vweird.f32 %v1393_v17  ;;  %v1317_v27 = vmul.f32 -1.442695, %v259_v13  ;;  %v1395_v28 = vpop.eup %1394  ;;  %v1032_v29 = vsub.f32 1.0, %v1031_v23  ;;  %v1282_v30 = vmul.f32 -1.442695, %v171_v15  ;;  %vm857_vm13 = vmor %vm855_vm7, %vm856_vm11 }
  0xcc   :  { %v201_v31 = vadd.f32 %v1744_v16, %v200_v21  ;;  %v231_v32 = vadd.f32 %v1744_v16, %v230_v22  ;;  %v854_v33 = vadd.f32 %v1391_v4, %v853_v26  ;;  %v1898_v34 = vadd.f32 1.0, %v1395_v28  ;;  %vm1037_vm0 = vmor %vm1035_vm10, %vm1036_vm12 }
  0xcd   :  { %1400 = vpow2.f32 %v1317_v27  ;;  %v261_v35 = vadd.f32 %v1744_v16, %v260_v25  ;;  %v1033_v37 = vmul.f32 %v1393_v17, %v1032_v29  ;;  %vm1903_vm14 = vcmp.eq.f32.partialorder %v1039_v20, 8.507059e+37 }
  0xce   :  { %v1397_v36 = vpop.eup %1396  ;;  %1402 = vpow2.f32 %v1282_v30  ;;  %v1294_v39 = vmul.f32 -1.442695, %v201_v31  ;;  %v1306_v40 = vmul.f32 -1.442695, %v231_v32  ;;  %v858_v41 = vsel %vm857_vm13, %v1391_v4, %v854_v33 }
  0xcf   :  { %v506_v43 = vmul.f32 %v1397_v36, %v1864_v2  ;;  %1404 = vrcp.f32 %v1898_v34  ;;  %v863_v46 = vsel %vm1872_vm8, %v862_v14, %v858_v41  ;;  %v1034_v47 = vadd.f32 %v1393_v17, %v1033_v37 }
  0xd0   :  { %v1399_v45 = vpop.eup %1398  ;;  %v1042_v38 = vor.u32 1.1754944e-38, %v1041_v24  ;;  %vm510_vm15 = vweird.f32 %v1864_v2  ;;  %1220 = vst [vmem:[%s2619_s3 + $0xc8] sm:$0xff] %v863_v46  ;;  %v514_v49 = vand.u32 2147483647, %v1864_v2  ;;  %1406 = vpow2.f32 %v1294_v39 }
  0xd1   :  { %v507_v48 = vsub.f32 1.0, %v506_v43  ;;  %v1919_v50 = vadd.f32 1.0, %v1399_v45  ;;  %v1038_v52 = vsel %vm1037_vm0, %v1393_v17, %v1034_v47  ;;  %v516_v54 = vand.u32 2147483648, %v1864_v2 }
  0xd2   :  { %1408 = vpow2.f32 %v1306_v40  ;;  %v1318_v51 = vmul.f32 -1.442695, %v261_v35  ;;  %v1043_v56 = vsel %vm1903_vm14, %v1042_v38, %v1038_v52  ;;  %vm511_vm1 = vweird.f32 %v1397_v36 }
  0xd3   :  { %v1401_v55 = vpop.eup %1400  ;;  %v508_v57 = vmul.f32 %v1397_v36, %v507_v48  ;;  %1410 = vrcp.f32 %v1919_v50  ;;  %1232 = vst [vmem:[%s2619_s3 + $0x128] sm:$0xff] %v1043_v56  ;;  %v694_v58 = vand.u32 2147483647, %v1898_v34  ;;  %v696_v53 = vand.u32 2147483648, %v1898_v34  ;;  %vm512_vm2 = vmor %vm510_vm15, %vm511_vm1 }
  0xd4   :  { %v1403_v44 = vpop.eup %1402  ;;  %v1929_v59 = vadd.f32 1.0, %v1401_v55  ;;  %1412 = vpow2.f32 %v1318_v51  ;;  %vm515_vm3 = vcmp.eq.f32.partialorder %v514_v49, 8.507059e+37  ;;  %v517_v63 = vor.u32 1.1754944e-38, %v516_v54  ;;  %v233_v49 = vpop.f32.mrf.mxu2 }
  0xd5   :  { %v1405_v60 = vpop.eup %1404  ;;  %v509_v61 = vadd.f32 %v1397_v36, %v508_v57  ;;  %v1932_v62 = vadd.f32 1.0, %v1403_v44  ;;  %v874_v5 = vand.u32 2147483647, %v1919_v50  ;;  %v876_v6 = vand.u32 2147483648, %v1919_v50 }
  0xd6   :  { %v686_v0 = vmul.f32 %v1405_v60, %v1898_v34  ;;  %v1407_v3 = vpop.eup %1406  ;;  %1414 = vrcp.f32 %v1929_v59  ;;  %vm690_vm4 = vweird.f32 %v1898_v34  ;;  %vm1945_vm5 = vcmp.eq.f32.partialorder %v694_v58, 8.507059e+37  ;;  %v203_v34 = vpop.f32.mrf.mxu1 }
  0xd7   :  { %v513_v4 = vsel %vm512_vm2, %v1397_v36, %v509_v61  ;;  %1416 = vrcp.f32 %v1932_v62  ;;  %v697_v13 = vor.u32 1.1754944e-38, %v696_v53  ;;  %vm870_vm6 = vweird.f32 %v1919_v50 }
  0xd8   :  { %v1409_v7 = vpop.eup %1408  ;;  %v518_v8 = vsel %vm515_vm3, %v517_v63, %v513_v4  ;;  %v687_v11 = vsub.f32 1.0, %v686_v0  ;;  %v174_v9 = vadd.f32 %v1744_v16, %v173_v1  ;;  %vm691_vm7 = vweird.f32 %v1405_v60 }
  0xd9   :  { %v1411_v2 = vpop.eup %1410  ;;  %1197 = vst [vmem:[%s2619_s3 + $0x10] sm:$0xff] %v518_v8  ;;  %v1054_v17 = vand.u32 2147483647, %v1929_v59  ;;  %vm1953_vm8 = vcmp.eq.f32.partialorder %v874_v5, 8.507059e+37  ;;  %v877_v20 = vor.u32 1.1754944e-38, %v876_v6  ;;  %v1056_v21 = vand.u32 2147483648, %v1929_v59  ;;  %vm692_vm10 = vmor %vm690_vm4, %vm691_vm7  ;;  %v263_v6 = vpop.f32.mrf.mxu3 }
  0xda   :  { %v688_v14 = vmul.f32 %v1405_v60, %v687_v11  ;;  %v866_v15 = vmul.f32 %v1411_v2, %v1919_v50  ;;  %v1413_v18 = vpop.eup %1412  ;;  %v1958_v22 = vadd.f32 1.0, %v1407_v3  ;;  %vm1050_vm9 = vweird.f32 %v1929_v59 }
  0xdb   :  { %v1961_v24 = vadd.f32 1.0, %v1409_v7  ;;  %vm871_vm11 = vweird.f32 %v1411_v2  ;;  %vm525_vm12 = vweird.f32 %v1932_v62  ;;  %v529_v26 = vand.u32 2147483647, %v1932_v62  ;;  %v175_v7 = vpop.f32.mrf.mxu0 }
  0xdc   :  { %v689_v10 = vadd.f32 %v1405_v60, %v688_v14  ;;  %v867_v23 = vsub.f32 1.0, %v866_v15  ;;  %v1415_v25 = vpop.eup %1414  ;;  %v531_v27 = vand.u32 2147483648, %v1932_v62  ;;  %1418 = vrcp.f32 %v1958_v22  ;;  %vm872_vm14 = vmor %vm870_vm6, %vm871_vm11 }
  0xdd   :  { %v1417_v28 = vpop.eup %1416  ;;  %v1046_v31 = vmul.f32 %v1415_v25, %v1929_v59  ;;  %vm1970_vm13 = vcmp.eq.f32.partialorder %v1054_v17, 8.507059e+37  ;;  %v1974_v33 = vadd.f32 1.0, %v1413_v18  ;;  %v1057_v36 = vor.u32 1.1754944e-38, %v1056_v21 }
  0xde   :  { %v693_v29 = vsel %vm692_vm10, %v1405_v60, %v689_v10  ;;  %v868_v30 = vmul.f32 %v1411_v2, %v867_v23  ;;  %v521_v37 = vmul.f32 %v1417_v28, %v1932_v62  ;;  %v709_v39 = vand.u32 2147483647, %v1958_v22 }
  0xdf   :  { %v698_v35 = vsel %vm1945_vm5, %v697_v13, %v693_v29  ;;  %v1047_v41 = vsub.f32 1.0, %v1046_v31  ;;  %v711_v42 = vand.u32 2147483648, %v1958_v22  ;;  %1420 = vrcp.f32 %v1961_v24  ;;  %v205_v13 = vpop.f32.mrf.mxu1  ;;  %v235_v29 = vpop.f32.mrf.mxu2 }
  0xe0   :  { %1209 = vst [vmem:[%s2619_s3 + $0x70] sm:$0xff] %v698_v35  ;;  %v869_v40 = vadd.f32 %v1411_v2, %v868_v30  ;;  %v522_v43 = vsub.f32 1.0, %v521_v37  ;;  %vm1988_vm15 = vcmp.eq.f32.partialorder %v529_v26, 8.507059e+37  ;;  %v532_v46 = vor.u32 1.1754944e-38, %v531_v27 }
  0xe1   :  { %v1283_v47 = vmul.f32 -1.442695, %v174_v9  ;;  %v1048_v48 = vmul.f32 %v1415_v25, %v1047_v41  ;;  %vm1051_vm0 = vweird.f32 %v1415_v25  ;;  %1422 = vrcp.f32 %v1974_v33  ;;  %v265_v45 = vpop.f32.mrf.mxu3 }
  0xe2   :  { %v873_v38 = vsel %vm872_vm14, %v1411_v2, %v869_v40  ;;  %v1419_v52 = vpop.eup %1418  ;;  %v523_v51 = vmul.f32 %v1417_v28, %v522_v43  ;;  %vm526_vm1 = vweird.f32 %v1417_v28  ;;  %vm705_vm2 = vweird.f32 %v1958_v22  ;;  %vm1052_vm4 = vmor %vm1050_vm9, %vm1051_vm0 }
  0xe3   :  { %v878_v54 = vsel %vm1953_vm8, %v877_v20, %v873_v38  ;;  %v1049_v50 = vadd.f32 %v1415_v25, %v1048_v48  ;;  %v701_v55 = vmul.f32 %v1419_v52, %v1958_v22  ;;  %vm2000_vm3 = vcmp.eq.f32.partialorder %v709_v39, 8.507059e+37  ;;  %vm527_vm6 = vmor %vm525_vm12, %vm526_vm1  ;;  %v178_v48 = vpop.f32.mrf.mxu0 }
  0xe4   :  { %1221 = vst [vmem:[%s2619_s3 + $0xd0] sm:$0xff] %v878_v54  ;;  %v712_v57 = vor.u32 1.1754944e-38, %v711_v42  ;;  %v889_v44 = vand.u32 2147483647, %v1961_v24  ;;  %v524_v58 = vadd.f32 %v1417_v28, %v523_v51  ;;  %vm885_vm5 = vweird.f32 %v1961_v24 }
  0xe5   :  { %v891_v60 = vand.u32 2147483648, %v1961_v24  ;;  %1424 = vpow2.f32 %v1283_v47  ;;  %v204_v61 = vadd.f32 %v1744_v16, %v203_v34  ;;  %v1421_v53 = vpop.eup %1420  ;;  %v1053_v63 = vsel %vm1052_vm4, %v1415_v25, %v1049_v50 }
  0xe6   :  { %v702_v0 = vsub.f32 1.0, %v701_v55  ;;  %vm706_vm7 = vweird.f32 %v1419_v52  ;;  %v234_v1 = vadd.f32 %v1744_v16, %v233_v49  ;;  %v1058_v59 = vsel %vm1970_vm13, %v1057_v36, %v1053_v63 }
  0xe7   :  { %v528_v3 = vsel %vm527_vm6, %v1417_v28, %v524_v58  ;;  %v881_v4 = vmul.f32 %v1421_v53, %v1961_v24  ;;  %vm1065_vm8 = vweird.f32 %v1974_v33  ;;  %v1069_v5 = vand.u32 2147483647, %v1974_v33  ;;  %v1423_v8 = vpop.eup %1422  ;;  %1233 = vst [vmem:[%s2619_s3 + $0x130] sm:$0xff] %v1058_v59  ;;  %vm707_vm10 = vmor %vm705_vm2, %vm706_vm7 }
  0xe8   :  { %v533_v62 = vsel %vm1988_vm15, %v532_v46, %v528_v3  ;;  %v703_v11 = vmul.f32 %v1419_v52, %v702_v0  ;;  %v1071_v2 = vand.u32 2147483648, %v1974_v33  ;;  %v1295_v12 = vmul.f32 -1.442695, %v204_v61 }
  0xe9   :  { %1198 = vst [vmem:[%s2619_s3 + $0x18] sm:$0xff] %v533_v62  ;;  %v882_v9 = vsub.f32 1.0, %v881_v4  ;;  %vm886_vm9 = vweird.f32 %v1421_v53  ;;  %v1061_v14 = vmul.f32 %v1423_v8, %v1974_v33  ;;  %v1307_v15 = vmul.f32 -1.442695, %v234_v1 }
  0xea   :  { %v704_v17 = vadd.f32 %v1419_v52, %v703_v11  ;;  %1426 = vpow2.f32 %v1295_v12  ;;  %v264_v18 = vadd.f32 %v1744_v16, %v263_v6  ;;  %v176_v19 = vadd.f32 %v1744_v16, %v175_v7  ;;  %vm887_vm12 = vmor %vm885_vm5, %vm886_vm9 }
  0xeb   :  { %v1425_v20 = vpop.eup %1424  ;;  %v883_v21 = vmul.f32 %v1421_v53, %v882_v9  ;;  %v1062_v10 = vsub.f32 1.0, %v1061_v14  ;;  %1428 = vpow2.f32 %v1307_v15  ;;  %v206_v23 = vadd.f32 %v1744_v16, %v205_v13 }
  0xec   :  { %v708_v25 = vsel %vm707_vm10, %v1419_v52, %v704_v17  ;;  %v2035_v26 = vadd.f32 1.0, %v1425_v20  ;;  %v1319_v27 = vmul.f32 -1.442695, %v264_v18  ;;  %v1284_v28 = vmul.f32 -1.442695, %v176_v19 }
  0xed   :  { %v713_v30 = vsel %vm2000_vm3, %v712_v57, %v708_v25  ;;  %v884_v31 = vadd.f32 %v1421_v53, %v883_v21  ;;  %v1063_v32 = vmul.f32 %v1423_v8, %v1062_v10  ;;  %vm1066_vm11 = vweird.f32 %v1423_v8 }
  0xee   :  { %1210 = vst [vmem:[%s2619_s3 + $0x78] sm:$0xff] %v713_v30  ;;  %vm890_vm13 = vcmp.eq.f32.partialorder %v889_v44, 8.507059e+37  ;;  %v892_v22 = vor.u32 1.1754944e-38, %v891_v60  ;;  %1430 = vrcp.f32 %v2035_v26  ;;  %v1296_v34 = vmul.f32 -1.442695, %v206_v23  ;;  %vm1067_vm14 = vmor %vm1065_vm8, %vm1066_vm11  ;;  %v2103_v23 = vpop.f32.mrf.mxu1 }
  0xef   :  { %v888_v35 = vsel %vm887_vm12, %v1421_v53, %v884_v31  ;;  %v1064_v36 = vadd.f32 %v1423_v8, %v1063_v32  ;;  %1432 = vpow2.f32 %v1319_v27  ;;  %v236_v37 = vadd.f32 %v1744_v16, %v235_v29 }
  0xf0   :  { %v1427_v39 = vpop.eup %1426  ;;  %v893_v40 = vsel %vm890_vm13, %v892_v22, %v888_v35  ;;  %v1072_v41 = vor.u32 1.1754944e-38, %v1071_v2  ;;  %1434 = vpow2.f32 %v1284_v28  ;;  %vm1070_vm15 = vcmp.eq.f32.partialorder %v1069_v5, 8.507059e+37 }
  0xf1   :  { %v1429_v42 = vpop.eup %1428  ;;  %1222 = vst [vmem:[%s2619_s3 + $0xd8] sm:$0xff] %v893_v40  ;;  %v1068_v24 = vsel %vm1067_vm14, %v1423_v8, %v1064_v36  ;;  %v2052_v43 = vadd.f32 1.0, %v1427_v39  ;;  %1436 = vpow2.f32 %v1296_v34  ;;  %v1308_v38 = vmul.f32 -1.442695, %v236_v37  ;;  %v238_v39 = vpop.f32.mrf.mxu2 }
  0xf2   :  { %v1073_v46 = vsel %vm1070_vm15, %v1072_v41, %v1068_v24  ;;  %v2054_v47 = vadd.f32 1.0, %v1429_v42  ;;  %v544_v33 = vand.u32 2147483647, %v2035_v26  ;;  %v546_v52 = vand.u32 2147483648, %v2035_v26 }
  0xf3   :  { %1234 = vst [vmem:[%s2619_s3 + $0x138] sm:$0xff] %v1073_v46  ;;  %1438 = vrcp.f32 %v2052_v43  ;;  %v266_v54 = vadd.f32 %v1744_v16, %v265_v45  ;;  %vm540_vm0 = vweird.f32 %v2035_v26  ;;  %v724_v55 = vand.u32 2147483647, %v2052_v43 }
  0xf4   :  { %v1431_v49 = vpop.eup %1430  ;;  %1440 = vrcp.f32 %v2054_v47  ;;  %v179_v56 = vadd.f32 %v1744_v16, %v178_v48  ;;  %v726_v44 = vand.u32 2147483648, %v2052_v43  ;;  %v906_v58 = vand.u32 2147483648, %v2054_v47 }
  0xf5   :  { %v1433_v51 = vpop.eup %1432  ;;  %v536_v50 = vmul.f32 %v1431_v49, %v2035_v26  ;;  %1442 = vpow2.f32 %v1308_v38  ;;  %vm2072_vm1 = vcmp.eq.f32.partialorder %v544_v33, 8.507059e+37  ;;  %v904_v63 = vand.u32 2147483647, %v2054_v47 }
  0xf6   :  { %v1435_v57 = vpop.eup %1434  ;;  %v2070_v60 = vadd.f32 1.0, %v1433_v51  ;;  %v547_v59 = vor.u32 1.1754944e-38, %v546_v52  ;;  %vm720_vm2 = vweird.f32 %v2052_v43  ;;  %v1320_v16 = vmul.f32 -1.442695, %v266_v54  ;;  %v268_v54 = vpop.f32.mrf.mxu3 }
  0xf7   :  { %v537_v61 = vsub.f32 1.0, %v536_v50  ;;  %v2077_v0 = vadd.f32 1.0, %v1435_v57  ;;  %v1437_v1 = vpop.eup %1436  ;;  %vm541_vm3 = vweird.f32 %v1431_v49  ;;  %vm900_vm4 = vweird.f32 %v2054_v47 }
  0xf8   :  { %1444 = vrcp.f32 %v2070_v60  ;;  %v1285_v5 = vmul.f32 -1.442695, %v179_v56  ;;  %vm2084_vm5 = vcmp.eq.f32.partialorder %v724_v55, 8.507059e+37  ;;  %v727_v62 = vor.u32 1.1754944e-38, %v726_v44  ;;  %vm542_vm7 = vmor %vm540_vm0, %vm541_vm3 }
  0xf9   :  { %v1439_v3 = vpop.eup %1438  ;;  %v538_v4 = vmul.f32 %v1431_v49, %v537_v61  ;;  %1446 = vrcp.f32 %v2077_v0  ;;  %v907_v11 = vor.u32 1.1754944e-38, %v906_v58  ;;  %v1084_v2 = vand.u32 2147483647, %v2070_v60  ;;  %v180_v61 = vpop.f32.mrf.mxu0 }
  0xfa   :  { %v1441_v6 = vpop.eup %1440  ;;  %v716_v7 = vmul.f32 %v1439_v3, %v2052_v43  ;;  %vm2090_vm6 = vcmp.eq.f32.partialorder %v904_v63, 8.507059e+37  ;;  %v1086_v14 = vand.u32 2147483648, %v2070_v60  ;;  %v559_v15 = vand.u32 2147483647, %v2077_v0 }
  0xfb   :  { %v539_v12 = vadd.f32 %v1431_v49, %v538_v4  ;;  %v896_v13 = vmul.f32 %v1441_v6, %v2054_v47  ;;  %v1443_v17 = vpop.eup %1442  ;;  %vm721_vm8 = vweird.f32 %v1439_v3  ;;  %v2099_v19 = vadd.f32 1.0, %v1437_v1 }
  0xfc   :  { %v717_v18 = vsub.f32 1.0, %v716_v7  ;;  %1448 = vpow2.f32 %v1320_v16  ;;  %v2101_v10 = vadd.f32 1.0, %v1443_v17  ;;  %v561_v26 = vand.u32 2147483648, %v2077_v0  ;;  %vm722_vm13 = vmor %vm720_vm2, %vm721_vm8 }
  0xfd   :  { %v543_v20 = vsel %vm542_vm7, %v1431_v49, %v539_v12  ;;  %v897_v21 = vsub.f32 1.0, %v896_v13  ;;  %1450 = vpow2.f32 %v1285_v5  ;;  %vm901_vm9 = vweird.f32 %v1441_v6  ;;  %v240_v13 = vpop.f32.mrf.mxu2 }
  0xfe   :  { %v1445_v25 = vpop.eup %1444  ;;  %v548_v27 = vsel %vm2072_vm1, %v547_v59, %v543_v20  ;;  %v718_v28 = vmul.f32 %v1439_v3, %v717_v18  ;;  %1452 = vrcp.f32 %v2099_v19  ;;  %vm1080_vm10 = vweird.f32 %v2070_v60  ;;  %vm902_vm14 = vmor %vm900_vm4, %vm901_vm9 }
  0xff   :  { %v1447_v29 = vpop.eup %1446  ;;  %1199 = vst [vmem:[%s2619_s3 + $0x20] sm:$0xff] %v548_v27  ;;  %v898_v30 = vmul.f32 %v1441_v6, %v897_v21  ;;  %v1076_v31 = vmul.f32 %v1445_v25, %v2070_v60  ;;  %vm2114_vm11 = vcmp.eq.f32.partialorder %v1084_v2, 8.507059e+37  ;;  %vm555_vm12 = vweird.f32 %v2077_v0  ;;  %v210_v60 = vpop.f32.mrf.mxu1 }
 0x100   :  { %v719_v32 = vadd.f32 %v1439_v3, %v718_v28  ;;  %v551_v34 = vmul.f32 %v1447_v29, %v2077_v0  ;;  %v1087_v37 = vor.u32 1.1754944e-38, %v1086_v14  ;;  %1454 = vrcp.f32 %v2101_v10 }
 0x101   :  { %v899_v35 = vadd.f32 %v1441_v6, %v898_v30  ;;  %v1077_v36 = vsub.f32 1.0, %v1076_v31  ;;  %vm2127_vm15 = vcmp.eq.f32.partialorder %v559_v15, 8.507059e+37  ;;  %v562_v45 = vor.u32 1.1754944e-38, %v561_v26  ;;  %v2186_v15 = vld [vmem:[%s2617_s2] ss:$0 sm:$0xff] }
 0x102   :  { %v1449_v40 = vpop.eup %1448  ;;  %v723_v41 = vsel %vm722_vm13, %v1439_v3, %v719_v32  ;;  %v552_v42 = vsub.f32 1.0, %v551_v34  ;;  %vm1081_vm0 = vweird.f32 %v1445_v25  ;;  %vm556_vm1 = vweird.f32 %v1447_v29 }
 0x103   :  { %v1451_v43 = vpop.eup %1450  ;;  %v728_v46 = vsel %vm2084_vm5, %v727_v62, %v723_v41  ;;  %v903_v38 = vsel %vm902_vm14, %v1441_v6, %v899_v35  ;;  %v1078_v48 = vmul.f32 %v1445_v25, %v1077_v36  ;;  %v739_v52 = vand.u32 2147483647, %v2099_v19  ;;  %vm1082_vm3 = vmor %vm1080_vm10, %vm1081_vm0  ;;  %v183_v41 = vpop.f32.mrf.mxu0 }
 0x104   :  { %v1453_v33 = vpop.eup %1452  ;;  %1211 = vst [vmem:[%s2619_s3 + $0x80] sm:$0xff] %v728_v46  ;;  %v908_v47 = vsel %vm2090_vm6, %v907_v11, %v903_v38  ;;  %v553_v49 = vmul.f32 %v1447_v29, %v552_v42  ;;  %vm735_vm2 = vweird.f32 %v2099_v19  ;;  %v2144_v55 = vadd.f32 1.0, %v1449_v40  ;;  %vm557_vm4 = vmor %vm555_vm12, %vm556_vm1 }
 0x105   :  { %1223 = vst [vmem:[%s2619_s3 + $0xe0] sm:$0xff] %v908_v47  ;;  %v1079_v51 = vadd.f32 %v1445_v25, %v1078_v48  ;;  %v731_v50 = vmul.f32 %v1453_v33, %v2099_v19  ;;  %v741_v57 = vand.u32 2147483648, %v2099_v19  ;;  %v919_v44 = vand.u32 2147483647, %v2101_v10 }
 0x106   :  { %v554_v56 = vadd.f32 %v1447_v29, %v553_v49  ;;  %v2150_v58 = vadd.f32 1.0, %v1451_v43  ;;  %v1455_v53 = vpop.eup %1454  ;;  %v921_v59 = vand.u32 2147483648, %v2101_v10  ;;  %1456 = vrcp.f32 %v2144_v55 }
 0x107   :  { %v1083_v63 = vsel %vm1082_vm3, %v1445_v25, %v1079_v51  ;;  %v732_v1 = vsub.f32 1.0, %v731_v50  ;;  %vm2159_vm5 = vcmp.eq.f32.partialorder %v739_v52, 8.507059e+37  ;;  %v911_v5 = vmul.f32 %v1455_v53, %v2101_v10  ;;  %v243_v50 = vpop.f32.mrf.mxu2 }
 0x108   :  { %v1088_v16 = vsel %vm2114_vm11, %v1087_v37, %v1083_v63  ;;  %v558_v3 = vsel %vm557_vm4, %v1447_v29, %v554_v56  ;;  %vm736_vm6 = vweird.f32 %v1453_v33  ;;  %vm915_vm7 = vweird.f32 %v2101_v10  ;;  %v213_v10 = vpop.f32.mrf.mxu1 }
 0x109   :  { %1235 = vst [vmem:[%s2619_s3 + $0x140] sm:$0xff] %v1088_v16  ;;  %v563_v0 = vsel %vm2127_vm15, %v562_v45, %v558_v3  ;;  %v733_v6 = vmul.f32 %v1453_v33, %v732_v1  ;;  %v742_v7 = vor.u32 1.1754944e-38, %v741_v57  ;;  %v912_v8 = vsub.f32 1.0, %v911_v5  ;;  %vm737_vm10 = vmor %vm735_vm2, %vm736_vm6 }
 0x10a   :  { %1200 = vst [vmem:[%s2619_s3 + $0x28] sm:$0xff] %v563_v0  ;;  %v1101_v62 = vand.u32 2147483648, %v2144_v55  ;;  %1458 = vrcp.f32 %v2150_v58  ;;  %vm916_vm8 = vweird.f32 %v1455_v53  ;;  %vm2175_vm9 = vcmp.eq.f32.partialorder %v919_v44, 8.507059e+37 }
 0x10b   :  { %v734_v11 = vadd.f32 %v1453_v33, %v733_v6  ;;  %v922_v12 = vor.u32 1.1754944e-38, %v921_v59  ;;  %v913_v9 = vmul.f32 %v1455_v53, %v912_v8  ;;  %vm1095_vm11 = vweird.f32 %v2144_v55  ;;  %vm917_vm13 = vmor %vm915_vm7, %vm916_vm8 }
 0x10c   :  { %v1099_v14 = vand.u32 2147483647, %v2144_v55  ;;  %v209_v17 = vadd.f32 %v2186_v15, %v2103_v23  ;;  %v239_v18 = vadd.f32 %v2186_v15, %v238_v39  ;;  %v1457_v20 = vpop.eup %1456  ;;  %vm570_vm12 = vweird.f32 %v2150_v58  ;;  %v270_v23 = vpop.f32.mrf.mxu3 }
 0x10d   :  { %v738_v21 = vsel %vm737_vm10, %v1453_v33, %v734_v11  ;;  %v574_v19 = vand.u32 2147483647, %v2150_v58  ;;  %v269_v25 = vadd.f32 %v2186_v15, %v268_v54  ;;  %v181_v27 = vadd.f32 %v2186_v15, %v180_v61 }
 0x10e   :  { %v743_v28 = vsel %vm2159_vm5, %v742_v7, %v738_v21  ;;  %v914_v26 = vadd.f32 %v1455_v53, %v913_v9  ;;  %v1091_v29 = vmul.f32 %v1457_v20, %v2144_v55  ;;  %v1102_v30 = vor.u32 1.1754944e-38, %v1101_v62  ;;  %v185_v7 = vpop.f32.mrf.mxu0 }
 0x10f   :  { %1212 = vst [vmem:[%s2619_s3 + $0x88] sm:$0xff] %v743_v28  ;;  %v1297_v31 = vmul.f32 -1.442695, %v209_v17  ;;  %v1309_v32 = vmul.f32 -1.442695, %v239_v18  ;;  %v211_v22 = vadd.f32 %v2186_v15, %v210_v60  ;;  %v241_v34 = vadd.f32 %v2186_v15, %v240_v13 }
 0x110   :  { %v1459_v35 = vpop.eup %1458  ;;  %v918_v36 = vsel %vm917_vm13, %v1455_v53, %v914_v26  ;;  %v1092_v37 = vsub.f32 1.0, %v1091_v29  ;;  %v1321_v39 = vmul.f32 -1.442695, %v269_v25  ;;  %v1286_v40 = vmul.f32 -1.442695, %v181_v27  ;;  %v215_v62 = vpop.f32.mrf.mxu1 }
 0x111   :  { %v923_v42 = vsel %vm2175_vm9, %v922_v12, %v918_v36  ;;  %vm1096_vm14 = vweird.f32 %v1457_v20  ;;  %v566_v24 = vmul.f32 %v1459_v35, %v2150_v58  ;;  %1460 = vpow2.f32 %v1297_v31 }
 0x112   :  { %1224 = vst [vmem:[%s2619_s3 + $0xe8] sm:$0xff] %v923_v42  ;;  %v1093_v45 = vmul.f32 %v1457_v20, %v1092_v37  ;;  %1462 = vpow2.f32 %v1309_v32  ;;  %v1298_v43 = vmul.f32 -1.442695, %v211_v22  ;;  %v1310_v46 = vmul.f32 -1.442695, %v241_v34  ;;  %vm1097_vm0 = vmor %vm1095_vm11, %vm1096_vm14 }
 0x113   :  { %v567_v38 = vsub.f32 1.0, %v566_v24  ;;  %v576_v48 = vand.u32 2147483648, %v2150_v58  ;;  %1464 = vpow2.f32 %v1321_v39  ;;  %v271_v33 = vadd.f32 %v2186_v15, %v270_v23 }
 0x114   :  { %v1094_v47 = vadd.f32 %v1457_v20, %v1093_v45  ;;  %vm571_vm15 = vweird.f32 %v1459_v35  ;;  %1466 = vpow2.f32 %v1286_v40  ;;  %v184_v49 = vadd.f32 %v2186_v15, %v183_v41  ;;  %v273_v60 = vpop.f32.mrf.mxu3 }
 0x115   :  { %v568_v52 = vmul.f32 %v1459_v35, %v567_v38  ;;  %1468 = vpow2.f32 %v1298_v43  ;;  %v1322_v54 = vmul.f32 -1.442695, %v271_v33  ;;  %v214_v51 = vadd.f32 %v2186_v15, %v213_v10  ;;  %vm572_vm3 = vmor %vm570_vm12, %vm571_vm15 }
 0x116   :  { %v1098_v56 = vsel %vm1097_vm0, %v1457_v20, %v1094_v47  ;;  %vm1100_vm1 = vcmp.eq.f32.partialorder %v1099_v14, 8.507059e+37  ;;  %1470 = vpow2.f32 %v1310_v46  ;;  %vm575_vm2 = vcmp.eq.f32.partialorder %v574_v19, 8.507059e+37 }
 0x117   :  { %v1461_v57 = vpop.eup %1460  ;;  %v1103_v44 = vsel %vm1100_vm1, %v1102_v30, %v1098_v56  ;;  %v569_v61 = vadd.f32 %v1459_v35, %v568_v52  ;;  %v577_v55 = vor.u32 1.1754944e-38, %v576_v48  ;;  %v1287_v1 = vmul.f32 -1.442695, %v184_v49 }
 0x118   :  { %v1463_v53 = vpop.eup %1462  ;;  %1236 = vst [vmem:[%s2619_s3 + $0x148] sm:$0xff] %v1103_v44  ;;  %v2225_v63 = vadd.f32 1.0, %v1461_v57  ;;  %v244_v59 = vadd.f32 %v2186_v15, %v243_v50  ;;  %1472 = vpow2.f32 %v1322_v54  ;;  %v1299_v5 = vmul.f32 -1.442695, %v214_v51 }
 0x119   :  { %v1465_v16 = vpop.eup %1464  ;;  %v573_v3 = vsel %vm572_vm3, %v1459_v35, %v569_v61  ;;  %v2228_v4 = vadd.f32 1.0, %v1463_v53  ;;  %v274_v8 = vadd.f32 %v2186_v15, %v273_v60  ;;  %v2246_v17 = vadd.f32 %v2186_v15, %v185_v7 }
 0x11a   :  { %v1467_v0 = vpop.eup %1466  ;;  %v578_v6 = vsel %vm575_vm2, %v577_v55, %v573_v3  ;;  %1474 = vrcp.f32 %v2225_v63  ;;  %v2236_v2 = vadd.f32 1.0, %v1465_v16  ;;  %v2240_v13 = vmul.f32 -1.442695, %v244_v59 }
 0x11b   :  { %v1469_v58 = vpop.eup %1468  ;;  %1201 = vst [vmem:[%s2619_s3 + $0x30] sm:$0xff] %v578_v6  ;;  %1476 = vrcp.f32 %v2228_v4  ;;  %v2238_v12 = vadd.f32 1.0, %v1467_v0  ;;  %v754_v9 = vand.u32 2147483647, %v2225_v63  ;;  %v756_v18 = vand.u32 2147483648, %v2225_v63 }
 0x11c   :  { %v1471_v11 = vpop.eup %1470  ;;  %1478 = vpow2.f32 %v1287_v1  ;;  %v2243_v14 = vadd.f32 1.0, %v1469_v58  ;;  %v934_v20 = vand.u32 2147483647, %v2228_v4  ;;  %v2252_v21 = vadd.f32 %v2186_v15, %v215_v62  ;;  %v275_v51 = vpop.f32.mrf.mxu3 }
 0x11d   :  { %1480 = vpow2.f32 %v1299_v5  ;;  %v936_v25 = vand.u32 2147483648, %v2228_v4  ;;  %v2256_v27 = vadd.f32 1.0, %v1471_v11  ;;  %v2258_v28 = vmul.f32 -1.442695, %v274_v8 }
 0x11e   :  { %1482 = vrcp.f32 %v2236_v2  ;;  %v1473_v19 = vpop.eup %1472  ;;  %vm750_vm4 = vweird.f32 %v2225_v63  ;;  %vm930_vm5 = vweird.f32 %v2228_v4  ;;  %v1116_v29 = vand.u32 2147483648, %v2236_v2 }
 0x11f   :  { %1484 = vrcp.f32 %v2238_v12  ;;  %vm2265_vm6 = vcmp.eq.f32.partialorder %v754_v9, 8.507059e+37  ;;  %v1114_v32 = vand.u32 2147483647, %v2236_v2  ;;  %v591_v22 = vand.u32 2147483648, %v2238_v12 }
 0x120   :  { %v1475_v26 = vpop.eup %1474  ;;  %1486 = vrcp.f32 %v2243_v14  ;;  %v757_v35 = vor.u32 1.1754944e-38, %v756_v18  ;;  %vm2272_vm7 = vcmp.eq.f32.partialorder %v934_v20, 8.507059e+37  ;;  %v589_v39 = vand.u32 2147483647, %v2238_v12 }
 0x121   :  { %v1477_v30 = vpop.eup %1476  ;;  %v746_v23 = vmul.f32 %v1475_v26, %v2225_v63  ;;  %v937_v42 = vor.u32 1.1754944e-38, %v936_v25  ;;  %vm1110_vm8 = vweird.f32 %v2236_v2  ;;  %1488 = vrcp.f32 %v2256_v27 }
 0x122   :  { %v1479_v34 = vpop.eup %1478  ;;  %v926_v36 = vmul.f32 %v1477_v30, %v2228_v4  ;;  %vm751_vm9 = vweird.f32 %v1475_v26  ;;  %vm931_vm10 = vweird.f32 %v1477_v30  ;;  %v1117_v45 = vor.u32 1.1754944e-38, %v1116_v29 }
 0x123   :  { %v2277_v40 = vpop.eup %1480  ;;  %v747_v41 = vsub.f32 1.0, %v746_v23  ;;  %vm585_vm11 = vweird.f32 %v2238_v12  ;;  %vm2283_vm12 = vcmp.eq.f32.partialorder %v1114_v32, 8.507059e+37  ;;  %v592_v33 = vor.u32 1.1754944e-38, %v591_v22  ;;  %vm752_vm0 = vmor %vm750_vm4, %vm751_vm9 }
 0x124   :  { %v1483_v24 = vpop.eup %1482  ;;  %v927_v10 = vsub.f32 1.0, %v926_v36  ;;  %vm765_vm13 = vweird.f32 %v2243_v14  ;;  %v769_v47 = vand.u32 2147483647, %v2243_v14  ;;  %vm2290_vm14 = vcmp.eq.f32.partialorder %v589_v39, 8.507059e+37  ;;  %vm932_vm2 = vmor %vm930_vm5, %vm931_vm10  ;;  %v245_v39 = vpop.f32.mrf.mxu2 }
 0x125   :  { %v1485_v43 = vpop.eup %1484  ;;  %v748_v46 = vmul.f32 %v1475_v26, %v747_v41  ;;  %v1106_v38 = vmul.f32 %v1483_v24, %v2236_v2  ;;  %v771_v50 = vand.u32 2147483648, %v2243_v14  ;;  %v949_v56 = vand.u32 2147483647, %v2256_v27 }
 0x126   :  { %v1487_v49 = vpop.eup %1486  ;;  %v928_v52 = vmul.f32 %v1477_v30, %v927_v10  ;;  %v581_v54 = vmul.f32 %v1485_v43, %v2238_v12  ;;  %vm1111_vm15 = vweird.f32 %v1483_v24  ;;  %vm586_vm1 = vweird.f32 %v1485_v43 }
 0x127   :  { %v749_v57 = vadd.f32 %v1475_v26, %v748_v46  ;;  %v1107_v44 = vsub.f32 1.0, %v1106_v38  ;;  %v761_v61 = vmul.f32 %v1487_v49, %v2243_v14  ;;  %v2300_v1 = vadd.f32 1.0, %v1473_v19  ;;  %v1489_v59 = vpop.eup %1488  ;;  %vm1112_vm4 = vmor %vm1110_vm8, %vm1111_vm15 }
 0x128   :  { %v929_v53 = vadd.f32 %v1477_v30, %v928_v52  ;;  %v582_v55 = vsub.f32 1.0, %v581_v54  ;;  %v2305_v5 = vadd.f32 1.0, %v1479_v34  ;;  %v941_v7 = vmul.f32 %v1489_v59, %v2256_v27  ;;  %vm587_vm5 = vmor %vm585_vm11, %vm586_vm1 }
 0x129   :  { %v753_v60 = vsel %vm752_vm0, %v1475_v26, %v749_v57  ;;  %v1108_v16 = vmul.f32 %v1483_v24, %v1107_v44  ;;  %v762_v3 = vsub.f32 1.0, %v761_v61  ;;  %vm766_vm3 = vweird.f32 %v1487_v49  ;;  %v188_v44 = vpop.f32.mrf.mxu0 }
 0x12a   :  { %v758_v0 = vsel %vm2265_vm6, %v757_v35, %v753_v60  ;;  %v933_v63 = vsel %vm932_vm2, %v1477_v30, %v929_v53  ;;  %v583_v6 = vmul.f32 %v1485_v43, %v582_v55  ;;  %v942_v11 = vsub.f32 1.0, %v941_v7 }
 0x12b   :  { %1213 = vst [vmem:[%s2619_s3 + $0x90] sm:$0xff] %v758_v0  ;;  %v938_v58 = vsel %vm2272_vm7, %v937_v42, %v933_v63  ;;  %v1109_v4 = vadd.f32 %v1483_v24, %v1108_v16  ;;  %v763_v8 = vmul.f32 %v1487_v49, %v762_v3  ;;  %v951_v9 = vand.u32 2147483648, %v2256_v27  ;;  %vm767_vm7 = vmor %vm765_vm13, %vm766_vm3 }
 0x12c   :  { %1225 = vst [vmem:[%s2619_s3 + $0xf0] sm:$0xff] %v938_v58  ;;  %v584_v62 = vadd.f32 %v1485_v43, %v583_v6  ;;  %1490 = vrcp.f32 %v2300_v1  ;;  %v772_v19 = vor.u32 1.1754944e-38, %v771_v50  ;;  %vm946_vm6 = vweird.f32 %v1489_v59  ;;  %v218_v6 = vpop.f32.mrf.mxu1 }
 0x12d   :  { %v1113_v18 = vsel %vm1112_vm4, %v1483_v24, %v1109_v4  ;;  %v764_v20 = vadd.f32 %v1487_v49, %v763_v8  ;;  %v943_v2 = vmul.f32 %v1489_v59, %v942_v11  ;;  %1492 = vrcp.f32 %v2305_v5 }
 0x12e   :  { %v1118_v25 = vsel %vm2283_vm12, %v1117_v45, %v1113_v18  ;;  %v588_v26 = vsel %vm587_vm5, %v1485_v43, %v584_v62  ;;  %vm770_vm8 = vcmp.eq.f32.partialorder %v769_v47, 8.507059e+37  ;;  %vm945_vm9 = vweird.f32 %v2256_v27  ;;  %v248_v62 = vpop.f32.mrf.mxu2 }
 0x12f   :  { %1237 = vst [vmem:[%s2619_s3 + $0x150] sm:$0xff] %v1118_v25  ;;  %v593_v12 = vsel %vm2290_vm14, %v592_v33, %v588_v26  ;;  %v768_v29 = vsel %vm767_vm7, %v1487_v49, %v764_v20  ;;  %v944_v23 = vadd.f32 %v1489_v59, %v943_v2  ;;  %v952_v14 = vor.u32 1.1754944e-38, %v951_v9  ;;  %vm947_vm10 = vmor %vm945_vm9, %vm946_vm6 }
 0x130   :  { %1202 = vst [vmem:[%s2619_s3 + $0x38] sm:$0xff] %v593_v12  ;;  %v773_v30 = vsel %vm770_vm8, %v772_v19, %v768_v29  ;;  %v1129_v31 = vand.u32 2147483647, %v2300_v1  ;;  %v2346_v32 = vadd.f32 1.0, %v2277_v40  ;;  %1494 = vpow2.f32 %v2240_v13 }
 0x131   :  { %1214 = vst [vmem:[%s2619_s3 + $0x98] sm:$0xff] %v773_v30  ;;  %v1288_v22 = vmul.f32 -1.442695, %v2246_v17  ;;  %v948_v35 = vsel %vm947_vm10, %v1489_v59, %v944_v23  ;;  %vm950_vm11 = vcmp.eq.f32.partialorder %v949_v56, 8.507059e+37  ;;  %1496 = vpow2.f32 %v2258_v28 }
 0x132   :  { %v1491_v34 = vpop.eup %1490  ;;  %v1300_v27 = vmul.f32 -1.442695, %v2252_v21  ;;  %v953_v36 = vsel %vm950_vm11, %v952_v14, %v948_v35  ;;  %vm1125_vm12 = vweird.f32 %v2300_v1  ;;  %v1131_v13 = vand.u32 2147483648, %v2300_v1 }
 0x133   :  { %v1121_v37 = vmul.f32 %v1491_v34, %v2300_v1  ;;  %v1493_v41 = vpop.eup %1492  ;;  %1226 = vst [vmem:[%s2619_s3 + $0xf8] sm:$0xff] %v953_v36  ;;  %1498 = vrcp.f32 %v2346_v32  ;;  %vm2359_vm13 = vcmp.eq.f32.partialorder %v1129_v31, 8.507059e+37  ;;  %vm1126_vm14 = vweird.f32 %v1491_v34 }
 0x134   :  { %v596_v21 = vmul.f32 %v1493_v41, %v2305_v5  ;;  %1500 = vpow2.f32 %v1288_v22  ;;  %v604_v40 = vand.u32 2147483647, %v2305_v5  ;;  %v606_v42 = vand.u32 2147483648, %v2305_v5  ;;  %vm1127_vm1 = vmor %vm1125_vm12, %vm1126_vm14 }
 0x135   :  { %v1122_v17 = vsub.f32 1.0, %v1121_v37  ;;  %1502 = vpow2.f32 %v1300_v27  ;;  %v784_v43 = vand.u32 2147483647, %v2346_v32  ;;  %v246_v46 = vadd.f32 %v2186_v15, %v245_v39 }
 0x136   :  { %v1495_v24 = vpop.eup %1494  ;;  %v597_v45 = vsub.f32 1.0, %v596_v21  ;;  %v1132_v48 = vor.u32 1.1754944e-38, %v1131_v13  ;;  %vm600_vm15 = vweird.f32 %v2305_v5  ;;  %v786_v33 = vand.u32 2147483648, %v2346_v32 }
 0x137   :  { %v1123_v10 = vmul.f32 %v1491_v34, %v1122_v17  ;;  %v1497_v38 = vpop.eup %1496  ;;  %v2370_v47 = vadd.f32 1.0, %v1495_v24  ;;  %vm601_vm0 = vweird.f32 %v1493_v41  ;;  %vm2377_vm2 = vcmp.eq.f32.partialorder %v604_v40, 8.507059e+37 }
 0x138   :  { %v598_v52 = vmul.f32 %v1493_v41, %v597_v45  ;;  %v2372_v54 = vadd.f32 1.0, %v1497_v38  ;;  %v607_v57 = vor.u32 1.1754944e-38, %v606_v42  ;;  %vm780_vm3 = vweird.f32 %v2346_v32  ;;  %vm602_vm5 = vmor %vm600_vm15, %vm601_vm0 }
 0x139   :  { %v1124_v49 = vadd.f32 %v1491_v34, %v1123_v10  ;;  %v1499_v50 = vpop.eup %1498  ;;  %1504 = vrcp.f32 %v2370_v47  ;;  %vm2384_vm4 = vcmp.eq.f32.partialorder %v784_v43, 8.507059e+37  ;;  %v1312_v1 = vmul.f32 -1.442695, %v246_v46 }
 0x13a   :  { %v1501_v61 = vpop.eup %1500  ;;  %v599_v55 = vadd.f32 %v1493_v41, %v598_v52  ;;  %v776_v59 = vmul.f32 %v1499_v50, %v2346_v32  ;;  %v787_v0 = vor.u32 1.1754944e-38, %v786_v33  ;;  %1506 = vrcp.f32 %v2372_v54 }
 0x13b   :  { %v1128_v53 = vsel %vm1127_vm1, %v1491_v34, %v1124_v49  ;;  %v1503_v16 = vpop.eup %1502  ;;  %v276_v63 = vadd.f32 %v2186_v15, %v275_v51  ;;  %v964_v4 = vand.u32 2147483647, %v2370_v47  ;;  %v189_v8 = vadd.f32 %v2186_v15, %v188_v44 }
 0x13c   :  { %v1133_v3 = vsel %vm2359_vm13, %v1132_v48, %v1128_v53  ;;  %v603_v7 = vsel %vm602_vm5, %v1493_v41, %v599_v55  ;;  %v777_v58 = vsub.f32 1.0, %v776_v59  ;;  %v966_v11 = vand.u32 2147483648, %v2370_v47 }
 0x13d   :  { %1238 = vst [vmem:[%s2619_s3 + $0x158] sm:$0xff] %v1133_v3  ;;  %v608_v5 = vsel %vm2377_vm2, %v607_v57, %v603_v7  ;;  %v2403_v9 = vadd.f32 1.0, %v1501_v61  ;;  %v2405_v18 = vadd.f32 1.0, %v1503_v16  ;;  %vm781_vm6 = vweird.f32 %v1499_v50 }
 0x13e   :  { %1203 = vst [vmem:[%s2619_s3 + $0x40] sm:$0xff] %v608_v5  ;;  %v778_v20 = vmul.f32 %v1499_v50, %v777_v58  ;;  %1508 = vpow2.f32 %v1312_v1  ;;  %v219_v19 = vadd.f32 %v2186_v15, %v218_v6  ;;  %v1144_v26 = vand.u32 2147483647, %v2372_v54  ;;  %vm782_vm8 = vmor %vm780_vm3, %vm781_vm6  ;;  %v190_v5 = vpop.f32.mrf.mxu0 }
 0x13f   :  { %v1505_v25 = vpop.eup %1504  ;;  %v1146_v2 = vand.u32 2147483648, %v2372_v54  ;;  %1510 = vrcp.f32 %v2403_v9  ;;  %v249_v12 = vadd.f32 %v2186_v15, %v248_v62  ;;  %vm960_vm7 = vweird.f32 %v2370_v47 }
 0x140   :  { %v779_v29 = vadd.f32 %v1499_v50, %v778_v20  ;;  %v956_v30 = vmul.f32 %v1505_v25, %v2370_v47  ;;  %v1324_v23 = vmul.f32 -1.442695, %v276_v63  ;;  %v1507_v14 = vpop.eup %1506  ;;  %vm2419_vm9 = vcmp.eq.f32.partialorder %v964_v4, 8.507059e+37 }
 0x141   :  { %v967_v22 = vor.u32 1.1754944e-38, %v966_v11  ;;  %1512 = vrcp.f32 %v2405_v18  ;;  %v1289_v34 = vmul.f32 -1.442695, %v189_v8  ;;  %v1136_v36 = vmul.f32 %v1507_v14, %v2372_v54 }
 0x142   :  { %v783_v35 = vsel %vm782_vm8, %v1499_v50, %v779_v29  ;;  %v957_v27 = vsub.f32 1.0, %v956_v30  ;;  %vm1140_vm10 = vweird.f32 %v2372_v54  ;;  %vm2428_vm11 = vcmp.eq.f32.partialorder %v1144_v26, 8.507059e+37 }
 0x143   :  { %v788_v37 = vsel %vm2384_vm4, %v787_v0, %v783_v35  ;;  %v1147_v39 = vor.u32 1.1754944e-38, %v1146_v2  ;;  %v619_v41 = vand.u32 2147483647, %v2403_v9  ;;  %vm961_vm12 = vweird.f32 %v1505_v25  ;;  %v278_v0 = vpop.f32.mrf.mxu3 }
 0x144   :  { %v1509_v13 = vpop.eup %1508  ;;  %1215 = vst [vmem:[%s2619_s3 + $0xa0] sm:$0xff] %v788_v37  ;;  %v958_v17 = vmul.f32 %v1505_v25, %v957_v27  ;;  %v1137_v28 = vsub.f32 1.0, %v1136_v36  ;;  %vm615_vm13 = vweird.f32 %v2403_v9  ;;  %1514 = vpow2.f32 %v1324_v23  ;;  %vm962_vm15 = vmor %vm960_vm7, %vm961_vm12 }
 0x145   :  { %v1511_v21 = vpop.eup %1510  ;;  %vm1141_vm14 = vweird.f32 %v1507_v14  ;;  %v621_v40 = vand.u32 2147483648, %v2403_v9  ;;  %v2438_v42 = vadd.f32 1.0, %v1509_v13  ;;  %1516 = vpow2.f32 %v1289_v34 }
 0x146   :  { %v959_v24 = vadd.f32 %v1505_v25, %v958_v17  ;;  %v1138_v10 = vmul.f32 %v1507_v14, %v1137_v28  ;;  %v611_v45 = vmul.f32 %v1511_v21, %v2403_v9  ;;  %v1301_v43 = vmul.f32 -1.442695, %v219_v19  ;;  %vm1142_vm2 = vmor %vm1140_vm10, %vm1141_vm14 }
 0x147   :  { %v1513_v46 = vpop.eup %1512  ;;  %vm2443_vm0 = vcmp.eq.f32.partialorder %v619_v41, 8.507059e+37  ;;  %vm795_vm1 = vweird.f32 %v2405_v18  ;;  %1518 = vrcp.f32 %v2438_v42  ;;  %v1313_v48 = vmul.f32 -1.442695, %v249_v12 }
 0x148   :  { %v963_v33 = vsel %vm962_vm15, %v1505_v25, %v959_v24  ;;  %v1139_v49 = vadd.f32 %v1507_v14, %v1138_v10  ;;  %v612_v52 = vsub.f32 1.0, %v611_v45  ;;  %v791_v51 = vmul.f32 %v1513_v46, %v2405_v18 }
 0x149   :  { %v968_v50 = vsel %vm2419_vm9, %v967_v22, %v963_v33  ;;  %vm616_vm3 = vweird.f32 %v1511_v21  ;;  %v799_v47 = vand.u32 2147483647, %v2405_v18  ;;  %v801_v56 = vand.u32 2147483648, %v2405_v18 }
 0x14a   :  { %v1515_v57 = vpop.eup %1514  ;;  %1227 = vst [vmem:[%s2619_s3 + $0x100] sm:$0xff] %v968_v50  ;;  %v1143_v44 = vsel %vm1142_vm2, %v1507_v14, %v1139_v49  ;;  %v613_v61 = vmul.f32 %v1511_v21, %v612_v52  ;;  %v792_v53 = vsub.f32 1.0, %v791_v51  ;;  %1520 = vpow2.f32 %v1301_v43  ;;  %vm617_vm5 = vmor %vm615_vm13, %vm616_vm3  ;;  %v250_v43 = vpop.f32.mrf.mxu2 }
 0x14b   :  { %v1517_v55 = vpop.eup %1516  ;;  %v1148_v59 = vsel %vm2428_vm11, %v1147_v39, %v1143_v44  ;;  %v979_v54 = vand.u32 2147483647, %v2438_v42  ;;  %v2463_v60 = vadd.f32 1.0, %v1515_v57  ;;  %1522 = vpow2.f32 %v1313_v48 }
 0x14c   :  { %1239 = vst [vmem:[%s2619_s3 + $0x160] sm:$0xff] %v1148_v59  ;;  %v614_v1 = vadd.f32 %v1511_v21, %v613_v61  ;;  %v793_v16 = vmul.f32 %v1513_v46, %v792_v53  ;;  %vm796_vm4 = vweird.f32 %v1513_v46  ;;  %v2468_v3 = vadd.f32 1.0, %v1517_v55 }
 0x14d   :  { %v1519_v63 = vpop.eup %1518  ;;  %v622_v6 = vor.u32 1.1754944e-38, %v621_v40  ;;  %vm2473_vm6 = vcmp.eq.f32.partialorder %v799_v47, 8.507059e+37  ;;  %v802_v58 = vor.u32 1.1754944e-38, %v801_v56  ;;  %1524 = vrcp.f32 %v2463_v60  ;;  %vm797_vm8 = vmor %vm795_vm1, %vm796_vm4 }
 0x14e   :  { %v618_v4 = vsel %vm617_vm5, %v1511_v21, %v614_v1  ;;  %v794_v8 = vadd.f32 %v1513_v46, %v793_v16  ;;  %v971_v62 = vmul.f32 %v1519_v63, %v2438_v42  ;;  %vm975_vm7 = vweird.f32 %v2438_v42  ;;  %v220_v21 = vpop.f32.mrf.mxu1 }
 0x14f   :  { %v623_v11 = vsel %vm2443_vm0, %v622_v6, %v618_v4  ;;  %vm2485_vm9 = vcmp.eq.f32.partialorder %v979_v54, 8.507059e+37  ;;  %v981_v20 = vand.u32 2147483648, %v2438_v42  ;;  %1526 = vrcp.f32 %v2468_v3 }
 0x150   :  { %v1521_v19 = vpop.eup %1520  ;;  %1204 = vst [vmem:[%s2619_s3 + $0x48] sm:$0xff] %v623_v11  ;;  %v798_v25 = vsel %vm797_vm8, %v1513_v46, %v794_v8  ;;  %v972_v26 = vsub.f32 1.0, %v971_v62  ;;  %v1159_v2 = vand.u32 2147483647, %v2463_v60  ;;  %v279_v18 = vadd.f32 %v2186_v15, %v278_v0  ;;  %v280_v46 = vpop.f32.mrf.mxu3 }
 0x151   :  { %v1523_v12 = vpop.eup %1522  ;;  %v803_v29 = vsel %vm2473_vm6, %v802_v58, %v798_v25  ;;  %v1161_v30 = vand.u32 2147483648, %v2463_v60  ;;  %v2499_v23 = vadd.f32 1.0, %v1521_v19  ;;  %v191_v14 = vadd.f32 %v2186_v15, %v190_v5 }
 0x152   :  { %1216 = vst [vmem:[%s2619_s3 + $0xa8] sm:$0xff] %v803_v29  ;;  %v973_v31 = vmul.f32 %v1519_v63, %v972_v26  ;;  %vm976_vm10 = vweird.f32 %v1519_v63  ;;  %v634_v22 = vand.u32 2147483647, %v2468_v3  ;;  %v2506_v34 = vadd.f32 1.0, %v1523_v12 }
 0x153   :  { %v1525_v35 = vpop.eup %1524  ;;  %v982_v27 = vor.u32 1.1754944e-38, %v981_v20  ;;  %vm1155_vm11 = vweird.f32 %v2463_v60  ;;  %v636_v36 = vand.u32 2147483648, %v2468_v3  ;;  %1528 = vrcp.f32 %v2499_v23  ;;  %vm977_vm13 = vmor %vm975_vm7, %vm976_vm10 }
 0x154   :  { %v974_v37 = vadd.f32 %v1519_v63, %v973_v31  ;;  %v1151_v32 = vmul.f32 %v1525_v35, %v2463_v60  ;;  %vm2512_vm12 = vcmp.eq.f32.partialorder %v1159_v2, 8.507059e+37  ;;  %v1325_v41 = vmul.f32 -1.442695, %v279_v18 }
 0x155   :  { %v1527_v13 = vpop.eup %1526  ;;  %v1162_v17 = vor.u32 1.1754944e-38, %v1161_v30  ;;  %vm630_vm14 = vweird.f32 %v2468_v3  ;;  %1530 = vrcp.f32 %v2506_v34  ;;  %v1290_v28 = vmul.f32 -1.442695, %v191_v14 }
 0x156   :  { %v978_v40 = vsel %vm977_vm13, %v1519_v63, %v974_v37  ;;  %v1152_v24 = vsub.f32 1.0, %v1151_v32  ;;  %v626_v10 = vmul.f32 %v1527_v13, %v2468_v3  ;;  %vm2521_vm15 = vcmp.eq.f32.partialorder %v634_v22, 8.507059e+37 }
 0x157   :  { %v983_v42 = vsel %vm2485_vm9, %v982_v27, %v978_v40  ;;  %vm1156_vm0 = vweird.f32 %v1525_v35  ;;  %v637_v38 = vor.u32 1.1754944e-38, %v636_v36  ;;  %v814_v48 = vand.u32 2147483647, %v2499_v23 }
 0x158   :  { %1228 = vst [vmem:[%s2619_s3 + $0x108] sm:$0xff] %v983_v42  ;;  %v1153_v33 = vmul.f32 %v1525_v35, %v1152_v24  ;;  %v627_v49 = vsub.f32 1.0, %v626_v10  ;;  %1532 = vpow2.f32 %v1325_v41  ;;  %v221_v52 = vadd.f32 %v2186_v15, %v220_v21  ;;  %vm1157_vm2 = vmor %vm1155_vm11, %vm1156_vm0 }
 0x159   :  { %v1529_v51 = vpop.eup %1528  ;;  %v816_v50 = vand.u32 2147483648, %v2499_v23  ;;  %1534 = vpow2.f32 %v1290_v28  ;;  %v251_v47 = vadd.f32 %v2186_v15, %v250_v43  ;;  %v281_v56 = vadd.f32 %v2186_v15, %v280_v46 }
 0x15a   :  { %v1154_v57 = vadd.f32 %v1525_v35, %v1153_v33  ;;  %v628_v44 = vmul.f32 %v1527_v13, %v627_v49  ;;  %vm631_vm1 = vweird.f32 %v1527_v13  ;;  %v806_v61 = vmul.f32 %v1529_v51, %v2499_v23 }
 0x15b   :  { %v1531_v53 = vpop.eup %1530  ;;  %vm810_vm3 = vweird.f32 %v2499_v23  ;;  %v1302_v55 = vmul.f32 -1.442695, %v221_v52  ;;  %v1314_v59 = vmul.f32 -1.442695, %v251_v47  ;;  %v1326_v54 = vmul.f32 -1.442695, %v281_v56  ;;  %vm632_vm4 = vmor %vm630_vm14, %vm631_vm1 }
 0x15c   :  { %v1158_v1 = vsel %vm1157_vm2, %v1525_v35, %v1154_v57  ;;  %v629_v16 = vadd.f32 %v1527_v13, %v628_v44  ;;  %v807_v0 = vsub.f32 1.0, %v806_v61  ;;  %v986_v15 = vmul.f32 %v1531_v53, %v2506_v34 }
 0x15d   :  { %v1163_v63 = vsel %vm2512_vm12, %v1162_v17, %v1158_v1  ;;  %vm811_vm5 = vweird.f32 %v1529_v51  ;;  %v994_v60 = vand.u32 2147483647, %v2506_v34  ;;  %1536 = vpow2.f32 %v1302_v55 }
 0x15e   :  { %v1533_v6 = vpop.eup %1532  ;;  %1240 = vst [vmem:[%s2619_s3 + $0x168] sm:$0xff] %v1163_v63  ;;  %v633_v7 = vsel %vm632_vm4, %v1527_v13, %v629_v16  ;;  %v808_v58 = vmul.f32 %v1529_v51, %v807_v0  ;;  %v987_v4 = vsub.f32 1.0, %v986_v15  ;;  %1538 = vpow2.f32 %v1314_v59  ;;  %vm812_vm7 = vmor %vm810_vm3, %vm811_vm5 }
 0x15f   :  { %v1535_v8 = vpop.eup %1534  ;;  %v638_v62 = vsel %vm2521_vm15, %v637_v38, %v633_v7  ;;  %vm991_vm6 = vweird.f32 %v1531_v53  ;;  %v996_v3 = vand.u32 2147483648, %v2506_v34  ;;  %v473_v5 = vadd.f32 1.0, %v1533_v6 }
 0x160   :  { %1205 = vst [vmem:[%s2619_s3 + $0x50] sm:$0xff] %v638_v62  ;;  %v809_v11 = vadd.f32 %v1529_v51, %v808_v58  ;;  %v988_v9 = vmul.f32 %v1531_v53, %v987_v4  ;;  %v438_v20 = vadd.f32 1.0, %v1535_v8  ;;  %1540 = vpow2.f32 %v1326_v54 }
 0x161   :  { %vm815_vm8 = vcmp.eq.f32.partialorder %v814_v48, 8.507059e+37  ;;  %v817_v19 = vor.u32 1.1754944e-38, %v816_v50  ;;  %1542 = vrcp.f32 %v473_v5  ;;  %vm990_vm9 = vweird.f32 %v2506_v34 }
 0x162   :  { %v813_v25 = vsel %vm812_vm7, %v1529_v51, %v809_v11  ;;  %v989_v26 = vadd.f32 %v1531_v53, %v988_v9  ;;  %1544 = vrcp.f32 %v438_v20  ;;  %vm992_vm10 = vmor %vm990_vm9, %vm991_vm6  ;;  %v997_v12 = vor.u32 1.1754944e-38, %v996_v3 }
 0x163   :  { %v1537_v2 = vpop.eup %1536  ;;  %v818_v18 = vsel %vm815_vm8, %v817_v19, %v813_v25  ;;  %vm995_vm11 = vcmp.eq.f32.partialorder %v994_v60, 8.507059e+37  ;;  %v1174_v36 = vand.u32 2147483647, %v473_v5  ;;  %v1176_v39 = vand.u32 2147483648, %v473_v5 }
 0x164   :  { %v1539_v29 = vpop.eup %1538  ;;  %1217 = vst [vmem:[%s2619_s3 + $0xb0] sm:$0xff] %v818_v18  ;;  %v993_v30 = vsel %vm992_vm10, %v1531_v53, %v989_v26  ;;  %v2563_v23 = vadd.f32 1.0, %v1537_v2  ;;  %v649_v41 = vand.u32 2147483647, %v438_v20  ;;  %vm1170_vm12 = vweird.f32 %v473_v5 }
 0x165   :  { %v998_v14 = vsel %vm995_vm11, %v997_v12, %v993_v30  ;;  %v2565_v31 = vadd.f32 1.0, %v1539_v29  ;;  %v651_v28 = vand.u32 2147483648, %v438_v20  ;;  %vm645_vm14 = vweird.f32 %v438_v20 }
 0x166   :  { %v1541_v22 = vpop.eup %1540  ;;  %1229 = vst [vmem:[%s2619_s3 + $0x110] sm:$0xff] %v998_v14  ;;  %1546 = vrcp.f32 %v2563_v23  ;;  %vm2575_vm15 = vcmp.eq.f32.partialorder %v1174_v36, 8.507059e+37  ;;  %v1177_v42 = vor.u32 1.1754944e-38, %v1176_v39  ;;  %vm2580_vm1 = vcmp.eq.f32.partialorder %v649_v41, 8.507059e+37 }
 0x167   :  { %v1543_v34 = vpop.eup %1542  ;;  %1548 = vrcp.f32 %v2565_v31  ;;  %v2572_v13 = vadd.f32 1.0, %v1541_v22  ;;  %v652_v49 = vor.u32 1.1754944e-38, %v651_v28  ;;  %v829_v51 = vand.u32 2147483647, %v2563_v23 }
 0x168   :  { %v1545_v35 = vpop.eup %1544  ;;  %v1166_v27 = vmul.f32 %v1543_v34, %v473_v5  ;;  %vm1171_vm13 = vweird.f32 %v1543_v34  ;;  %v831_v47 = vand.u32 2147483648, %v2563_v23  ;;  %v1011_v57 = vand.u32 2147483648, %v2565_v31 }
 0x169   :  { %v641_v37 = vmul.f32 %v1545_v35, %v438_v20  ;;  %1550 = vrcp.f32 %v2572_v13  ;;  %vm646_vm0 = vweird.f32 %v1545_v35  ;;  %vm1172_vm2 = vmor %vm1170_vm12, %vm1171_vm13  ;;  %v1009_v1 = vand.u32 2147483647, %v2565_v31 }
 0x16a   :  { %v1167_v32 = vsub.f32 1.0, %v1166_v27  ;;  %vm647_vm3 = vmor %vm645_vm14, %vm646_vm0  ;;  %vm825_vm6 = vweird.f32 %v2563_v23  ;;  %v832_v15 = vor.u32 1.1754944e-38, %v831_v47  ;;  %vm1005_vm8 = vweird.f32 %v2565_v31 }
 0x16b   :  { %v642_v17 = vsub.f32 1.0, %v641_v37  ;;  %vm830_vm9 = vcmp.eq.f32.partialorder %v829_v51, 8.507059e+37  ;;  %v1012_v6 = vor.u32 1.1754944e-38, %v1011_v57  ;;  %vm1010_vm11 = vcmp.eq.f32.partialorder %v1009_v1, 8.507059e+37 }
 0x16c   :  { %v1547_v21 = vpop.eup %1546  ;;  %v1168_v40 = vmul.f32 %v1543_v34, %v1167_v32  ;;  %v1191_v8 = vand.u32 2147483648, %v2572_v13  ;;  %v1189_v5 = vand.u32 2147483647, %v2572_v13  ;;  %vm1185_vm13 = vweird.f32 %v2572_v13 }
 0x16d   :  { %v1549_v24 = vpop.eup %1548  ;;  %v643_v45 = vmul.f32 %v1545_v35, %v642_v17  ;;  %v821_v43 = vmul.f32 %v1547_v21, %v2563_v23  ;;  %vm826_vm4 = vweird.f32 %v1547_v21 }
 0x16e   :  { %v1169_v46 = vadd.f32 %v1543_v34, %v1168_v40  ;;  %v1001_v48 = vmul.f32 %v1549_v24, %v2565_v31  ;;  %vm1006_vm5 = vweird.f32 %v1549_v24  ;;  %vm827_vm7 = vmor %vm825_vm6, %vm826_vm4  ;;  %v1192_v9 = vor.u32 1.1754944e-38, %v1191_v8 }
 0x16f   :  { %v644_v33 = vadd.f32 %v1545_v35, %v643_v45  ;;  %v822_v52 = vsub.f32 1.0, %v821_v43  ;;  %v1551_v55 = vpop.eup %1550  ;;  %vm1007_vm10 = vmor %vm1005_vm8, %vm1006_vm5 }
 0x170   :  { %v1173_v50 = vsel %vm1172_vm2, %v1543_v34, %v1169_v46  ;;  %v1002_v56 = vsub.f32 1.0, %v1001_v48  ;;  %v1181_v0 = vmul.f32 %v1551_v55, %v2572_v13  ;;  %vm1186_vm12 = vweird.f32 %v1551_v55 }
 0x171   :  { %v1178_v44 = vsel %vm2575_vm15, %v1177_v42, %v1173_v50  ;;  %v648_v61 = vsel %vm647_vm3, %v1545_v35, %v644_v33  ;;  %v823_v53 = vmul.f32 %v1547_v21, %v822_v52  ;;  %vm1187_vm14 = vmor %vm1185_vm13, %vm1186_vm12  ;;  %vm1190_vm15 = vcmp.eq.f32.partialorder %v1189_v5, 8.507059e+37 }
 0x172   :  { %1241 = vst [vmem:[%s2619_s3 + $0x170] sm:$0xff] %v1178_v44  ;;  %v653_v59 = vsel %vm2580_vm1, %v652_v49, %v648_v61  ;;  %v1003_v54 = vmul.f32 %v1549_v24, %v1002_v56  ;;  %v1182_v7 = vsub.f32 1.0, %v1181_v0 }
 0x173   :  { %1206 = vst [vmem:[%s2619_s3 + $0x58] sm:$0xff] %v653_v59  ;;  %v824_v16 = vadd.f32 %v1547_v21, %v823_v53 }
 0x174   :  { %v1004_v63 = vadd.f32 %v1549_v24, %v1003_v54  ;;  %v1183_v3 = vmul.f32 %v1551_v55, %v1182_v7 }
 0x175   :  { %v828_v60 = vsel %vm827_vm7, %v1547_v21, %v824_v16 }
 0x176   :  { %v833_v58 = vsel %vm830_vm9, %v832_v15, %v828_v60  ;;  %v1008_v4 = vsel %vm1007_vm10, %v1549_v24, %v1004_v63  ;;  %v1184_v11 = vadd.f32 %v1551_v55, %v1183_v3 }
 0x177   :  { %1218 = vst [vmem:[%s2619_s3 + $0xb8] sm:$0xff] %v833_v58  ;;  %v1013_v62 = vsel %vm1010_vm11, %v1012_v6, %v1008_v4 }
 0x178   :  { %1230 = vst [vmem:[%s2619_s3 + $0x118] sm:$0xff] %v1013_v62  ;;  %v1188_v20 = vsel %vm1187_vm14, %v1551_v55, %v1184_v11 }
 0x179   :  { %v1193_v19 = vsel %vm1190_vm15, %v1192_v9, %v1188_v20 }
 0x17a   :  { %1242 = vst [vmem:[%s2619_s3 + $0x178] sm:$0xff] %v1193_v19 }

// kernel: multi_step_gnn_forward.4
= control target key start
LH: loop header
LB: loop body
LE: loop exit
PB: predicated region body
PF: predicated region fallthrough
CT: control target
= control target key end

     0   :  { %s2701_s15 = smov 0   ;;  %s2703_s16 = smov 0   ;;  %s3132_s0 = inlined_call_operand.vmem [shape: bf16[3,384,384], index: 0, kind: input, shape index: {}]   ;;  %s3133_s1 = inlined_call_operand.vmem [shape: bf16[3,384,128], index: 1, kind: input, shape index: {}]   ;;  %s3134_s2 = inlined_call_operand.vmem [shape: bf16[3,128,128], index: 2, kind: input, shape index: {}]   ;;  %s3135_s3 = inlined_call_operand.vmem [shape: f32[3,1,128], index: 3, kind: input, shape index: {}]   ;;  %s3136_s4 = inlined_call_operand.vmem [shape: f32[3,384,128], index: 4, kind: output, shape index: {}]  }
   0x1   :  { %s2705_s17 = smov 0  }
   0x2 LB: > { %s33_s18 = sadd.s32 1, %s2670_s16  ;;  %p2095_p0 = scmp.ge.s32.totalorder %s2674_s17, 1  ;;  %s2674_s17 = sphi %s2705_s17, %s14_s17   ;;  %s2670_s16 = sphi %s2703_s16, %s3138_s16   ;;  %s2666_s15 = sphi %s2701_s15, %s3137_s15  }
   0x3   : > { %p35_p1 = scmp.ge.s32.totalorder %s33_s18, 3  ;;  %p233_p2 = scmp.lt.s32.totalorder %s2674_s17, 4 }
   0x5   : > { %s3140_s18 = smov (%p35_p1, %s33_s18), 0  ;;  %p234_p3 = pnand %p2095_p0, %p233_p2 }
   0x6   : > { %p291_p4 = scmp.lt.s32.totalorder (!%p234_p3), %s2666_s15, 2 }
   0x7   : > { %237 = sbr.rel (%p234_p3) target bundleno = 1095 (0x447), region = 36 }
   0xc   : > { %s3142_s15 = smov (!%p291_p4, %s2666_s15), 2 }
   0xd   : > { %s2519_s19 = sshll.u32 %s3142_s15, 6  ;;  %s2625_s23 = smul.u32 192, %s3142_s15 }
   0xe   : > { %s319_s22 = scalar_lea.vmem %s3134_s2, %s2519_s19  ;;  %s2624_s27 = smul.u32 576, %s3142_s15 }
   0xf   : > { %v2551_v0 = vld [vmem:[%s319_s22 + $0x38] sm:$0xff]  ;;  %v2550_v1 = vld [vmem:[%s319_s22 + $0x30] sm:$0xff]  ;;  %v2549_v2 = vld [vmem:[%s319_s22 + $0x28] sm:$0xff]  ;;  %s2729_s26 = scalar_lea.vmem %s3133_s1, %s2625_s23  ;;  %s322_s7 = scalar_lea.vmem %s3135_s3, %s3142_s15 }
  0x10   : > { %641 = vmatpush.bf16.msra.mxu0 %v2551_v0  ;;  %v2548_v3 = vld [vmem:[%s319_s22 + $0x20] sm:$0xff]  ;;  %v2547_v4 = vld [vmem:[%s319_s22 + $0x18] sm:$0xff]  ;;  %v2546_v5 = vld [vmem:[%s319_s22 + $0x10] sm:$0xff]  ;;  %s2765_s30 = scalar_lea.vmem %s3132_s0, %s2624_s27  ;;  %s2626_s8 = smul.u32 384, %s3142_s15 }
  0x11   : > { %v2545_v6 = vld [vmem:[%s319_s22 + $0x8] sm:$0xff]  ;;  %v2544_v7 = vld [vmem:[%s319_s22] sm:$0xff]  ;;  %v2522_v10 = vld [vmem:[%s2729_s26 + $0x10] sm:$0xff] }
  0x12   : > { %v2520_v8 = vld [vmem:[%s2729_s26] sm:$0xff]  ;;  %v2521_v9 = vld [vmem:[%s2729_s26 + $0x8] sm:$0xff]  ;;  %v2523_v11 = vld [vmem:[%s2729_s26 + $0x18] sm:$0xff]  ;;  %s2850_s13 = scalar_lea.vmem %s3136_s4, %s2626_s8 }
  0x13   : > { %v2524_v12 = vld [vmem:[%s2729_s26 + $0x20] sm:$0xff]  ;;  %v2525_v13 = vld [vmem:[%s2729_s26 + $0x28] sm:$0xff]  ;;  %v2526_v14 = vld [vmem:[%s2729_s26 + $0x30] sm:$0xff] }
  0x14   : > { %642 = vmatpush.bf16.msra.mxu0 %v2550_v1  ;;  %v2527_v15 = vld [vmem:[%s2729_s26 + $0x38] sm:$0xff]  ;;  %v2528_v16 = vld [vmem:[%s2729_s26 + $0x40] sm:$0xff]  ;;  %v2529_v20 = vld [vmem:[%s2729_s26 + $0x48] sm:$0xff] }
  0x15   : > { %v2530_v24 = vld [vmem:[%s2729_s26 + $0x50] sm:$0xff]  ;;  %v2531_v28 = vld [vmem:[%s2729_s26 + $0x58] sm:$0xff]  ;;  %v2532_v32 = vld [vmem:[%s2729_s26 + $0x60] sm:$0xff] }
  0x16   : > { %v2533_v35 = vld [vmem:[%s2729_s26 + $0x68] sm:$0xff]  ;;  %v2534_v38 = vld [vmem:[%s2729_s26 + $0x70] sm:$0xff]  ;;  %v2535_v41 = vld [vmem:[%s2729_s26 + $0x78] sm:$0xff] }
  0x17   : > { %v2536_v46 = vld [vmem:[%s2729_s26 + $0x80] sm:$0xff]  ;;  %v2537_v52 = vld [vmem:[%s2729_s26 + $0x88] sm:$0xff]  ;;  %v2538_v56 = vld [vmem:[%s2729_s26 + $0x90] sm:$0xff] }
  0x18   : > { %643 = vmatpush.bf16.msra.mxu0 %v2549_v2  ;;  %v2539_v60 = vld [vmem:[%s2729_s26 + $0x98] sm:$0xff]  ;;  %v2540_v0 = vld [vmem:[%s2729_s26 + $0xa0] sm:$0xff] }
  0x1c   : > { %644 = vmatpush.bf16.msra.mxu0 %v2548_v3  ;;  %v2541_v3 = vld [vmem:[%s2729_s26 + $0xa8] sm:$0xff] }
  0x20   : > { %645 = vmatpush.bf16.msra.mxu0 %v2547_v4 }
  0x24   : > { %646 = vmatpush.bf16.msra.mxu0 %v2546_v5 }
  0x28   : > { %647 = vmatpush.bf16.msra.mxu0 %v2545_v6  ;;  %v2542_v6 = vld [vmem:[%s2729_s26 + $0xb0] sm:$0xff] }
  0x2c   : > { %648 = vmatpush.bf16.msra.mxu0 %v2544_v7 }
  0x2f   : > { %649 = vmatmul.bf16.vlgmr.msra.gmra.mxu0 %v2520_v8 }
  0x3f   : > { %654 = vmatmul.bf16.gmra.mxu0 %v2521_v9  ;;  %v2543_v9 = vld [vmem:[%s2729_s26 + $0xb8] sm:$0xff] }
  0x4f   : > { %659 = vmatmul.bf16.gmra.mxu0 %v2522_v10 }
  0x5f   : > { %664 = vmatmul.bf16.gmra.mxu0 %v2523_v11 }
  0x6f   : > { %669 = vmatmul.bf16.gmra.mxu0 %v2524_v12 }
  0x7f   : > { %674 = vmatmul.bf16.gmra.mxu0 %v2525_v13 }
  0x8f   : > { %679 = vmatmul.bf16.gmra.mxu0 %v2526_v14 }
  0x9f   : > { %684 = vmatmul.bf16.gmra.mxu0 %v2527_v15 }
  0xac   : > { %v650_v17 = vpop.f32.mrf.mxu0 }
  0xaf   : > { %689 = vmatmul.bf16.gmra.mxu0 %v2528_v16 }
  0xb4   : > { %v652_v18 = vpop.f32.mrf.mxu0 }
  0xb5   : > { %v914_v19 = vpack.c.bf16 %v652_v18, %v650_v17 }
  0xbc   : > { %v655_v21 = vpop.f32.mrf.mxu0 }
  0xbf   : > { %694 = vmatmul.bf16.gmra.mxu0 %v2529_v20 }
  0xc4   : > { %v657_v22 = vpop.f32.mrf.mxu0 }
  0xc5   : > { %v915_v23 = vpack.c.bf16 %v657_v22, %v655_v21 }
  0xcc   : > { %v660_v25 = vpop.f32.mrf.mxu0 }
  0xcf   : > { %699 = vmatmul.bf16.gmra.mxu0 %v2530_v24 }
  0xd4   : > { %v662_v26 = vpop.f32.mrf.mxu0 }
  0xd5   : > { %v916_v27 = vpack.c.bf16 %v662_v26, %v660_v25 }
  0xdc   : > { %v665_v29 = vpop.f32.mrf.mxu0 }
  0xdf   : > { %704 = vmatmul.bf16.gmra.mxu0 %v2531_v28 }
  0xe4   : > { %v667_v30 = vpop.f32.mrf.mxu0 }
  0xe5   : > { %v917_v31 = vpack.c.bf16 %v667_v30, %v665_v29 }
  0xec   : > { %v670_v33 = vpop.f32.mrf.mxu0 }
  0xef   : > { %709 = vmatmul.bf16.gmra.mxu0 %v2532_v32 }
  0xf4   : > { %v672_v34 = vpop.f32.mrf.mxu0 }
  0xf5   : > { %v918_v49 = vpack.c.bf16 %v672_v34, %v670_v33  ;;  %v2552_v34 = vld [vmem:[%s2765_s30 + $0x4] sm:$0xf] }
  0xfc   : > { %v675_v36 = vpop.f32.mrf.mxu0 }
  0xff   : > { %714 = vmatmul.bf16.gmra.mxu0 %v2533_v35  ;;  %v2233_v35 = vld [vmem:[%s2765_s30 + $0xc] sm:$0xf0] }
 0x104   : > { %v677_v37 = vpop.f32.mrf.mxu0 }
 0x105   : > { %v919_v48 = vpack.c.bf16 %v677_v37, %v675_v36  ;;  %v2236_v36 = vor.u32 %v2552_v34, %v2233_v35  ;;  %v2317_v34 = vld [vmem:[%s2765_s30 + $0xb4] sm:$0xf0] }
 0x10c   : > { %v680_v39 = vpop.f32.mrf.mxu0 }
 0x10f   : > { %719 = vmatmul.bf16.gmra.mxu0 %v2534_v38  ;;  %v2231_v38 = vld [vmem:[%s2765_s30] sm:$0xf] }
 0x114   : > { %v682_v40 = vpop.f32.mrf.mxu0 }
 0x115   : > { %v920_v45 = vpack.c.bf16 %v682_v40, %v680_v39  ;;  %v2553_v39 = vld [vmem:[%s2765_s30 + $0x8] sm:$0xf0] }
 0x116   : > { %v2232_v40 = vor.u32 %v2553_v39, %v2231_v38  ;;  %v2299_v39 = vld [vmem:[%s2765_s30 + $0x80] sm:$0xf] }
 0x11c   : > { %v685_v42 = vpop.f32.mrf.mxu0 }
 0x11f   : > { %724 = vmatmul.bf16.gmra.mxu0 %v2535_v41 }
 0x124   : > { %v687_v43 = vpop.f32.mrf.mxu0 }
 0x125   : > { %v921_v44 = vpack.c.bf16 %v687_v43, %v685_v42  ;;  %v2555_v43 = vld [vmem:[%s2765_s30 + $0x1c] sm:$0xf] }
 0x127   : > { %1322 = vmatpush.bf16.msra.mxu1 %v921_v44  ;;  %v2245_v44 = vld [vmem:[%s2765_s30 + $0x24] sm:$0xf0] }
 0x12b   : > { %1323 = vmatpush.bf16.msra.mxu1 %v920_v45  ;;  %v2248_v45 = vor.u32 %v2555_v43, %v2245_v44  ;;  %v2329_v43 = vld [vmem:[%s2765_s30 + $0xcc] sm:$0xf0] }
 0x12c   : > { %v690_v47 = vpop.f32.mrf.mxu0 }
 0x12f   : > { %729 = vmatmul.bf16.gmra.mxu0 %v2536_v46  ;;  %1324 = vmatpush.bf16.msra.mxu1 %v919_v48  ;;  %v2556_v48 = vld [vmem:[%s2765_s30 + $0x20] sm:$0xf0] }
 0x133   : > { %1325 = vmatpush.bf16.msra.mxu1 %v918_v49 }
 0x134   : > { %v692_v50 = vpop.f32.mrf.mxu0 }
 0x135   : > { %v922_v51 = vpack.c.bf16 %v692_v50, %v690_v47  ;;  %v2243_v47 = vld [vmem:[%s2765_s30 + $0x18] sm:$0xf] }
 0x136   : > { %v2244_v50 = vor.u32 %v2556_v48, %v2243_v47  ;;  %v2311_v48 = vld [vmem:[%s2765_s30 + $0x98] sm:$0xf] }
 0x137   : > { %1326 = vmatpush.bf16.msra.mxu1 %v917_v31 }
 0x13b   : > { %1327 = vmatpush.bf16.msra.mxu1 %v916_v27 }
 0x13c   : > { %v695_v53 = vpop.f32.mrf.mxu0 }
 0x13f   : > { %734 = vmatmul.bf16.gmra.mxu0 %v2537_v52  ;;  %1328 = vmatpush.bf16.msra.mxu1 %v915_v23  ;;  %v2558_v52 = vld [vmem:[%s2765_s30 + $0x34] sm:$0xf] }
 0x143   : > { %1329 = vmatpush.bf16.msra.mxu1 %v914_v19 }
 0x144   : > { %v697_v54 = vpop.f32.mrf.mxu0 }
 0x145   : > { %v923_v55 = vpack.c.bf16 %v697_v54, %v695_v53  ;;  %v2257_v53 = vld [vmem:[%s2765_s30 + $0x3c] sm:$0xf0] }
 0x146   : > { %1330 = vmatmul.bf16.vlgmr.msra.gmra.mxu1 %v2232_v40  ;;  %v2260_v54 = vor.u32 %v2558_v52, %v2257_v53  ;;  %v2569_v40 = vld [vmem:[%s2765_s30 + $0x88] sm:$0xf0] }
 0x14c   : > { %v700_v57 = vpop.f32.mrf.mxu0 }
 0x14f   : > { %739 = vmatmul.bf16.gmra.mxu0 %v2538_v56  ;;  %v2559_v56 = vld [vmem:[%s2765_s30 + $0x38] sm:$0xf0] }
 0x154   : > { %v702_v58 = vpop.f32.mrf.mxu0 }
 0x155   : > { %v924_v59 = vpack.c.bf16 %v702_v58, %v700_v57  ;;  %v2239_v58 = vld [vmem:[%s2765_s30 + $0x8] sm:$0xf] }
 0x156   : > { %1335 = vmatmul.bf16.gmra.mxu1 %v2244_v50 }
 0x15c   : > { %v705_v61 = vpop.f32.mrf.mxu0 }
 0x15f   : > { %744 = vmatmul.bf16.gmra.mxu0 %v2539_v60 }
 0x164   : > { %v707_v62 = vpop.f32.mrf.mxu0 }
 0x165   : > { %v925_v63 = vpack.c.bf16 %v707_v62, %v705_v61  ;;  %v2561_v61 = vld [vmem:[%s2765_s30 + $0x4c] sm:$0xf]  ;;  %v2269_v62 = vld [vmem:[%s2765_s30 + $0x54] sm:$0xf0] }
 0x16c   : > { %v710_v1 = vpop.f32.mrf.mxu0 }
 0x16f   : > { %749 = vmatmul.bf16.gmra.mxu0 %v2540_v0  ;;  %v2267_v0 = vld [vmem:[%s2765_s30 + $0x48] sm:$0xf] }
 0x174   : > { %v712_v2 = vpop.f32.mrf.mxu0 }
 0x175   : > { %v926_v16 = vpack.c.bf16 %v712_v2, %v710_v1  ;;  %v2562_v1 = vld [vmem:[%s2765_s30 + $0x50] sm:$0xf0] }
 0x176   : > { %v2268_v2 = vor.u32 %v2562_v1, %v2267_v0 }
 0x17c   : > { %v715_v4 = vpop.f32.mrf.mxu0 }
 0x17f   : > { %754 = vmatmul.bf16.gmra.mxu0 %v2541_v3  ;;  %v2251_v3 = vld [vmem:[%s2765_s30 + $0x20] sm:$0xf] }
 0x184   : > { %v717_v5 = vpop.f32.mrf.mxu0 }
 0x185   : > { %v927_v15 = vpack.c.bf16 %v717_v5, %v715_v4  ;;  %v2557_v4 = vld [vmem:[%s2765_s30 + $0x28] sm:$0xf0] }
 0x186   : > { %v2252_v5 = vor.u32 %v2557_v4, %v2251_v3  ;;  %v2582_v4 = vld [vmem:[%s2765_s30 + $0xf4] sm:$0xf] }
 0x18c   : > { %v720_v7 = vpop.f32.mrf.mxu0 }
 0x18f   : > { %759 = vmatmul.bf16.gmra.mxu0 %v2542_v6  ;;  %v2564_v6 = vld [vmem:[%s2765_s30 + $0x64] sm:$0xf] }
 0x194   : > { %v722_v8 = vpop.f32.mrf.mxu0 }
 0x195   : > { %v928_v13 = vpack.c.bf16 %v722_v8, %v720_v7  ;;  %v2281_v7 = vld [vmem:[%s2765_s30 + $0x6c] sm:$0xf0] }
 0x196   : > { %v2284_v8 = vor.u32 %v2564_v6, %v2281_v7  ;;  %v2335_v7 = vld [vmem:[%s2765_s30 + $0xc8] sm:$0xf] }
 0x19c   : > { %v725_v10 = vpop.f32.mrf.mxu0 }
 0x19f   : > { %764 = vmatmul.bf16.gmra.mxu0 %v2543_v9  ;;  %v2279_v9 = vld [vmem:[%s2765_s30 + $0x60] sm:$0xf] }
 0x1a4   : > { %v727_v11 = vpop.f32.mrf.mxu0 }
 0x1a5   : > { %v929_v12 = vpack.c.bf16 %v727_v11, %v725_v10  ;;  %v2565_v10 = vld [vmem:[%s2765_s30 + $0x68] sm:$0xf0] }
 0x1a6   : > { %v2280_v11 = vor.u32 %v2565_v10, %v2279_v9 }
 0x1a7   : > { %1451 = vmatpush.bf16.msra.mxu2 %v929_v12  ;;  %v2263_v12 = vld [vmem:[%s2765_s30 + $0x38] sm:$0xf] }
 0x1ab   : > { %1452 = vmatpush.bf16.msra.mxu2 %v928_v13  ;;  %v2560_v13 = vld [vmem:[%s2765_s30 + $0x40] sm:$0xf0] }
 0x1ac   : > { %v2755_v14 = vpop.f32.mrf.mxu0 }
 0x1af   : > { %1453 = vmatpush.bf16.msra.mxu2 %v927_v15  ;;  %v2567_v15 = vld [vmem:[%s2765_s30 + $0x7c] sm:$0xf] }
 0x1b3   : > { %1454 = vmatpush.bf16.msra.mxu2 %v926_v16  ;;  %v2293_v16 = vld [vmem:[%s2765_s30 + $0x84] sm:$0xf0] }
 0x1b4   : > { %v2757_v17 = vpop.f32.mrf.mxu0 }
 0x1b5   : > { %v930_v18 = vpack.c.bf16 %v2757_v17, %v2755_v14  ;;  %v2264_v14 = vor.u32 %v2560_v13, %v2263_v12  ;;  %v2296_v17 = vor.u32 %v2567_v15, %v2293_v16  ;;  %v2583_v12 = vld [vmem:[%s2765_s30 + $0xf8] sm:$0xf0] }
 0x1b7   : > { %1455 = vmatpush.bf16.msra.mxu2 %v925_v63  ;;  %v2272_v63 = vor.u32 %v2561_v61, %v2269_v62  ;;  %v2339_v62 = vld [vmem:[%s2765_s30 + $0xd8] sm:$0xf] }
 0x1bb   : > { %1456 = vmatpush.bf16.msra.mxu2 %v924_v59  ;;  %v2554_v59 = vld [vmem:[%s2765_s30 + $0x10] sm:$0xf0] }
 0x1bc   : > { %v735_v19 = vpop.f32.mrf.mxu0  ;;  %v2240_v60 = vor.u32 %v2554_v59, %v2239_v58  ;;  %v2323_v58 = vld [vmem:[%s2765_s30 + $0xb0] sm:$0xf]  ;;  %v2575_v59 = vld [vmem:[%s2765_s30 + $0xb8] sm:$0xf0] }
 0x1bd   : > { %v2324_v1 = vor.u32 %v2575_v59, %v2323_v58 }
 0x1bf   : > { %1457 = vmatpush.bf16.msra.mxu2 %v923_v55  ;;  %v2255_v55 = vld [vmem:[%s2765_s30 + $0x30] sm:$0xf] }
 0x1c0   : > { %v2256_v57 = vor.u32 %v2559_v56, %v2255_v55  ;;  %v2579_v55 = vld [vmem:[%s2765_s30 + $0xdc] sm:$0xf]  ;;  %v2341_v56 = vld [vmem:[%s2765_s30 + $0xe4] sm:$0xf0] }
 0x1c2   : > { %1340 = vmatmul.bf16.gmra.mxu1 %v2256_v57  ;;  %v2344_v57 = vor.u32 %v2579_v55, %v2341_v56 }
 0x1c3   : > { %1458 = vmatpush.bf16.msra.mxu2 %v922_v51  ;;  %v1331_v50 = vpop.f32.mrf.mxu1 }
 0x1c4   : > { %v737_v20 = vpop.f32.mrf.mxu0 }
 0x1c5   : > { %v931_v21 = vpack.c.bf16 %v737_v20, %v735_v19  ;;  %v2568_v19 = vld [vmem:[%s2765_s30 + $0x80] sm:$0xf0] }
 0x1c6   : > { %1459 = vmatmul.bf16.vlgmr.msra.gmra.mxu2 %v2236_v36  ;;  %v2315_v36 = vld [vmem:[%s2765_s30 + $0xa8] sm:$0xf] }
 0x1cb   : > { %v1333_v53 = vpop.f32.mrf.mxu1 }
 0x1cc   : > { %v740_v22 = vpop.f32.mrf.mxu0 }
 0x1d2   : > { %1345 = vmatmul.bf16.gmra.mxu1 %v2268_v2 }
 0x1d4   : > { %v742_v23 = vpop.f32.mrf.mxu0 }
 0x1d5   : > { %v932_v24 = vpack.c.bf16 %v742_v23, %v740_v22  ;;  %v2563_v22 = vld [vmem:[%s2765_s30 + $0x58] sm:$0xf0] }
 0x1d6   : > { %1464 = vmatmul.bf16.gmra.mxu2 %v2248_v45  ;;  %v2327_v45 = vld [vmem:[%s2765_s30 + $0xc0] sm:$0xf] }
 0x1dc   : > { %v745_v25 = vpop.f32.mrf.mxu0 }
 0x1e2   : > { %1350 = vmatmul.bf16.gmra.mxu1 %v2280_v11  ;;  %v2351_v11 = vld [vmem:[%s2765_s30 + $0xf0] sm:$0xf] }
 0x1e3   : > { %v2352_v13 = vor.u32 %v2583_v12, %v2351_v11 }
 0x1e4   : > { %v747_v26 = vpop.f32.mrf.mxu0 }
 0x1e5   : > { %v933_v27 = vpack.c.bf16 %v747_v26, %v745_v25  ;;  %v2305_v25 = vld [vmem:[%s2765_s30 + $0x9c] sm:$0xf0] }
 0x1e6   : > { %1469 = vmatmul.bf16.gmra.mxu2 %v2260_v54 }
 0x1ec   : > { %v750_v28 = vpop.f32.mrf.mxu0 }
 0x1f4   : > { %v752_v29 = vpop.f32.mrf.mxu0 }
 0x1f5   : > { %v934_v51 = vpack.c.bf16 %v752_v29, %v750_v28  ;;  %v2571_v28 = vld [vmem:[%s2765_s30 + $0x98] sm:$0xf0] }
 0x1f6   : > { %1474 = vmatmul.bf16.gmra.mxu2 %v2272_v63  ;;  %v2580_v63 = vld [vmem:[%s2765_s30 + $0xe0] sm:$0xf0] }
 0x1f7   : > { %v2340_v0 = vor.u32 %v2580_v63, %v2339_v62  ;;  %v2591_v62 = vld [vmem:[%s2765_s30 + $0x13c] sm:$0xf]  ;;  %v2389_v63 = vld [vmem:[%s2765_s30 + $0x144] sm:$0xf0] }
 0x1fc   : > { %v755_v30 = vpop.f32.mrf.mxu0 }
 0x204   : > { %v757_v31 = vpop.f32.mrf.mxu0 }
 0x205   : > { %v935_v49 = vpack.c.bf16 %v757_v31, %v755_v30  ;;  %v2287_v30 = vld [vmem:[%s2765_s30 + $0x68] sm:$0xf]  ;;  %v2566_v31 = vld [vmem:[%s2765_s30 + $0x70] sm:$0xf0] }
 0x206   : > { %1479 = vmatmul.bf16.gmra.mxu2 %v2284_v8  ;;  %v2578_v8 = vld [vmem:[%s2765_s30 + $0xd0] sm:$0xf0] }
 0x20c   : > { %v760_v32 = vpop.f32.mrf.mxu0 }
 0x214   : > { %v762_v33 = vpop.f32.mrf.mxu0 }
 0x215   : > { %v936_v46 = vpack.c.bf16 %v762_v33, %v760_v32  ;;  %v2288_v32 = vor.u32 %v2566_v31, %v2287_v30  ;;  %v2573_v33 = vld [vmem:[%s2765_s30 + $0xac] sm:$0xf]  ;;  %v2586_v30 = vld [vmem:[%s2765_s30 + $0x110] sm:$0xf0] }
 0x216   : > { %1484 = vmatmul.bf16.gmra.mxu2 %v2296_v17  ;;  %v2320_v35 = vor.u32 %v2573_v33, %v2317_v34 }
 0x21c   : > { %v765_v37 = vpop.f32.mrf.mxu0 }
 0x224   : > { %v767_v41 = vpop.f32.mrf.mxu0 }
 0x225   : > { %v937_v42 = vpack.c.bf16 %v767_v41, %v765_v37  ;;  %v2574_v37 = vld [vmem:[%s2765_s30 + $0xb0] sm:$0xf0]  ;;  %v2300_v41 = vor.u32 %v2569_v40, %v2299_v39 }
 0x226   : > { %v2316_v38 = vor.u32 %v2574_v37, %v2315_v36 }
 0x227   : > { %1580 = vmatpush.bf16.msra.mxu3 %v937_v42  ;;  %v2576_v42 = vld [vmem:[%s2765_s30 + $0xc4] sm:$0xf] }
 0x228   : > { %v2332_v44 = vor.u32 %v2576_v42, %v2329_v43  ;;  %v2377_v42 = vld [vmem:[%s2765_s30 + $0x12c] sm:$0xf0] }
 0x22b   : > { %1581 = vmatpush.bf16.msra.mxu3 %v936_v46  ;;  %v2577_v46 = vld [vmem:[%s2765_s30 + $0xc8] sm:$0xf0] }
 0x22c   : > { %v2328_v47 = vor.u32 %v2577_v46, %v2327_v45  ;;  %v2359_v46 = vld [vmem:[%s2765_s30 + $0xf8] sm:$0xf] }
 0x22f   : > { %1582 = vmatpush.bf16.msra.mxu3 %v935_v49  ;;  %v2572_v49 = vld [vmem:[%s2765_s30 + $0xa0] sm:$0xf0] }
 0x230   : > { %v2312_v52 = vor.u32 %v2572_v49, %v2311_v48 }
 0x233   : > { %1583 = vmatpush.bf16.msra.mxu3 %v934_v51 }
 0x237   : > { %1584 = vmatpush.bf16.msra.mxu3 %v933_v27  ;;  %v2303_v27 = vld [vmem:[%s2765_s30 + $0x90] sm:$0xf] }
 0x238   : > { %v2304_v29 = vor.u32 %v2571_v28, %v2303_v27 }
 0x23b   : > { %1585 = vmatpush.bf16.msra.mxu3 %v932_v24  ;;  %v2570_v24 = vld [vmem:[%s2765_s30 + $0x94] sm:$0xf] }
 0x23c   : > { %v2308_v26 = vor.u32 %v2570_v24, %v2305_v25  ;;  %v2347_v25 = vld [vmem:[%s2765_s30 + $0xe0] sm:$0xf] }
 0x23e   : > { %1489 = vmatmul.bf16.gmra.mxu2 %v2308_v26  ;;  %v2581_v26 = vld [vmem:[%s2765_s30 + $0xe8] sm:$0xf0] }
 0x23f   : > { %1586 = vmatpush.bf16.msra.mxu3 %v931_v21  ;;  %v2275_v21 = vld [vmem:[%s2765_s30 + $0x50] sm:$0xf] }
 0x240   : > { %v2276_v23 = vor.u32 %v2563_v22, %v2275_v21  ;;  %v2365_v21 = vld [vmem:[%s2765_s30 + $0x114] sm:$0xf0] }
 0x243   : > { %1587 = vmatpush.bf16.msra.mxu3 %v930_v18  ;;  %v2291_v18 = vld [vmem:[%s2765_s30 + $0x78] sm:$0xf] }
 0x244   : > { %v2292_v20 = vor.u32 %v2568_v19, %v2291_v18  ;;  %v2843_v18 = vld [vmem:[%s322_s7] ss:$0 sm:$0xff] }
 0x246   : > { %1588 = vmatmul.bf16.vlgmr.msra.gmra.mxu3 %v2240_v60  ;;  %1355 = vmatmul.bf16.gmra.mxu1 %v2292_v20  ;;  %v1336_v60 = vpop.f32.mrf.mxu1  ;;  %v2585_v20 = vld [vmem:[%s2765_s30 + $0x10c] sm:$0xf] }
 0x249   : > { %v1460_v51 = vpop.f32.mrf.mxu2 }
 0x24a   : > { %v1461_v15 = vadd.f32 %v1460_v51, %v1331_v50  ;;  %v2375_v50 = vld [vmem:[%s2765_s30 + $0x120] sm:$0xf]  ;;  %v2589_v51 = vld [vmem:[%s2765_s30 + $0x128] sm:$0xf0] }
 0x24e   : > { %1494 = vmatmul.bf16.gmra.mxu2 %v2320_v35  ;;  %v1338_v2 = vpop.f32.mrf.mxu1  ;;  %v2348_v35 = vor.u32 %v2581_v26, %v2347_v25  ;;  %v2383_v25 = vld [vmem:[%s2765_s30 + $0x128] sm:$0xf]  ;;  %v2590_v26 = vld [vmem:[%s2765_s30 + $0x130] sm:$0xf0] }
 0x251   : > { %v1462_v54 = vpop.f32.mrf.mxu2 }
 0x252   : > { %v1463_v31 = vadd.f32 %v1462_v54, %v1333_v53  ;;  %v2376_v53 = vor.u32 %v2589_v51, %v2375_v50  ;;  %v2411_v50 = vld [vmem:[%s2765_s30 + $0x168] sm:$0xf]  ;;  %v2598_v51 = vld [vmem:[%s2765_s30 + $0x170] sm:$0xf0] }
 0x256   : > { %1593 = vmatmul.bf16.gmra.mxu3 %v2252_v5  ;;  %1360 = vmatmul.bf16.gmra.mxu1 %v2304_v29  ;;  %v2353_v5 = vld [vmem:[%s2765_s30 + $0xfc] sm:$0xf0]  ;;  %v1341_v9 = vpop.f32.mrf.mxu1  ;;  %v2363_v29 = vld [vmem:[%s2765_s30 + $0x108] sm:$0xf] }
 0x257   : > { %v2356_v6 = vor.u32 %v2582_v4, %v2353_v5  ;;  %v2587_v4 = vld [vmem:[%s2765_s30 + $0x118] sm:$0xf0] }
 0x259   : > { %v1465_v61 = vpop.f32.mrf.mxu2 }
 0x25a   : > { %v1466_v37 = vadd.f32 %v1465_v61, %v1336_v60 }
 0x25e   : > { %1499 = vmatmul.bf16.gmra.mxu2 %v2332_v44  ;;  %v2834_v16 = vpop.f32.mrf.mxu1 }
 0x261   : > { %v1467_v3 = vpop.f32.mrf.mxu2 }
 0x266   : > { %1598 = vmatmul.bf16.gmra.mxu3 %v2264_v14  ;;  %1365 = vmatmul.bf16.gmra.mxu1 %v2316_v38  ;;  %v2336_v14 = vor.u32 %v2578_v8, %v2335_v7  ;;  %v2856_v27 = vpop.f32.mrf.mxu1  ;;  %v2387_v7 = vld [vmem:[%s2765_s30 + $0x138] sm:$0xf]  ;;  %v2592_v8 = vld [vmem:[%s2765_s30 + $0x140] sm:$0xf0] }
 0x269   : > { %v1470_v10 = vpop.f32.mrf.mxu2 }
 0x26a   : > { %v1471_v58 = vadd.f32 %v1470_v10, %v1341_v9  ;;  %v2388_v10 = vor.u32 %v2592_v8, %v2387_v7  ;;  %v2423_v7 = vld [vmem:[%s2765_s30 + $0x180] sm:$0xf]  ;;  %v2601_v8 = vld [vmem:[%s2765_s30 + $0x188] sm:$0xf0] }
 0x26e   : > { %1504 = vmatmul.bf16.gmra.mxu2 %v2344_v57  ;;  %v2862_v38 = vpop.f32.mrf.mxu1 }
 0x271   : > { %v2836_v17 = vpop.f32.mrf.mxu2 }
 0x272   : > { %v1473_v9 = vadd.f32 %v2836_v17, %v2834_v16  ;;  %v2594_v17 = vld [vmem:[%s2765_s30 + $0x154] sm:$0xf] }
 0x276   : > { %1603 = vmatmul.bf16.gmra.mxu3 %v2276_v23  ;;  %1370 = vmatmul.bf16.gmra.mxu1 %v2328_v47  ;;  %v2368_v23 = vor.u32 %v2585_v20, %v2365_v21  ;;  %v2584_v47 = vld [vmem:[%s2765_s30 + $0x100] sm:$0xf0]  ;;  %v2872_v48 = vpop.f32.mrf.mxu1  ;;  %v2401_v21 = vld [vmem:[%s2765_s30 + $0x15c] sm:$0xf0] }
 0x277   : > { %v2360_v56 = vor.u32 %v2584_v47, %v2359_v46  ;;  %v2395_v46 = vld [vmem:[%s2765_s30 + $0x140] sm:$0xf]  ;;  %v2593_v47 = vld [vmem:[%s2765_s30 + $0x148] sm:$0xf0] }
 0x279   : > { %v1475_v28 = vpop.f32.mrf.mxu2 }
 0x27e   : > { %1509 = vmatmul.bf16.gmra.mxu2 %v2356_v6  ;;  %v2878_v59 = vpop.f32.mrf.mxu1 }
 0x281   : > { %v2864_v39 = vpop.f32.mrf.mxu2 }
 0x286   : > { %1608 = vmatmul.bf16.gmra.mxu3 %v2288_v32  ;;  %1375 = vmatmul.bf16.gmra.mxu1 %v2340_v0  ;;  %v2364_v32 = vor.u32 %v2586_v30, %v2363_v29  ;;  %v2399_v29 = vld [vmem:[%s2765_s30 + $0x150] sm:$0xf]  ;;  %v2595_v30 = vld [vmem:[%s2765_s30 + $0x158] sm:$0xf0] }
 0x289   : > { %v1480_v49 = vpop.f32.mrf.mxu2 }
 0x28e   : > { %1514 = vmatmul.bf16.gmra.mxu2 %v2368_v23  ;;  %v2404_v23 = vor.u32 %v2594_v17, %v2401_v21  ;;  %v2437_v21 = vld [vmem:[%s2765_s30 + $0x1a4] sm:$0xf0] }
 0x291   : > { %v2880_v60 = vpop.f32.mrf.mxu2 }
 0x296   : > { %1613 = vmatmul.bf16.gmra.mxu3 %v2300_v41  ;;  %1380 = vmatmul.bf16.gmra.mxu1 %v2352_v13  ;;  %v2588_v41 = vld [vmem:[%s2765_s30 + $0x124] sm:$0xf] }
 0x297   : > { %v2380_v44 = vor.u32 %v2588_v41, %v2377_v42  ;;  %v2413_v42 = vld [vmem:[%s2765_s30 + $0x174] sm:$0xf0] }
 0x299   : > { %v1485_v6 = vpop.f32.mrf.mxu2 }
 0x29e   : > { %1519 = vmatmul.bf16.gmra.mxu2 %v2380_v44 }
 0x2a1   : > { %v2899_v20 = vpop.f32.mrf.mxu2 }
 0x2a6   : > { %1618 = vmatmul.bf16.gmra.mxu3 %v2312_v52  ;;  %1385 = vmatmul.bf16.gmra.mxu1 %v2364_v32  ;;  %v1468_v52 = vadd.f32 %v1467_v3, %v1338_v2  ;;  %v2371_v3 = vld [vmem:[%s2765_s30 + $0x110] sm:$0xf]  ;;  %v2400_v32 = vor.u32 %v2595_v30, %v2399_v29  ;;  %v2435_v29 = vld [vmem:[%s2765_s30 + $0x198] sm:$0xf]  ;;  %v2604_v30 = vld [vmem:[%s2765_s30 + $0x1a0] sm:$0xf0] }
 0x2a7   : > { %v2372_v13 = vor.u32 %v2587_v4, %v2371_v3  ;;  %v2407_v3 = vld [vmem:[%s2765_s30 + $0x158] sm:$0xf]  ;;  %v2596_v4 = vld [vmem:[%s2765_s30 + $0x160] sm:$0xf0] }
 0x2b6   : > { %1623 = vmatmul.bf16.gmra.mxu3 %v2324_v1  ;;  %1390 = vmatmul.bf16.gmra.mxu1 %v2376_v53  ;;  %v2392_v1 = vor.u32 %v2591_v62, %v2389_v63  ;;  %v2412_v53 = vor.u32 %v2598_v51, %v2411_v50  ;;  %v2425_v63 = vld [vmem:[%s2765_s30 + $0x18c] sm:$0xf0]  ;;  %v2607_v51 = vld [vmem:[%s2765_s30 + $0x1b8] sm:$0xf0] }
 0x2b7   : > { %v2447_v50 = vld [vmem:[%s2765_s30 + $0x1b0] sm:$0xf] }
 0x2b8   : > { %1524 = vmatmul.bf16.gmra.mxu2 %v2392_v1 }
 0x2c3   : > { %v2888_v5 = vpop.f32.mrf.mxu1 }
 0x2c6   : > { %1628 = vmatmul.bf16.gmra.mxu3 %v2336_v14  ;;  %1395 = vmatmul.bf16.gmra.mxu1 %v2388_v10  ;;  %v2424_v10 = vor.u32 %v2601_v8, %v2423_v7  ;;  %v2459_v7 = vld [vmem:[%s2765_s30 + $0x1c8] sm:$0xf]  ;;  %v2610_v8 = vld [vmem:[%s2765_s30 + $0x1d0] sm:$0xf0] }
 0x2c8   : > { %1529 = vmatmul.bf16.gmra.mxu2 %v2404_v23 }
 0x2c9   : > { %v1589_v19 = vpop.f32.mrf.mxu3 }
 0x2ca   : > { %v1590_v22 = vadd.f32 %v1589_v19, %v1461_v15  ;;  %v1476_v15 = vadd.f32 %v1475_v28, %v2856_v27  ;;  %v1490_v28 = vpop.f32.mrf.mxu2 }
 0x2cb   : > { %v2897_v19 = vpop.f32.mrf.mxu1 }
 0x2cc   : > { %v1860_v24 = vadd.f32 %v2843_v18, %v1590_v22 }
 0x2ce   : > { %1908 = vst [vmem:[%s2850_s13] sm:$0xff] %v1860_v24 }
 0x2d1   : > { %v1591_v33 = vpop.f32.mrf.mxu3 }
 0x2d2   : > { %v1592_v34 = vadd.f32 %v1591_v33, %v1463_v31  ;;  %v1478_v31 = vadd.f32 %v2864_v39, %v2862_v38  ;;  %v2918_v41 = vpop.f32.mrf.mxu2  ;;  %v2597_v39 = vld [vmem:[%s2765_s30 + $0x16c] sm:$0xf] }
 0x2d3   : > { %v2907_v27 = vpop.f32.mrf.mxu1  ;;  %v2416_v44 = vor.u32 %v2597_v39, %v2413_v42  ;;  %v2449_v42 = vld [vmem:[%s2765_s30 + $0x1bc] sm:$0xf0] }
 0x2d4   : > { %v1861_v36 = vadd.f32 %v2843_v18, %v1592_v34 }
 0x2d6   : > { %1909 = vst [vmem:[%s2850_s13 + $0x8] sm:$0xff] %v1861_v36  ;;  %1633 = vmatmul.bf16.gmra.mxu3 %v2348_v35  ;;  %v2384_v35 = vor.u32 %v2590_v26, %v2383_v25  ;;  %1400 = vmatmul.bf16.gmra.mxu1 %v2400_v32  ;;  %v2419_v25 = vld [vmem:[%s2765_s30 + $0x170] sm:$0xf]  ;;  %v2599_v26 = vld [vmem:[%s2765_s30 + $0x178] sm:$0xf0]  ;;  %v2436_v32 = vor.u32 %v2604_v30, %v2435_v29 }
 0x2d7   : > { %v2471_v29 = vld [vmem:[%s2765_s30 + $0x1e0] sm:$0xf]  ;;  %v2613_v30 = vld [vmem:[%s2765_s30 + $0x1e8] sm:$0xf0] }
 0x2d8   : > { %1534 = vmatmul.bf16.gmra.mxu2 %v2416_v44 }
 0x2d9   : > { %v1594_v40 = vpop.f32.mrf.mxu3 }
 0x2da   : > { %v1595_v43 = vadd.f32 %v1594_v40, %v1466_v37  ;;  %v1481_v37 = vadd.f32 %v1480_v49, %v2872_v48  ;;  %v1495_v49 = vpop.f32.mrf.mxu2 }
 0x2db   : > { %v2916_v40 = vpop.f32.mrf.mxu1 }
 0x2dc   : > { %v1862_v45 = vadd.f32 %v2843_v18, %v1595_v43 }
 0x2de   : > { %1910 = vst [vmem:[%s2850_s13 + $0x10] sm:$0xff] %v1862_v45 }
 0x2e1   : > { %v1596_v54 = vpop.f32.mrf.mxu3 }
 0x2e2   : > { %v1597_v55 = vadd.f32 %v1596_v54, %v1468_v52  ;;  %v1483_v52 = vadd.f32 %v2880_v60, %v2878_v59  ;;  %v2937_v62 = vpop.f32.mrf.mxu2  ;;  %v2600_v60 = vld [vmem:[%s2765_s30 + $0x184] sm:$0xf] }
 0x2e3   : > { %v2926_v48 = vpop.f32.mrf.mxu1  ;;  %v2428_v1 = vor.u32 %v2600_v60, %v2425_v63  ;;  %v2461_v63 = vld [vmem:[%s2765_s30 + $0x1d4] sm:$0xf0] }
 0x2e4   : > { %v1863_v57 = vadd.f32 %v2843_v18, %v1597_v55 }
 0x2e6   : > { %1911 = vst [vmem:[%s2850_s13 + $0x18] sm:$0xff] %v1863_v57  ;;  %1638 = vmatmul.bf16.gmra.mxu3 %v2360_v56  ;;  %v2396_v56 = vor.u32 %v2593_v47, %v2395_v46  ;;  %1405 = vmatmul.bf16.gmra.mxu1 %v2412_v53  ;;  %v2431_v46 = vld [vmem:[%s2765_s30 + $0x188] sm:$0xf]  ;;  %v2602_v47 = vld [vmem:[%s2765_s30 + $0x190] sm:$0xf0]  ;;  %v2448_v53 = vor.u32 %v2607_v51, %v2447_v50 }
 0x2e7   : > { %v2483_v50 = vld [vmem:[%s2765_s30 + $0x1f8] sm:$0xf]  ;;  %v2616_v51 = vld [vmem:[%s2765_s30 + $0x200] sm:$0xf0] }
 0x2e8   : > { %1539 = vmatmul.bf16.gmra.mxu2 %v2428_v1 }
 0x2e9   : > { %v1599_v61 = vpop.f32.mrf.mxu3 }
 0x2ea   : > { %v1600_v0 = vadd.f32 %v1599_v61, %v1471_v58  ;;  %v1486_v58 = vadd.f32 %v1485_v6, %v2888_v5  ;;  %v1500_v6 = vpop.f32.mrf.mxu2 }
 0x2eb   : > { %v2935_v61 = vpop.f32.mrf.mxu1 }
 0x2ec   : > { %v1864_v2 = vadd.f32 %v2843_v18, %v1600_v0 }
 0x2ee   : > { %1912 = vst [vmem:[%s2850_s13 + $0x20] sm:$0xff] %v1864_v2 }
 0x2f1   : > { %v1601_v11 = vpop.f32.mrf.mxu3 }
 0x2f2   : > { %v1602_v12 = vadd.f32 %v1601_v11, %v1473_v9  ;;  %v1488_v9 = vadd.f32 %v2899_v20, %v2897_v19  ;;  %v2956_v17 = vpop.f32.mrf.mxu2  ;;  %v2603_v20 = vld [vmem:[%s2765_s30 + $0x19c] sm:$0xf] }
 0x2f3   : > { %v2945_v5 = vpop.f32.mrf.mxu1  ;;  %v2440_v23 = vor.u32 %v2603_v20, %v2437_v21  ;;  %v2473_v21 = vld [vmem:[%s2765_s30 + $0x1ec] sm:$0xf0] }
 0x2f4   : > { %v1865_v14 = vadd.f32 %v2843_v18, %v1602_v12 }
 0x2f6   : > { %1913 = vst [vmem:[%s2850_s13 + $0x28] sm:$0xff] %v1865_v14  ;;  %1643 = vmatmul.bf16.gmra.mxu3 %v2372_v13  ;;  %v2408_v13 = vor.u32 %v2596_v4, %v2407_v3  ;;  %1410 = vmatmul.bf16.gmra.mxu1 %v2424_v10  ;;  %v2443_v3 = vld [vmem:[%s2765_s30 + $0x1a0] sm:$0xf]  ;;  %v2605_v4 = vld [vmem:[%s2765_s30 + $0x1a8] sm:$0xf0]  ;;  %v2460_v10 = vor.u32 %v2610_v8, %v2459_v7 }
 0x2f7   : > { %v2619_v8 = vld [vmem:[%s2765_s30 + $0x218] sm:$0xf0] }
 0x2f8   : > { %1544 = vmatmul.bf16.gmra.mxu2 %v2440_v23 }
 0x2f9   : > { %v1604_v16 = vpop.f32.mrf.mxu3 }
 0x2fa   : > { %v1605_v22 = vadd.f32 %v1604_v16, %v1476_v15  ;;  %v1491_v15 = vadd.f32 %v1490_v28, %v2907_v27  ;;  %v1505_v28 = vpop.f32.mrf.mxu2 }
 0x2fb   : > { %v2954_v16 = vpop.f32.mrf.mxu1 }
 0x2fc   : > { %v1866_v24 = vadd.f32 %v2843_v18, %v1605_v22 }
 0x2fe   : > { %1914 = vst [vmem:[%s2850_s13 + $0x30] sm:$0xff] %v1866_v24 }
 0x301   : > { %v1606_v33 = vpop.f32.mrf.mxu3 }
 0x302   : > { %v1607_v34 = vadd.f32 %v1606_v33, %v1478_v31  ;;  %v1493_v31 = vadd.f32 %v2918_v41, %v2916_v40  ;;  %v2975_v39 = vpop.f32.mrf.mxu2  ;;  %v2606_v41 = vld [vmem:[%s2765_s30 + $0x1b4] sm:$0xf] }
 0x303   : > { %v2964_v27 = vpop.f32.mrf.mxu1  ;;  %v2452_v44 = vor.u32 %v2606_v41, %v2449_v42  ;;  %v2485_v42 = vld [vmem:[%s2765_s30 + $0x204] sm:$0xf0] }
 0x304   : > { %v1867_v36 = vadd.f32 %v2843_v18, %v1607_v34 }
 0x306   : > { %1915 = vst [vmem:[%s2850_s13 + $0x38] sm:$0xff] %v1867_v36  ;;  %1648 = vmatmul.bf16.gmra.mxu3 %v2384_v35  ;;  %v2420_v35 = vor.u32 %v2599_v26, %v2419_v25  ;;  %1415 = vmatmul.bf16.gmra.mxu1 %v2436_v32  ;;  %v2455_v25 = vld [vmem:[%s2765_s30 + $0x1b8] sm:$0xf]  ;;  %v2608_v26 = vld [vmem:[%s2765_s30 + $0x1c0] sm:$0xf0]  ;;  %v2472_v32 = vor.u32 %v2613_v30, %v2471_v29 }
 0x307   : > { %v2507_v29 = vld [vmem:[%s2765_s30 + $0x228] sm:$0xf]  ;;  %v2622_v30 = vld [vmem:[%s2765_s30 + $0x230] sm:$0xf0] }
 0x308   : > { %1549 = vmatmul.bf16.gmra.mxu2 %v2452_v44 }
 0x309   : > { %v1609_v38 = vpop.f32.mrf.mxu3 }
 0x30a   : > { %v1610_v43 = vadd.f32 %v1609_v38, %v1481_v37  ;;  %v1496_v37 = vadd.f32 %v1495_v49, %v2926_v48  ;;  %v1510_v49 = vpop.f32.mrf.mxu2 }
 0x30b   : > { %v2973_v38 = vpop.f32.mrf.mxu1 }
 0x30c   : > { %v1868_v45 = vadd.f32 %v2843_v18, %v1610_v43 }
 0x30e   : > { %1916 = vst [vmem:[%s2850_s13 + $0x40] sm:$0xff] %v1868_v45 }
 0x311   : > { %v1611_v54 = vpop.f32.mrf.mxu3 }
 0x312   : > { %v1612_v55 = vadd.f32 %v1611_v54, %v1483_v52  ;;  %v1498_v52 = vadd.f32 %v2937_v62, %v2935_v61  ;;  %v2994_v60 = vpop.f32.mrf.mxu2  ;;  %v2609_v62 = vld [vmem:[%s2765_s30 + $0x1cc] sm:$0xf] }
 0x313   : > { %v2983_v48 = vpop.f32.mrf.mxu1  ;;  %v2464_v1 = vor.u32 %v2609_v62, %v2461_v63 }
 0x314   : > { %v1869_v57 = vadd.f32 %v2843_v18, %v1612_v55 }
 0x316   : > { %1917 = vst [vmem:[%s2850_s13 + $0x48] sm:$0xff] %v1869_v57  ;;  %1653 = vmatmul.bf16.gmra.mxu3 %v2396_v56  ;;  %v2432_v56 = vor.u32 %v2602_v47, %v2431_v46  ;;  %1420 = vmatmul.bf16.gmra.mxu1 %v2448_v53  ;;  %v2467_v46 = vld [vmem:[%s2765_s30 + $0x1d0] sm:$0xf]  ;;  %v2611_v47 = vld [vmem:[%s2765_s30 + $0x1d8] sm:$0xf0]  ;;  %v2484_v53 = vor.u32 %v2616_v51, %v2483_v50 }
 0x318   : > { %1554 = vmatmul.bf16.gmra.mxu2 %v2464_v1 }
 0x319   : > { %v1614_v59 = vpop.f32.mrf.mxu3 }
 0x31a   : > { %v1615_v0 = vadd.f32 %v1614_v59, %v1486_v58  ;;  %v1501_v58 = vadd.f32 %v1500_v6, %v2945_v5  ;;  %v1515_v6 = vpop.f32.mrf.mxu2 }
 0x31b   : > { %v2992_v59 = vpop.f32.mrf.mxu1 }
 0x31c   : > { %v1870_v2 = vadd.f32 %v2843_v18, %v1615_v0 }
 0x31e   : > { %1918 = vst [vmem:[%s2850_s13 + $0x50] sm:$0xff] %v1870_v2 }
 0x321   : > { %v1616_v11 = vpop.f32.mrf.mxu3 }
 0x322   : > { %v1617_v12 = vadd.f32 %v1616_v11, %v1488_v9  ;;  %v1503_v9 = vadd.f32 %v2956_v17, %v2954_v16  ;;  %v3013_v20 = vpop.f32.mrf.mxu2  ;;  %v2612_v17 = vld [vmem:[%s2765_s30 + $0x1e4] sm:$0xf] }
 0x323   : > { %v3002_v5 = vpop.f32.mrf.mxu1  ;;  %v2476_v23 = vor.u32 %v2612_v17, %v2473_v21 }
 0x324   : > { %v1871_v14 = vadd.f32 %v2843_v18, %v1617_v12 }
 0x326   : > { %1919 = vst [vmem:[%s2850_s13 + $0x58] sm:$0xff] %v1871_v14  ;;  %1658 = vmatmul.bf16.gmra.mxu3 %v2408_v13  ;;  %v2444_v13 = vor.u32 %v2605_v4, %v2443_v3  ;;  %1425 = vmatmul.bf16.gmra.mxu1 %v2460_v10  ;;  %v2479_v3 = vld [vmem:[%s2765_s30 + $0x1e8] sm:$0xf]  ;;  %v2614_v4 = vld [vmem:[%s2765_s30 + $0x1f0] sm:$0xf0] }
 0x328   : > { %1559 = vmatmul.bf16.gmra.mxu2 %v2476_v23 }
 0x329   : > { %v1619_v19 = vpop.f32.mrf.mxu3 }
 0x32a   : > { %v1620_v22 = vadd.f32 %v1619_v19, %v1491_v15  ;;  %v1506_v15 = vadd.f32 %v1505_v28, %v2964_v27  ;;  %v1520_v28 = vpop.f32.mrf.mxu2 }
 0x32b   : > { %v3011_v19 = vpop.f32.mrf.mxu1 }
 0x32c   : > { %v1872_v24 = vadd.f32 %v2843_v18, %v1620_v22 }
 0x32e   : > { %1920 = vst [vmem:[%s2850_s13 + $0x60] sm:$0xff] %v1872_v24 }
 0x331   : > { %v1621_v33 = vpop.f32.mrf.mxu3 }
 0x332   : > { %v1622_v34 = vadd.f32 %v1621_v33, %v1493_v31  ;;  %v1508_v31 = vadd.f32 %v2975_v39, %v2973_v38  ;;  %v3032_v41 = vpop.f32.mrf.mxu2  ;;  %v2615_v39 = vld [vmem:[%s2765_s30 + $0x1fc] sm:$0xf] }
 0x333   : > { %v3021_v27 = vpop.f32.mrf.mxu1  ;;  %v2488_v44 = vor.u32 %v2615_v39, %v2485_v42 }
 0x334   : > { %v1873_v36 = vadd.f32 %v2843_v18, %v1622_v34 }
 0x336   : > { %1921 = vst [vmem:[%s2850_s13 + $0x68] sm:$0xff] %v1873_v36  ;;  %1663 = vmatmul.bf16.gmra.mxu3 %v2420_v35  ;;  %v2456_v35 = vor.u32 %v2608_v26, %v2455_v25  ;;  %1430 = vmatmul.bf16.gmra.mxu1 %v2472_v32  ;;  %v2491_v25 = vld [vmem:[%s2765_s30 + $0x200] sm:$0xf]  ;;  %v2617_v26 = vld [vmem:[%s2765_s30 + $0x208] sm:$0xf0] }
 0x338   : > { %1564 = vmatmul.bf16.gmra.mxu2 %v2488_v44  ;;  %v2620_v44 = vld [vmem:[%s2765_s30 + $0x220] sm:$0xf0] }
 0x339   : > { %v1624_v40 = vpop.f32.mrf.mxu3 }
 0x33a   : > { %v1625_v43 = vadd.f32 %v1624_v40, %v1496_v37  ;;  %v1511_v37 = vadd.f32 %v1510_v49, %v2983_v48 }
 0x33b   : > { %v3030_v40 = vpop.f32.mrf.mxu1  ;;  %v1525_v49 = vpop.f32.mrf.mxu2 }
 0x33c   : > { %v1874_v45 = vadd.f32 %v2843_v18, %v1625_v43 }
 0x33e   : > { %1922 = vst [vmem:[%s2850_s13 + $0x70] sm:$0xff] %v1874_v45 }
 0x341   : > { %v1626_v54 = vpop.f32.mrf.mxu3 }
 0x342   : > { %v1627_v55 = vadd.f32 %v1626_v54, %v1498_v52  ;;  %v1513_v52 = vadd.f32 %v2994_v60, %v2992_v59  ;;  %v2618_v59 = vld [vmem:[%s2765_s30 + $0x214] sm:$0xf]  ;;  %v2497_v60 = vld [vmem:[%s2765_s30 + $0x21c] sm:$0xf0] }
 0x343   : > { %v3040_v48 = vpop.f32.mrf.mxu1  ;;  %v1527_v62 = vpop.f32.mrf.mxu2  ;;  %v2500_v1 = vor.u32 %v2618_v59, %v2497_v60 }
 0x344   : > { %v1875_v57 = vadd.f32 %v2843_v18, %v1627_v55 }
 0x346   : > { %1923 = vst [vmem:[%s2850_s13 + $0x78] sm:$0xff] %v1875_v57  ;;  %1668 = vmatmul.bf16.gmra.mxu3 %v2432_v56  ;;  %v2468_v56 = vor.u32 %v2611_v47, %v2467_v46  ;;  %1435 = vmatmul.bf16.gmra.mxu1 %v2484_v53 }
 0x348   : > { %1569 = vmatmul.bf16.gmra.mxu2 %v2500_v1 }
 0x349   : > { %v1629_v61 = vpop.f32.mrf.mxu3 }
 0x34a   : > { %v1630_v0 = vadd.f32 %v1629_v61, %v1501_v58  ;;  %v1516_v58 = vadd.f32 %v1515_v6, %v3002_v5  ;;  %v2495_v6 = vld [vmem:[%s2765_s30 + $0x210] sm:$0xf] }
 0x34b   : > { %v1398_v61 = vpop.f32.mrf.mxu1  ;;  %v1530_v5 = vpop.f32.mrf.mxu2  ;;  %v2496_v10 = vor.u32 %v2619_v8, %v2495_v6 }
 0x34c   : > { %v1876_v2 = vadd.f32 %v2843_v18, %v1630_v0 }
 0x34e   : > { %1924 = vst [vmem:[%s2850_s13 + $0x80] sm:$0xff] %v1876_v2 }
 0x351   : > { %v1631_v11 = vpop.f32.mrf.mxu3 }
 0x352   : > { %v1632_v12 = vadd.f32 %v1631_v11, %v1503_v9  ;;  %v1518_v9 = vadd.f32 %v3013_v20, %v3011_v19  ;;  %v2621_v19 = vld [vmem:[%s2765_s30 + $0x22c] sm:$0xf]  ;;  %v2509_v20 = vld [vmem:[%s2765_s30 + $0x234] sm:$0xf0] }
 0x353   : > { %v1401_v7 = vpop.f32.mrf.mxu1  ;;  %v1532_v21 = vpop.f32.mrf.mxu2  ;;  %v2512_v23 = vor.u32 %v2621_v19, %v2509_v20 }
 0x354   : > { %v1877_v14 = vadd.f32 %v2843_v18, %v1632_v12 }
 0x356   : > { %1925 = vst [vmem:[%s2850_s13 + $0x88] sm:$0xff] %v1877_v14  ;;  %1673 = vmatmul.bf16.gmra.mxu3 %v2444_v13  ;;  %v2480_v13 = vor.u32 %v2614_v4, %v2479_v3  ;;  %1440 = vmatmul.bf16.gmra.mxu1 %v2496_v10 }
 0x358   : > { %1574 = vmatmul.bf16.gmra.mxu2 %v2512_v23 }
 0x359   : > { %v1634_v16 = vpop.f32.mrf.mxu3 }
 0x35a   : > { %v1635_v22 = vadd.f32 %v1634_v16, %v1506_v15  ;;  %v1521_v15 = vadd.f32 %v1520_v28, %v3021_v27  ;;  %v1523_v27 = vadd.f32 %v3032_v41, %v3030_v40  ;;  %v2508_v28 = vor.u32 %v2622_v30, %v2507_v29 }
 0x35b   : > { %v1403_v16 = vpop.f32.mrf.mxu1 }
 0x35c   : > { %v1878_v24 = vadd.f32 %v2843_v18, %v1635_v22 }
 0x35e   : > { %1926 = vst [vmem:[%s2850_s13 + $0x90] sm:$0xff] %v1878_v24 }
 0x361   : > { %v1636_v33 = vpop.f32.mrf.mxu3 }
 0x362   : > { %v1637_v34 = vadd.f32 %v1636_v33, %v1508_v31  ;;  %v2492_v33 = vor.u32 %v2617_v26, %v2491_v25 }
 0x364   : > { %v1879_v36 = vadd.f32 %v2843_v18, %v1637_v34  ;;  %v1406_v34 = vpop.f32.mrf.mxu1 }
 0x366   : > { %1927 = vst [vmem:[%s2850_s13 + $0x98] sm:$0xff] %v1879_v36  ;;  %1678 = vmatmul.bf16.gmra.mxu3 %v2456_v35  ;;  %1445 = vmatmul.bf16.gmra.mxu1 %v2508_v28  ;;  %v1535_v35 = vpop.f32.mrf.mxu2 }
 0x367   : > { %v1536_v1 = vadd.f32 %v1535_v35, %v1406_v34 }
 0x369   : > { %v1639_v38 = vpop.f32.mrf.mxu3 }
 0x36a   : > { %v1640_v43 = vadd.f32 %v1639_v38, %v1511_v37  ;;  %v1526_v37 = vadd.f32 %v1525_v49, %v3040_v48  ;;  %v1531_v49 = vadd.f32 %v1530_v5, %v1401_v7 }
 0x36c   : > { %v1880_v45 = vadd.f32 %v2843_v18, %v1640_v43  ;;  %v1408_v41 = vpop.f32.mrf.mxu1  ;;  %v2503_v43 = vld [vmem:[%s2765_s30 + $0x218] sm:$0xf] }
 0x36d   : > { %v2504_v50 = vor.u32 %v2620_v44, %v2503_v43 }
 0x36e   : > { %1928 = vst [vmem:[%s2850_s13 + $0xa0] sm:$0xff] %v1880_v45  ;;  %v1537_v42 = vpop.f32.mrf.mxu2  ;;  %v1528_v45 = vadd.f32 %v1527_v62, %v1398_v61 }
 0x36f   : > { %v1538_v6 = vadd.f32 %v1537_v42, %v1408_v41 }
 0x371   : > { %v1641_v54 = vpop.f32.mrf.mxu3 }
 0x372   : > { %v1642_v55 = vadd.f32 %v1641_v54, %v1513_v52 }
 0x374   : > { %v1881_v57 = vadd.f32 %v2843_v18, %v1642_v55  ;;  %v1411_v51 = vpop.f32.mrf.mxu1 }
 0x376   : > { %1929 = vst [vmem:[%s2850_s13 + $0xa8] sm:$0xff] %v1881_v57  ;;  %1683 = vmatmul.bf16.gmra.mxu3 %v2468_v56  ;;  %v1540_v52 = vpop.f32.mrf.mxu2  ;;  %v2515_v56 = vld [vmem:[%s2765_s30 + $0x230] sm:$0xf]  ;;  %v2623_v57 = vld [vmem:[%s2765_s30 + $0x238] sm:$0xf0] }
 0x377   : > { %v2516_v60 = vor.u32 %v2623_v57, %v2515_v56 }
 0x379   : > { %v1644_v63 = vpop.f32.mrf.mxu3 }
 0x37a   : > { %v1645_v0 = vadd.f32 %v1644_v63, %v1516_v58  ;;  %v1533_v58 = vadd.f32 %v1532_v21, %v1403_v16 }
 0x37c   : > { %v1882_v2 = vadd.f32 %v2843_v18, %v1645_v0  ;;  %v1413_v61 = vpop.f32.mrf.mxu1 }
 0x37e   : > { %1930 = vst [vmem:[%s2850_s13 + $0xb0] sm:$0xff] %v1882_v2  ;;  %v1542_v63 = vpop.f32.mrf.mxu2 }
 0x37f   : > { %v1543_v19 = vadd.f32 %v1542_v63, %v1413_v61 }
 0x381   : > { %v1646_v11 = vpop.f32.mrf.mxu3 }
 0x382   : > { %v1647_v12 = vadd.f32 %v1646_v11, %v1518_v9 }
 0x384   : > { %v1883_v14 = vadd.f32 %v2843_v18, %v1647_v12  ;;  %v1416_v4 = vpop.f32.mrf.mxu1 }
 0x386   : > { %1931 = vst [vmem:[%s2850_s13 + $0xb8] sm:$0xff] %v1883_v14  ;;  %1688 = vmatmul.bf16.gmra.mxu3 %v2480_v13  ;;  %v1545_v7 = vpop.f32.mrf.mxu2  ;;  %v1541_v13 = vadd.f32 %v1540_v52, %v1411_v51 }
 0x389   : > { %v1649_v17 = vpop.f32.mrf.mxu3 }
 0x38a   : > { %v1650_v22 = vadd.f32 %v1649_v17, %v1521_v15 }
 0x38c   : > { %v1884_v24 = vadd.f32 %v2843_v18, %v1650_v22  ;;  %v1418_v11 = vpop.f32.mrf.mxu1 }
 0x38e   : > { %1932 = vst [vmem:[%s2850_s13 + $0xc0] sm:$0xff] %v1884_v24  ;;  %v1547_v12 = vpop.f32.mrf.mxu2  ;;  %v1546_v24 = vadd.f32 %v1545_v7, %v1416_v4 }
 0x38f   : > { %v1548_v28 = vadd.f32 %v1547_v12, %v1418_v11 }
 0x391   : > { %v1651_v31 = vpop.f32.mrf.mxu3 }
 0x392   : > { %v1652_v32 = vadd.f32 %v1651_v31, %v1523_v27 }
 0x394   : > { %v1885_v36 = vadd.f32 %v2843_v18, %v1652_v32  ;;  %v1421_v17 = vpop.f32.mrf.mxu1 }
 0x396   : > { %1933 = vst [vmem:[%s2850_s13 + $0xc8] sm:$0xff] %v1885_v36  ;;  %1693 = vmatmul.bf16.gmra.mxu3 %v2492_v33  ;;  %v1550_v21 = vpop.f32.mrf.mxu2 }
 0x397   : > { %v1551_v36 = vadd.f32 %v1550_v21, %v1421_v17 }
 0x399   : > { %v1654_v38 = vpop.f32.mrf.mxu3 }
 0x39a   : > { %v1655_v39 = vadd.f32 %v1654_v38, %v1526_v37 }
 0x39c   : > { %v1886_v40 = vadd.f32 %v2843_v18, %v1655_v39  ;;  %v1423_v25 = vpop.f32.mrf.mxu1 }
 0x39e   : > { %1934 = vst [vmem:[%s2850_s13 + $0xd0] sm:$0xff] %v1886_v40  ;;  %v1552_v29 = vpop.f32.mrf.mxu2 }
 0x39f   : > { %v1553_v42 = vadd.f32 %v1552_v29, %v1423_v25 }
 0x3a1   : > { %v1656_v46 = vpop.f32.mrf.mxu3 }
 0x3a2   : > { %v1657_v47 = vadd.f32 %v1656_v46, %v1528_v45 }
 0x3a4   : > { %v1887_v48 = vadd.f32 %v2843_v18, %v1657_v47  ;;  %v1426_v33 = vpop.f32.mrf.mxu1 }
 0x3a6   : > { %1935 = vst [vmem:[%s2850_s13 + $0xd8] sm:$0xff] %v1887_v48  ;;  %1698 = vmatmul.bf16.gmra.mxu3 %v2504_v50  ;;  %v1555_v34 = vpop.f32.mrf.mxu2 }
 0x3a7   : > { %v1556_v46 = vadd.f32 %v1555_v34, %v1426_v33 }
 0x3a9   : > { %v1659_v53 = vpop.f32.mrf.mxu3 }
 0x3aa   : > { %v1660_v54 = vadd.f32 %v1659_v53, %v1531_v49 }
 0x3ac   : > { %v1888_v55 = vadd.f32 %v2843_v18, %v1660_v54  ;;  %v1428_v40 = vpop.f32.mrf.mxu1 }
 0x3ae   : > { %1936 = vst [vmem:[%s2850_s13 + $0xe0] sm:$0xff] %v1888_v55  ;;  %v1557_v41 = vpop.f32.mrf.mxu2 }
 0x3af   : > { %v1558_v52 = vadd.f32 %v1557_v41, %v1428_v40 }
 0x3b1   : > { %v1661_v62 = vpop.f32.mrf.mxu3 }
 0x3b2   : > { %v1662_v59 = vadd.f32 %v1661_v62, %v1533_v58 }
 0x3b4   : > { %v1889_v0 = vadd.f32 %v2843_v18, %v1662_v59  ;;  %v1431_v47 = vpop.f32.mrf.mxu1 }
 0x3b6   : > { %1937 = vst [vmem:[%s2850_s13 + $0xe8] sm:$0xff] %v1889_v0  ;;  %1703 = vmatmul.bf16.gmra.mxu3 %v2516_v60  ;;  %v1560_v50 = vpop.f32.mrf.mxu2 }
 0x3b7   : > { %v1561_v58 = vadd.f32 %v1560_v50, %v1431_v47 }
 0x3b9   : > { %v1664_v2 = vpop.f32.mrf.mxu3 }
 0x3ba   : > { %v1665_v3 = vadd.f32 %v1664_v2, %v1536_v1 }
 0x3bc   : > { %v1890_v5 = vadd.f32 %v2843_v18, %v1665_v3  ;;  %v1433_v53 = vpop.f32.mrf.mxu1 }
 0x3be   : > { %1938 = vst [vmem:[%s2850_s13 + $0xf0] sm:$0xff] %v1890_v5  ;;  %v1562_v55 = vpop.f32.mrf.mxu2 }
 0x3bf   : > { %v1563_v0 = vadd.f32 %v1562_v55, %v1433_v53 }
 0x3c1   : > { %v1666_v8 = vpop.f32.mrf.mxu3 }
 0x3c2   : > { %v1667_v9 = vadd.f32 %v1666_v8, %v1538_v6 }
 0x3c4   : > { %v1891_v10 = vadd.f32 %v2843_v18, %v1667_v9  ;;  %v1436_v63 = vpop.f32.mrf.mxu1 }
 0x3c6   : > { %1939 = vst [vmem:[%s2850_s13 + $0xf8] sm:$0xff] %v1891_v10  ;;  %v1565_v59 = vpop.f32.mrf.mxu2 }
 0x3c7   : > { %v1566_v5 = vadd.f32 %v1565_v59, %v1436_v63 }
 0x3c9   : > { %v1669_v14 = vpop.f32.mrf.mxu3 }
 0x3ca   : > { %v1670_v15 = vadd.f32 %v1669_v14, %v1541_v13 }
 0x3cc   : > { %v1892_v16 = vadd.f32 %v2843_v18, %v1670_v15  ;;  %v1438_v4 = vpop.f32.mrf.mxu1 }
 0x3ce   : > { %1940 = vst [vmem:[%s2850_s13 + $0x100] sm:$0xff] %v1892_v16  ;;  %v1567_v7 = vpop.f32.mrf.mxu2 }
 0x3cf   : > { %v1568_v12 = vadd.f32 %v1567_v7, %v1438_v4 }
 0x3d1   : > { %v1671_v20 = vpop.f32.mrf.mxu3 }
 0x3d2   : > { %v1672_v22 = vadd.f32 %v1671_v20, %v1543_v19 }
 0x3d4   : > { %v1893_v23 = vadd.f32 %v2843_v18, %v1672_v22  ;;  %v1441_v10 = vpop.f32.mrf.mxu1 }
 0x3d6   : > { %1941 = vst [vmem:[%s2850_s13 + $0x108] sm:$0xff] %v1893_v23  ;;  %v1570_v11 = vpop.f32.mrf.mxu2 }
 0x3d7   : > { %v1571_v16 = vadd.f32 %v1570_v11, %v1441_v10 }
 0x3d9   : > { %v1674_v26 = vpop.f32.mrf.mxu3 }
 0x3da   : > { %v1675_v30 = vadd.f32 %v1674_v26, %v1546_v24 }
 0x3dc   : > { %v1894_v27 = vadd.f32 %v2843_v18, %v1675_v30  ;;  %v1443_v17 = vpop.f32.mrf.mxu1 }
 0x3de   : > { %1942 = vst [vmem:[%s2850_s13 + $0x110] sm:$0xff] %v1894_v27  ;;  %v1572_v21 = vpop.f32.mrf.mxu2 }
 0x3df   : > { %v1573_v23 = vadd.f32 %v1572_v21, %v1443_v17 }
 0x3e1   : > { %v1676_v31 = vpop.f32.mrf.mxu3 }
 0x3e2   : > { %v1677_v32 = vadd.f32 %v1676_v31, %v1548_v28 }
 0x3e4   : > { %v1895_v35 = vadd.f32 %v2843_v18, %v1677_v32  ;;  %v1446_v26 = vpop.f32.mrf.mxu1 }
 0x3e6   : > { %1943 = vst [vmem:[%s2850_s13 + $0x118] sm:$0xff] %v1895_v35  ;;  %v1575_v29 = vpop.f32.mrf.mxu2 }
 0x3e7   : > { %v1576_v27 = vadd.f32 %v1575_v29, %v1446_v26 }
 0x3e9   : > { %v1679_v37 = vpop.f32.mrf.mxu3 }
 0x3ea   : > { %v1680_v38 = vadd.f32 %v1679_v37, %v1551_v36 }
 0x3ec   : > { %v1896_v39 = vadd.f32 %v2843_v18, %v1680_v38  ;;  %v1448_v33 = vpop.f32.mrf.mxu1 }
 0x3ee   : > { %1944 = vst [vmem:[%s2850_s13 + $0x120] sm:$0xff] %v1896_v39  ;;  %v1577_v34 = vpop.f32.mrf.mxu2 }
 0x3ef   : > { %v1578_v35 = vadd.f32 %v1577_v34, %v1448_v33 }
 0x3f1   : > { %v1681_v43 = vpop.f32.mrf.mxu3 }
 0x3f2   : > { %v1682_v44 = vadd.f32 %v1681_v43, %v1553_v42 }
 0x3f4   : > { %v1897_v45 = vadd.f32 %v2843_v18, %v1682_v44 }
 0x3f6   : > { %1945 = vst [vmem:[%s2850_s13 + $0x128] sm:$0xff] %v1897_v45 }
 0x3f9   : > { %v1684_v48 = vpop.f32.mrf.mxu3 }
 0x3fa   : > { %v1685_v49 = vadd.f32 %v1684_v48, %v1556_v46 }
 0x3fc   : > { %v1898_v51 = vadd.f32 %v2843_v18, %v1685_v49 }
 0x3fe   : > { %1946 = vst [vmem:[%s2850_s13 + $0x130] sm:$0xff] %v1898_v51 }
 0x401   : > { %v1686_v54 = vpop.f32.mrf.mxu3 }
 0x402   : > { %v1687_v56 = vadd.f32 %v1686_v54, %v1558_v52 }
 0x404   : > { %v1899_v57 = vadd.f32 %v2843_v18, %v1687_v56 }
 0x406   : > { %1947 = vst [vmem:[%s2850_s13 + $0x138] sm:$0xff] %v1899_v57 }
 0x409   : > { %v1689_v61 = vpop.f32.mrf.mxu3 }
 0x40a   : > { %v1690_v62 = vadd.f32 %v1689_v61, %v1561_v58 }
 0x40c   : > { %v1900_v60 = vadd.f32 %v2843_v18, %v1690_v62 }
 0x40e   : > { %1948 = vst [vmem:[%s2850_s13 + $0x140] sm:$0xff] %v1900_v60 }
 0x411   : > { %v1691_v1 = vpop.f32.mrf.mxu3 }
 0x412   : > { %v1692_v2 = vadd.f32 %v1691_v1, %v1563_v0 }
 0x414   : > { %v1901_v3 = vadd.f32 %v2843_v18, %v1692_v2 }
 0x416   : > { %1949 = vst [vmem:[%s2850_s13 + $0x148] sm:$0xff] %v1901_v3 }
 0x419   : > { %v1694_v6 = vpop.f32.mrf.mxu3 }
 0x41a   : > { %v1695_v8 = vadd.f32 %v1694_v6, %v1566_v5 }
 0x41c   : > { %v1902_v9 = vadd.f32 %v2843_v18, %v1695_v8 }
 0x41e   : > { %1950 = vst [vmem:[%s2850_s13 + $0x150] sm:$0xff] %v1902_v9 }
 0x421   : > { %v1696_v13 = vpop.f32.mrf.mxu3 }
 0x422   : > { %v1697_v14 = vadd.f32 %v1696_v13, %v1568_v12 }
 0x424   : > { %v1903_v15 = vadd.f32 %v2843_v18, %v1697_v14 }
 0x426   : > { %1951 = vst [vmem:[%s2850_s13 + $0x158] sm:$0xff] %v1903_v15 }
 0x429   : > { %v1699_v19 = vpop.f32.mrf.mxu3 }
 0x42a   : > { %v1700_v20 = vadd.f32 %v1699_v19, %v1571_v16 }
 0x42c   : > { %v1904_v22 = vadd.f32 %v2843_v18, %v1700_v20 }
 0x42e   : > { %1952 = vst [vmem:[%s2850_s13 + $0x160] sm:$0xff] %v1904_v22 }
 0x431   : > { %v1701_v24 = vpop.f32.mrf.mxu3 }
 0x432   : > { %v1702_v25 = vadd.f32 %v1701_v24, %v1573_v23 }
 0x434   : > { %v1905_v30 = vadd.f32 %v2843_v18, %v1702_v25 }
 0x436   : > { %1953 = vst [vmem:[%s2850_s13 + $0x168] sm:$0xff] %v1905_v30 }
 0x439   : > { %v1704_v28 = vpop.f32.mrf.mxu3 }
 0x43a   : > { %v1705_v31 = vadd.f32 %v1704_v28, %v1576_v27 }
 0x43c   : > { %v1906_v32 = vadd.f32 %v2843_v18, %v1705_v31 }
 0x43e   : > { %1954 = vst [vmem:[%s2850_s13 + $0x170] sm:$0xff] %v1906_v32 }
 0x441   : > { %v1706_v36 = vpop.f32.mrf.mxu3 }
 0x442   : > { %v1707_v37 = vadd.f32 %v1706_v36, %v1578_v35 }
 0x444   : > { %v1907_v38 = vadd.f32 %v2843_v18, %v1707_v37 }
 0x446   : > { %1955 = vst [vmem:[%s2850_s13 + $0x178] sm:$0xff] %v1907_v38 }
 0x447 PF: > { %s14_s17 = sadd.s32 1, %s2674_s17   ;;  %s3137_s15 = smov %s2670_s16 }
 0x448   : > { %p11_p5 = scmp.ge.s32.totalorder %s14_s17, 5   ;;  %s3138_s16 = smov %s3140_s18 }
 0x44a   :  { %13 = sbr.rel (!%p11_p5) target bundleno = 2 (0x2), region = 83 }

// kernel: multi_step_gnn_forward.3
= control target key start
LH: loop header
LB: loop body
LE: loop exit
PB: predicated region body
PF: predicated region fallthrough
CT: control target
= control target key end

     0   :  { %s3036_s15 = smov 0   ;;  %s3038_s16 = smov 0   ;;  %s3504_s0 = inlined_call_operand.vmem [shape: bf16[3,384,384], index: 0, kind: input, shape index: {}]   ;;  %s3505_s1 = inlined_call_operand.vmem [shape: bf16[3,384,128], index: 1, kind: input, shape index: {}]   ;;  %s3506_s2 = inlined_call_operand.vmem [shape: bf16[3,128,128], index: 2, kind: input, shape index: {}]   ;;  %s3507_s3 = inlined_call_operand.vmem [shape: f32[3,1,128], index: 3, kind: input, shape index: {}]   ;;  %s3508_s4 = inlined_call_operand.vmem [shape: bf16[3,384,128], index: 4, kind: output, shape index: {}]  }
   0x1   :  { %s3040_s17 = smov 0  }
   0x2 LB: > { %s33_s18 = sadd.s32 1, %s3005_s16  ;;  %p2287_p0 = scmp.ge.s32.totalorder %s3009_s17, 1  ;;  %s3009_s17 = sphi %s3040_s17, %s14_s17   ;;  %s3005_s16 = sphi %s3038_s16, %s3510_s16   ;;  %s3001_s15 = sphi %s3036_s15, %s3509_s15  }
   0x3   : > { %p35_p1 = scmp.ge.s32.totalorder %s33_s18, 3  ;;  %p233_p2 = scmp.lt.s32.totalorder %s3009_s17, 4 }
   0x5   : > { %s3512_s18 = smov (%p35_p1, %s33_s18), 0  ;;  %p234_p3 = pnand %p2287_p0, %p233_p2 }
   0x6   : > { %p291_p4 = scmp.lt.s32.totalorder (!%p234_p3), %s3001_s15, 2 }
   0x7   : > { %237 = sbr.rel (%p234_p3) target bundleno = 1100 (0x44c), region = 36 }
   0xc   : > { %s3514_s15 = smov (!%p291_p4, %s3001_s15), 2 }
   0xd   : > { %s2711_s19 = sshll.u32 %s3514_s15, 6  ;;  %s2960_s23 = smul.u32 192, %s3514_s15 }
   0xe   : > { %s319_s22 = scalar_lea.vmem %s3506_s2, %s2711_s19  ;;  %s2959_s27 = smul.u32 576, %s3514_s15 }
   0xf   : > { %v2743_v0 = vld [vmem:[%s319_s22 + $0x38] sm:$0xff]  ;;  %v2742_v1 = vld [vmem:[%s319_s22 + $0x30] sm:$0xff]  ;;  %v2741_v2 = vld [vmem:[%s319_s22 + $0x28] sm:$0xff]  ;;  %s3066_s26 = scalar_lea.vmem %s3505_s1, %s2960_s23  ;;  %s3124_s7 = scalar_lea.vmem %s3507_s3, %s3514_s15 }
  0x10   : > { %641 = vmatpush.bf16.msra.mxu0 %v2743_v0  ;;  %v2740_v3 = vld [vmem:[%s319_s22 + $0x20] sm:$0xff]  ;;  %v2739_v4 = vld [vmem:[%s319_s22 + $0x18] sm:$0xff]  ;;  %v2738_v5 = vld [vmem:[%s319_s22 + $0x10] sm:$0xff]  ;;  %s3102_s30 = scalar_lea.vmem %s3504_s0, %s2959_s27  ;;  %s3208_s10 = scalar_lea.vmem %s3508_s4, %s2960_s23 }
  0x11   : > { %v2737_v6 = vld [vmem:[%s319_s22 + $0x8] sm:$0xff]  ;;  %v2736_v7 = vld [vmem:[%s319_s22] sm:$0xff]  ;;  %v2714_v10 = vld [vmem:[%s3066_s26 + $0x10] sm:$0xff] }
  0x12   : > { %v2712_v8 = vld [vmem:[%s3066_s26] sm:$0xff]  ;;  %v2713_v9 = vld [vmem:[%s3066_s26 + $0x8] sm:$0xff]  ;;  %v2715_v11 = vld [vmem:[%s3066_s26 + $0x18] sm:$0xff] }
  0x13   : > { %v2716_v12 = vld [vmem:[%s3066_s26 + $0x20] sm:$0xff]  ;;  %v2717_v13 = vld [vmem:[%s3066_s26 + $0x28] sm:$0xff]  ;;  %v2718_v14 = vld [vmem:[%s3066_s26 + $0x30] sm:$0xff] }
  0x14   : > { %642 = vmatpush.bf16.msra.mxu0 %v2742_v1  ;;  %v2719_v15 = vld [vmem:[%s3066_s26 + $0x38] sm:$0xff]  ;;  %v2720_v16 = vld [vmem:[%s3066_s26 + $0x40] sm:$0xff]  ;;  %v2721_v20 = vld [vmem:[%s3066_s26 + $0x48] sm:$0xff] }
  0x15   : > { %v2722_v24 = vld [vmem:[%s3066_s26 + $0x50] sm:$0xff]  ;;  %v2723_v28 = vld [vmem:[%s3066_s26 + $0x58] sm:$0xff]  ;;  %v2724_v32 = vld [vmem:[%s3066_s26 + $0x60] sm:$0xff] }
  0x16   : > { %v2725_v35 = vld [vmem:[%s3066_s26 + $0x68] sm:$0xff]  ;;  %v2726_v38 = vld [vmem:[%s3066_s26 + $0x70] sm:$0xff]  ;;  %v2727_v41 = vld [vmem:[%s3066_s26 + $0x78] sm:$0xff] }
  0x17   : > { %v2728_v46 = vld [vmem:[%s3066_s26 + $0x80] sm:$0xff]  ;;  %v2729_v52 = vld [vmem:[%s3066_s26 + $0x88] sm:$0xff]  ;;  %v2730_v56 = vld [vmem:[%s3066_s26 + $0x90] sm:$0xff] }
  0x18   : > { %643 = vmatpush.bf16.msra.mxu0 %v2741_v2  ;;  %v2731_v60 = vld [vmem:[%s3066_s26 + $0x98] sm:$0xff]  ;;  %v2732_v0 = vld [vmem:[%s3066_s26 + $0xa0] sm:$0xff] }
  0x1c   : > { %644 = vmatpush.bf16.msra.mxu0 %v2740_v3  ;;  %v2733_v3 = vld [vmem:[%s3066_s26 + $0xa8] sm:$0xff] }
  0x20   : > { %645 = vmatpush.bf16.msra.mxu0 %v2739_v4 }
  0x24   : > { %646 = vmatpush.bf16.msra.mxu0 %v2738_v5 }
  0x28   : > { %647 = vmatpush.bf16.msra.mxu0 %v2737_v6  ;;  %v2734_v6 = vld [vmem:[%s3066_s26 + $0xb0] sm:$0xff] }
  0x2c   : > { %648 = vmatpush.bf16.msra.mxu0 %v2736_v7 }
  0x2f   : > { %649 = vmatmul.bf16.vlgmr.msra.gmra.mxu0 %v2712_v8 }
  0x3f   : > { %654 = vmatmul.bf16.gmra.mxu0 %v2713_v9  ;;  %v2735_v9 = vld [vmem:[%s3066_s26 + $0xb8] sm:$0xff] }
  0x4f   : > { %659 = vmatmul.bf16.gmra.mxu0 %v2714_v10 }
  0x5f   : > { %664 = vmatmul.bf16.gmra.mxu0 %v2715_v11 }
  0x6f   : > { %669 = vmatmul.bf16.gmra.mxu0 %v2716_v12 }
  0x7f   : > { %674 = vmatmul.bf16.gmra.mxu0 %v2717_v13 }
  0x8f   : > { %679 = vmatmul.bf16.gmra.mxu0 %v2718_v14 }
  0x9f   : > { %684 = vmatmul.bf16.gmra.mxu0 %v2719_v15 }
  0xac   : > { %v650_v17 = vpop.f32.mrf.mxu0 }
  0xaf   : > { %689 = vmatmul.bf16.gmra.mxu0 %v2720_v16 }
  0xb4   : > { %v652_v18 = vpop.f32.mrf.mxu0 }
  0xb5   : > { %v914_v19 = vpack.c.bf16 %v652_v18, %v650_v17 }
  0xbc   : > { %v655_v21 = vpop.f32.mrf.mxu0 }
  0xbf   : > { %694 = vmatmul.bf16.gmra.mxu0 %v2721_v20 }
  0xc4   : > { %v657_v22 = vpop.f32.mrf.mxu0 }
  0xc5   : > { %v915_v23 = vpack.c.bf16 %v657_v22, %v655_v21 }
  0xcc   : > { %v660_v25 = vpop.f32.mrf.mxu0 }
  0xcf   : > { %699 = vmatmul.bf16.gmra.mxu0 %v2722_v24 }
  0xd4   : > { %v662_v26 = vpop.f32.mrf.mxu0 }
  0xd5   : > { %v916_v27 = vpack.c.bf16 %v662_v26, %v660_v25 }
  0xdc   : > { %v665_v29 = vpop.f32.mrf.mxu0 }
  0xdf   : > { %704 = vmatmul.bf16.gmra.mxu0 %v2723_v28 }
  0xe4   : > { %v667_v30 = vpop.f32.mrf.mxu0 }
  0xe5   : > { %v917_v31 = vpack.c.bf16 %v667_v30, %v665_v29 }
  0xec   : > { %v670_v33 = vpop.f32.mrf.mxu0 }
  0xef   : > { %709 = vmatmul.bf16.gmra.mxu0 %v2724_v32 }
  0xf4   : > { %v672_v34 = vpop.f32.mrf.mxu0 }
  0xf5   : > { %v918_v49 = vpack.c.bf16 %v672_v34, %v670_v33  ;;  %v2744_v34 = vld [vmem:[%s3102_s30 + $0x4] sm:$0xf] }
  0xfc   : > { %v675_v36 = vpop.f32.mrf.mxu0 }
  0xff   : > { %714 = vmatmul.bf16.gmra.mxu0 %v2725_v35  ;;  %v2425_v35 = vld [vmem:[%s3102_s30 + $0xc] sm:$0xf0] }
 0x104   : > { %v677_v37 = vpop.f32.mrf.mxu0 }
 0x105   : > { %v919_v48 = vpack.c.bf16 %v677_v37, %v675_v36  ;;  %v2428_v36 = vor.u32 %v2744_v34, %v2425_v35  ;;  %v2509_v34 = vld [vmem:[%s3102_s30 + $0xb4] sm:$0xf0] }
 0x10c   : > { %v680_v39 = vpop.f32.mrf.mxu0 }
 0x10f   : > { %719 = vmatmul.bf16.gmra.mxu0 %v2726_v38  ;;  %v2423_v38 = vld [vmem:[%s3102_s30] sm:$0xf] }
 0x114   : > { %v682_v40 = vpop.f32.mrf.mxu0 }
 0x115   : > { %v920_v45 = vpack.c.bf16 %v682_v40, %v680_v39  ;;  %v2745_v39 = vld [vmem:[%s3102_s30 + $0x8] sm:$0xf0] }
 0x116   : > { %v2424_v40 = vor.u32 %v2745_v39, %v2423_v38  ;;  %v2491_v39 = vld [vmem:[%s3102_s30 + $0x80] sm:$0xf] }
 0x11c   : > { %v685_v42 = vpop.f32.mrf.mxu0 }
 0x11f   : > { %724 = vmatmul.bf16.gmra.mxu0 %v2727_v41 }
 0x124   : > { %v687_v43 = vpop.f32.mrf.mxu0 }
 0x125   : > { %v921_v44 = vpack.c.bf16 %v687_v43, %v685_v42  ;;  %v2747_v43 = vld [vmem:[%s3102_s30 + $0x1c] sm:$0xf] }
 0x127   : > { %1322 = vmatpush.bf16.msra.mxu1 %v921_v44  ;;  %v2437_v44 = vld [vmem:[%s3102_s30 + $0x24] sm:$0xf0] }
 0x12b   : > { %1323 = vmatpush.bf16.msra.mxu1 %v920_v45  ;;  %v2440_v45 = vor.u32 %v2747_v43, %v2437_v44  ;;  %v2521_v43 = vld [vmem:[%s3102_s30 + $0xcc] sm:$0xf0] }
 0x12c   : > { %v690_v47 = vpop.f32.mrf.mxu0 }
 0x12f   : > { %729 = vmatmul.bf16.gmra.mxu0 %v2728_v46  ;;  %1324 = vmatpush.bf16.msra.mxu1 %v919_v48  ;;  %v2748_v48 = vld [vmem:[%s3102_s30 + $0x20] sm:$0xf0] }
 0x133   : > { %1325 = vmatpush.bf16.msra.mxu1 %v918_v49 }
 0x134   : > { %v692_v50 = vpop.f32.mrf.mxu0 }
 0x135   : > { %v922_v51 = vpack.c.bf16 %v692_v50, %v690_v47  ;;  %v2435_v47 = vld [vmem:[%s3102_s30 + $0x18] sm:$0xf] }
 0x136   : > { %v2436_v50 = vor.u32 %v2748_v48, %v2435_v47  ;;  %v2503_v48 = vld [vmem:[%s3102_s30 + $0x98] sm:$0xf] }
 0x137   : > { %1326 = vmatpush.bf16.msra.mxu1 %v917_v31 }
 0x13b   : > { %1327 = vmatpush.bf16.msra.mxu1 %v916_v27 }
 0x13c   : > { %v695_v53 = vpop.f32.mrf.mxu0 }
 0x13f   : > { %734 = vmatmul.bf16.gmra.mxu0 %v2729_v52  ;;  %1328 = vmatpush.bf16.msra.mxu1 %v915_v23  ;;  %v2750_v52 = vld [vmem:[%s3102_s30 + $0x34] sm:$0xf] }
 0x143   : > { %1329 = vmatpush.bf16.msra.mxu1 %v914_v19 }
 0x144   : > { %v697_v54 = vpop.f32.mrf.mxu0 }
 0x145   : > { %v923_v55 = vpack.c.bf16 %v697_v54, %v695_v53  ;;  %v2449_v53 = vld [vmem:[%s3102_s30 + $0x3c] sm:$0xf0] }
 0x146   : > { %1330 = vmatmul.bf16.vlgmr.msra.gmra.mxu1 %v2424_v40  ;;  %v2452_v54 = vor.u32 %v2750_v52, %v2449_v53  ;;  %v2761_v40 = vld [vmem:[%s3102_s30 + $0x88] sm:$0xf0] }
 0x14c   : > { %v700_v57 = vpop.f32.mrf.mxu0 }
 0x14f   : > { %739 = vmatmul.bf16.gmra.mxu0 %v2730_v56  ;;  %v2751_v56 = vld [vmem:[%s3102_s30 + $0x38] sm:$0xf0] }
 0x154   : > { %v702_v58 = vpop.f32.mrf.mxu0 }
 0x155   : > { %v924_v59 = vpack.c.bf16 %v702_v58, %v700_v57  ;;  %v2431_v58 = vld [vmem:[%s3102_s30 + $0x8] sm:$0xf] }
 0x156   : > { %1335 = vmatmul.bf16.gmra.mxu1 %v2436_v50 }
 0x15c   : > { %v705_v61 = vpop.f32.mrf.mxu0 }
 0x15f   : > { %744 = vmatmul.bf16.gmra.mxu0 %v2731_v60 }
 0x164   : > { %v707_v62 = vpop.f32.mrf.mxu0 }
 0x165   : > { %v925_v63 = vpack.c.bf16 %v707_v62, %v705_v61  ;;  %v2753_v61 = vld [vmem:[%s3102_s30 + $0x4c] sm:$0xf]  ;;  %v2461_v62 = vld [vmem:[%s3102_s30 + $0x54] sm:$0xf0] }
 0x16c   : > { %v710_v1 = vpop.f32.mrf.mxu0 }
 0x16f   : > { %749 = vmatmul.bf16.gmra.mxu0 %v2732_v0  ;;  %v2459_v0 = vld [vmem:[%s3102_s30 + $0x48] sm:$0xf] }
 0x174   : > { %v712_v2 = vpop.f32.mrf.mxu0 }
 0x175   : > { %v926_v16 = vpack.c.bf16 %v712_v2, %v710_v1  ;;  %v2754_v1 = vld [vmem:[%s3102_s30 + $0x50] sm:$0xf0] }
 0x176   : > { %v2460_v2 = vor.u32 %v2754_v1, %v2459_v0 }
 0x17c   : > { %v715_v4 = vpop.f32.mrf.mxu0 }
 0x17f   : > { %754 = vmatmul.bf16.gmra.mxu0 %v2733_v3  ;;  %v2443_v3 = vld [vmem:[%s3102_s30 + $0x20] sm:$0xf] }
 0x184   : > { %v717_v5 = vpop.f32.mrf.mxu0 }
 0x185   : > { %v927_v15 = vpack.c.bf16 %v717_v5, %v715_v4  ;;  %v2749_v4 = vld [vmem:[%s3102_s30 + $0x28] sm:$0xf0] }
 0x186   : > { %v2444_v5 = vor.u32 %v2749_v4, %v2443_v3  ;;  %v2774_v4 = vld [vmem:[%s3102_s30 + $0xf4] sm:$0xf] }
 0x18c   : > { %v720_v7 = vpop.f32.mrf.mxu0 }
 0x18f   : > { %759 = vmatmul.bf16.gmra.mxu0 %v2734_v6  ;;  %v2756_v6 = vld [vmem:[%s3102_s30 + $0x64] sm:$0xf] }
 0x194   : > { %v722_v8 = vpop.f32.mrf.mxu0 }
 0x195   : > { %v928_v13 = vpack.c.bf16 %v722_v8, %v720_v7  ;;  %v2473_v7 = vld [vmem:[%s3102_s30 + $0x6c] sm:$0xf0] }
 0x196   : > { %v2476_v8 = vor.u32 %v2756_v6, %v2473_v7  ;;  %v2527_v7 = vld [vmem:[%s3102_s30 + $0xc8] sm:$0xf] }
 0x19c   : > { %v725_v10 = vpop.f32.mrf.mxu0 }
 0x19f   : > { %764 = vmatmul.bf16.gmra.mxu0 %v2735_v9  ;;  %v2471_v9 = vld [vmem:[%s3102_s30 + $0x60] sm:$0xf] }
 0x1a4   : > { %v727_v11 = vpop.f32.mrf.mxu0 }
 0x1a5   : > { %v929_v12 = vpack.c.bf16 %v727_v11, %v725_v10  ;;  %v2757_v10 = vld [vmem:[%s3102_s30 + $0x68] sm:$0xf0] }
 0x1a6   : > { %v2472_v11 = vor.u32 %v2757_v10, %v2471_v9 }
 0x1a7   : > { %1451 = vmatpush.bf16.msra.mxu2 %v929_v12  ;;  %v2455_v12 = vld [vmem:[%s3102_s30 + $0x38] sm:$0xf] }
 0x1ab   : > { %1452 = vmatpush.bf16.msra.mxu2 %v928_v13  ;;  %v2752_v13 = vld [vmem:[%s3102_s30 + $0x40] sm:$0xf0] }
 0x1ac   : > { %v3092_v14 = vpop.f32.mrf.mxu0 }
 0x1af   : > { %1453 = vmatpush.bf16.msra.mxu2 %v927_v15  ;;  %v2759_v15 = vld [vmem:[%s3102_s30 + $0x7c] sm:$0xf] }
 0x1b3   : > { %1454 = vmatpush.bf16.msra.mxu2 %v926_v16  ;;  %v2485_v16 = vld [vmem:[%s3102_s30 + $0x84] sm:$0xf0] }
 0x1b4   : > { %v3094_v17 = vpop.f32.mrf.mxu0 }
 0x1b5   : > { %v930_v18 = vpack.c.bf16 %v3094_v17, %v3092_v14  ;;  %v2456_v14 = vor.u32 %v2752_v13, %v2455_v12  ;;  %v2488_v17 = vor.u32 %v2759_v15, %v2485_v16  ;;  %v2775_v12 = vld [vmem:[%s3102_s30 + $0xf8] sm:$0xf0] }
 0x1b7   : > { %1455 = vmatpush.bf16.msra.mxu2 %v925_v63  ;;  %v2464_v63 = vor.u32 %v2753_v61, %v2461_v62  ;;  %v2531_v62 = vld [vmem:[%s3102_s30 + $0xd8] sm:$0xf] }
 0x1bb   : > { %1456 = vmatpush.bf16.msra.mxu2 %v924_v59  ;;  %v2746_v59 = vld [vmem:[%s3102_s30 + $0x10] sm:$0xf0] }
 0x1bc   : > { %v735_v19 = vpop.f32.mrf.mxu0  ;;  %v2432_v60 = vor.u32 %v2746_v59, %v2431_v58  ;;  %v2515_v58 = vld [vmem:[%s3102_s30 + $0xb0] sm:$0xf]  ;;  %v2767_v59 = vld [vmem:[%s3102_s30 + $0xb8] sm:$0xf0] }
 0x1bd   : > { %v2516_v1 = vor.u32 %v2767_v59, %v2515_v58 }
 0x1bf   : > { %1457 = vmatpush.bf16.msra.mxu2 %v923_v55  ;;  %v2447_v55 = vld [vmem:[%s3102_s30 + $0x30] sm:$0xf] }
 0x1c0   : > { %v2448_v57 = vor.u32 %v2751_v56, %v2447_v55  ;;  %v2771_v55 = vld [vmem:[%s3102_s30 + $0xdc] sm:$0xf]  ;;  %v2533_v56 = vld [vmem:[%s3102_s30 + $0xe4] sm:$0xf0] }
 0x1c2   : > { %1340 = vmatmul.bf16.gmra.mxu1 %v2448_v57  ;;  %v2536_v57 = vor.u32 %v2771_v55, %v2533_v56  ;;  %v2781_v55 = vld [vmem:[%s3102_s30 + $0x128] sm:$0xf0] }
 0x1c3   : > { %1458 = vmatpush.bf16.msra.mxu2 %v922_v51  ;;  %v1331_v50 = vpop.f32.mrf.mxu1 }
 0x1c4   : > { %v737_v20 = vpop.f32.mrf.mxu0 }
 0x1c5   : > { %v931_v21 = vpack.c.bf16 %v737_v20, %v735_v19  ;;  %v2760_v19 = vld [vmem:[%s3102_s30 + $0x80] sm:$0xf0] }
 0x1c6   : > { %1459 = vmatmul.bf16.vlgmr.msra.gmra.mxu2 %v2428_v36  ;;  %v2507_v36 = vld [vmem:[%s3102_s30 + $0xa8] sm:$0xf] }
 0x1cb   : > { %v1333_v53 = vpop.f32.mrf.mxu1 }
 0x1cc   : > { %v740_v22 = vpop.f32.mrf.mxu0 }
 0x1d2   : > { %1345 = vmatmul.bf16.gmra.mxu1 %v2460_v2 }
 0x1d4   : > { %v742_v23 = vpop.f32.mrf.mxu0 }
 0x1d5   : > { %v932_v24 = vpack.c.bf16 %v742_v23, %v740_v22  ;;  %v2755_v22 = vld [vmem:[%s3102_s30 + $0x58] sm:$0xf0] }
 0x1d6   : > { %1464 = vmatmul.bf16.gmra.mxu2 %v2440_v45  ;;  %v2519_v45 = vld [vmem:[%s3102_s30 + $0xc0] sm:$0xf] }
 0x1dc   : > { %v745_v25 = vpop.f32.mrf.mxu0 }
 0x1e2   : > { %1350 = vmatmul.bf16.gmra.mxu1 %v2472_v11  ;;  %v2543_v11 = vld [vmem:[%s3102_s30 + $0xf0] sm:$0xf] }
 0x1e3   : > { %v2544_v13 = vor.u32 %v2775_v12, %v2543_v11  ;;  %v2581_v11 = vld [vmem:[%s3102_s30 + $0x144] sm:$0xf0] }
 0x1e4   : > { %v747_v26 = vpop.f32.mrf.mxu0 }
 0x1e5   : > { %v933_v27 = vpack.c.bf16 %v747_v26, %v745_v25  ;;  %v2497_v25 = vld [vmem:[%s3102_s30 + $0x9c] sm:$0xf0] }
 0x1e6   : > { %1469 = vmatmul.bf16.gmra.mxu2 %v2452_v54 }
 0x1ec   : > { %v750_v28 = vpop.f32.mrf.mxu0 }
 0x1f4   : > { %v752_v29 = vpop.f32.mrf.mxu0 }
 0x1f5   : > { %v934_v51 = vpack.c.bf16 %v752_v29, %v750_v28  ;;  %v2763_v28 = vld [vmem:[%s3102_s30 + $0x98] sm:$0xf0] }
 0x1f6   : > { %1474 = vmatmul.bf16.gmra.mxu2 %v2464_v63  ;;  %v2772_v63 = vld [vmem:[%s3102_s30 + $0xe0] sm:$0xf0] }
 0x1f7   : > { %v2532_v0 = vor.u32 %v2772_v63, %v2531_v62 }
 0x1fc   : > { %v755_v30 = vpop.f32.mrf.mxu0 }
 0x204   : > { %v757_v31 = vpop.f32.mrf.mxu0 }
 0x205   : > { %v935_v49 = vpack.c.bf16 %v757_v31, %v755_v30  ;;  %v2479_v30 = vld [vmem:[%s3102_s30 + $0x68] sm:$0xf]  ;;  %v2758_v31 = vld [vmem:[%s3102_s30 + $0x70] sm:$0xf0] }
 0x206   : > { %1479 = vmatmul.bf16.gmra.mxu2 %v2476_v8  ;;  %v2770_v8 = vld [vmem:[%s3102_s30 + $0xd0] sm:$0xf0] }
 0x20c   : > { %v760_v32 = vpop.f32.mrf.mxu0 }
 0x214   : > { %v762_v33 = vpop.f32.mrf.mxu0 }
 0x215   : > { %v936_v46 = vpack.c.bf16 %v762_v33, %v760_v32  ;;  %v2480_v32 = vor.u32 %v2758_v31, %v2479_v30  ;;  %v2765_v33 = vld [vmem:[%s3102_s30 + $0xac] sm:$0xf] }
 0x216   : > { %1484 = vmatmul.bf16.gmra.mxu2 %v2488_v17  ;;  %v2512_v35 = vor.u32 %v2765_v33, %v2509_v34 }
 0x21c   : > { %v765_v37 = vpop.f32.mrf.mxu0 }
 0x224   : > { %v767_v41 = vpop.f32.mrf.mxu0 }
 0x225   : > { %v937_v42 = vpack.c.bf16 %v767_v41, %v765_v37  ;;  %v2766_v37 = vld [vmem:[%s3102_s30 + $0xb0] sm:$0xf0]  ;;  %v2492_v41 = vor.u32 %v2761_v40, %v2491_v39 }
 0x226   : > { %v2508_v38 = vor.u32 %v2766_v37, %v2507_v36 }
 0x227   : > { %1580 = vmatpush.bf16.msra.mxu3 %v937_v42  ;;  %v2768_v42 = vld [vmem:[%s3102_s30 + $0xc4] sm:$0xf] }
 0x228   : > { %v2524_v44 = vor.u32 %v2768_v42, %v2521_v43 }
 0x22b   : > { %1581 = vmatpush.bf16.msra.mxu3 %v936_v46  ;;  %v2769_v46 = vld [vmem:[%s3102_s30 + $0xc8] sm:$0xf0] }
 0x22c   : > { %v2520_v47 = vor.u32 %v2769_v46, %v2519_v45  ;;  %v2780_v46 = vld [vmem:[%s3102_s30 + $0x124] sm:$0xf] }
 0x22f   : > { %1582 = vmatpush.bf16.msra.mxu3 %v935_v49  ;;  %v2764_v49 = vld [vmem:[%s3102_s30 + $0xa0] sm:$0xf0] }
 0x230   : > { %v2504_v52 = vor.u32 %v2764_v49, %v2503_v48 }
 0x233   : > { %1583 = vmatpush.bf16.msra.mxu3 %v934_v51 }
 0x237   : > { %1584 = vmatpush.bf16.msra.mxu3 %v933_v27  ;;  %v2495_v27 = vld [vmem:[%s3102_s30 + $0x90] sm:$0xf] }
 0x238   : > { %v2496_v29 = vor.u32 %v2763_v28, %v2495_v27  ;;  %v2555_v28 = vld [vmem:[%s3102_s30 + $0x108] sm:$0xf] }
 0x23b   : > { %1585 = vmatpush.bf16.msra.mxu3 %v932_v24  ;;  %v2762_v24 = vld [vmem:[%s3102_s30 + $0x94] sm:$0xf] }
 0x23c   : > { %v2500_v26 = vor.u32 %v2762_v24, %v2497_v25  ;;  %v2539_v24 = vld [vmem:[%s3102_s30 + $0xe0] sm:$0xf]  ;;  %v2773_v25 = vld [vmem:[%s3102_s30 + $0xe8] sm:$0xf0] }
 0x23e   : > { %1489 = vmatmul.bf16.gmra.mxu2 %v2500_v26 }
 0x23f   : > { %1586 = vmatpush.bf16.msra.mxu3 %v931_v21  ;;  %v2467_v21 = vld [vmem:[%s3102_s30 + $0x50] sm:$0xf] }
 0x240   : > { %v2468_v23 = vor.u32 %v2755_v22, %v2467_v21 }
 0x243   : > { %1587 = vmatpush.bf16.msra.mxu3 %v930_v18  ;;  %v2483_v18 = vld [vmem:[%s3102_s30 + $0x78] sm:$0xf] }
 0x244   : > { %v2484_v20 = vor.u32 %v2760_v19, %v2483_v18  ;;  %v2777_v19 = vld [vmem:[%s3102_s30 + $0x10c] sm:$0xf] }
 0x246   : > { %1588 = vmatmul.bf16.vlgmr.msra.gmra.mxu3 %v2432_v60  ;;  %1355 = vmatmul.bf16.gmra.mxu1 %v2484_v20  ;;  %v1336_v60 = vpop.f32.mrf.mxu1  ;;  %v2557_v20 = vld [vmem:[%s3102_s30 + $0x114] sm:$0xf0] }
 0x247   : > { %v2560_v21 = vor.u32 %v2777_v19, %v2557_v20  ;;  %v2579_v20 = vld [vmem:[%s3102_s30 + $0x138] sm:$0xf] }
 0x249   : > { %v1460_v51 = vpop.f32.mrf.mxu2 }
 0x24a   : > { %v1461_v17 = vadd.f32 %v1460_v51, %v1331_v50  ;;  %v2551_v50 = vld [vmem:[%s3102_s30 + $0xf8] sm:$0xf]  ;;  %v2776_v51 = vld [vmem:[%s3102_s30 + $0x100] sm:$0xf0] }
 0x24e   : > { %1494 = vmatmul.bf16.gmra.mxu2 %v2512_v35  ;;  %v3166_v2 = vpop.f32.mrf.mxu1  ;;  %v2540_v35 = vor.u32 %v2773_v25, %v2539_v24 }
 0x251   : > { %v1462_v54 = vpop.f32.mrf.mxu2 }
 0x252   : > { %v1463_v30 = vadd.f32 %v1462_v54, %v1333_v53  ;;  %v2567_v54 = vld [vmem:[%s3102_s30 + $0x120] sm:$0xf] }
 0x253   : > { %v2568_v58 = vor.u32 %v2781_v55, %v2567_v54 }
 0x256   : > { %1593 = vmatmul.bf16.gmra.mxu3 %v2444_v5  ;;  %1360 = vmatmul.bf16.gmra.mxu1 %v2496_v29  ;;  %v2545_v5 = vld [vmem:[%s3102_s30 + $0xfc] sm:$0xf0]  ;;  %v3174_v9 = vpop.f32.mrf.mxu1  ;;  %v2778_v29 = vld [vmem:[%s3102_s30 + $0x110] sm:$0xf0] }
 0x257   : > { %v2548_v6 = vor.u32 %v2774_v4, %v2545_v5 }
 0x259   : > { %v1465_v61 = vpop.f32.mrf.mxu2 }
 0x25a   : > { %v1466_v42 = vadd.f32 %v1465_v61, %v1336_v60  ;;  %v2552_v61 = vor.u32 %v2776_v51, %v2551_v50 }
 0x25e   : > { %1499 = vmatmul.bf16.gmra.mxu2 %v2524_v44  ;;  %v3180_v15 = vpop.f32.mrf.mxu1 }
 0x261   : > { %v3168_v3 = vpop.f32.mrf.mxu2 }
 0x262   : > { %v1468_v56 = vadd.f32 %v3168_v3, %v3166_v2 }
 0x266   : > { %1598 = vmatmul.bf16.gmra.mxu3 %v2456_v14  ;;  %1365 = vmatmul.bf16.gmra.mxu1 %v2508_v38  ;;  %v2528_v14 = vor.u32 %v2770_v8, %v2527_v7  ;;  %v3191_v26 = vpop.f32.mrf.mxu1  ;;  %v2783_v8 = vld [vmem:[%s3102_s30 + $0x13c] sm:$0xf] }
 0x267   : > { %v2584_v12 = vor.u32 %v2783_v8, %v2581_v11  ;;  %v2603_v11 = vld [vmem:[%s3102_s30 + $0x168] sm:$0xf] }
 0x269   : > { %v3176_v10 = vpop.f32.mrf.mxu2 }
 0x26a   : > { %v1471_v4 = vadd.f32 %v3176_v10, %v3174_v9 }
 0x26e   : > { %1504 = vmatmul.bf16.gmra.mxu2 %v2536_v57  ;;  %v3199_v39 = vpop.f32.mrf.mxu1 }
 0x271   : > { %v3182_v16 = vpop.f32.mrf.mxu2 }
 0x272   : > { %v1473_v9 = vadd.f32 %v3182_v16, %v3180_v15 }
 0x276   : > { %1603 = vmatmul.bf16.gmra.mxu3 %v2468_v23  ;;  %1370 = vmatmul.bf16.gmra.mxu1 %v2520_v47  ;;  %v3187_v23 = vld [vmem:[%s3124_s7] ss:$0 sm:$0xff]  ;;  %v2569_v47 = vld [vmem:[%s3102_s30 + $0x12c] sm:$0xf0] }
 0x277   : > { %v2572_v48 = vor.u32 %v2780_v46, %v2569_v47  ;;  %v2591_v47 = vld [vmem:[%s3102_s30 + $0x150] sm:$0xf] }
 0x279   : > { %v3193_v27 = vpop.f32.mrf.mxu2 }
 0x27e   : > { %1509 = vmatmul.bf16.gmra.mxu2 %v2548_v6 }
 0x281   : > { %v3201_v40 = vpop.f32.mrf.mxu2 }
 0x286   : > { %1608 = vmatmul.bf16.gmra.mxu3 %v2480_v32  ;;  %1375 = vmatmul.bf16.gmra.mxu1 %v2532_v0  ;;  %v2556_v32 = vor.u32 %v2778_v29, %v2555_v28 }
 0x289   : > { %v3217_v53 = vpop.f32.mrf.mxu2 }
 0x28e   : > { %1514 = vmatmul.bf16.gmra.mxu2 %v2560_v21  ;;  %v2784_v21 = vld [vmem:[%s3102_s30 + $0x140] sm:$0xf0] }
 0x291   : > { %v3227_v2 = vpop.f32.mrf.mxu2 }
 0x296   : > { %1613 = vmatmul.bf16.gmra.mxu3 %v2492_v41  ;;  %1380 = vmatmul.bf16.gmra.mxu1 %v2544_v13 }
 0x299   : > { %v3238_v19 = vpop.f32.mrf.mxu2 }
 0x29e   : > { %1519 = vmatmul.bf16.gmra.mxu2 %v2572_v48  ;;  %v2787_v48 = vld [vmem:[%s3102_s30 + $0x158] sm:$0xf0] }
 0x2a1   : > { %v3248_v16 = vpop.f32.mrf.mxu2 }
 0x2a6   : > { %1618 = vmatmul.bf16.gmra.mxu3 %v2504_v52  ;;  %1385 = vmatmul.bf16.gmra.mxu1 %v2556_v32  ;;  %v3215_v52 = vpop.f32.mrf.mxu1 }
 0x2ae   : > { %1524 = vmatmul.bf16.gmra.mxu2 %v2584_v12  ;;  %v2790_v12 = vld [vmem:[%s3102_s30 + $0x170] sm:$0xf0] }
 0x2b6   : > { %1623 = vmatmul.bf16.gmra.mxu3 %v2516_v1  ;;  %1390 = vmatmul.bf16.gmra.mxu1 %v2568_v58  ;;  %v3225_v1 = vpop.f32.mrf.mxu1 }
 0x2c1   : > { %v3259_v46 = vpop.f32.mrf.mxu2 }
 0x2c6   : > { %1628 = vmatmul.bf16.gmra.mxu3 %v2528_v14  ;;  %v2563_v14 = vld [vmem:[%s3102_s30 + $0x110] sm:$0xf] }
 0x2c9   : > { %v1589_v18 = vpop.f32.mrf.mxu3 }
 0x2ca   : > { %v1590_v22 = vadd.f32 %v1589_v18, %v1461_v17  ;;  %v2779_v17 = vld [vmem:[%s3102_s30 + $0x118] sm:$0xf0]  ;;  %v3236_v18 = vpop.f32.mrf.mxu1 }
 0x2cb   : > { %v2564_v28 = vor.u32 %v2779_v17, %v2563_v14 }
 0x2cc   : > { %v1860_v31 = vadd.f32 %v3187_v23, %v1590_v22  ;;  %v2580_v22 = vor.u32 %v2784_v21, %v2579_v20 }
 0x2ce   : > { %v1956_v36 = vmul.f32 0.01, %v1860_v31  ;;  %vm1908_vm0 = vcmp.ge.f32.partialorder %v1860_v31, 0.0  ;;  %1395 = vmatmul.bf16.gmra.mxu1 %v2580_v22 }
 0x2d0   : > { %v2004_v41 = vsel %vm1908_vm0, %v1860_v31, %v1956_v36 }
 0x2d1   : > { %v1591_v33 = vpop.f32.mrf.mxu3 }
 0x2d2   : > { %v1592_v34 = vadd.f32 %v1591_v33, %v1463_v30  ;;  %v3246_v15 = vpop.f32.mrf.mxu1  ;;  %v1476_v33 = vadd.f32 %v3193_v27, %v3191_v26  ;;  %v1478_v26 = vadd.f32 %v3201_v40, %v3199_v39  ;;  %v3269_v40 = vpop.f32.mrf.mxu2 }
 0x2d4   : > { %v1861_v37 = vadd.f32 %v3187_v23, %v1592_v34 }
 0x2d6   : > { %vm1909_vm1 = vcmp.ge.f32.partialorder %v1861_v37, 0.0  ;;  %v1957_v38 = vmul.f32 0.01, %v1861_v37  ;;  %1633 = vmatmul.bf16.gmra.mxu3 %v2540_v35 }
 0x2d8   : > { %v2005_v43 = vsel %vm1909_vm1, %v1861_v37, %v1957_v38  ;;  %v2786_v37 = vld [vmem:[%s3102_s30 + $0x154] sm:$0xf]  ;;  %v2593_v38 = vld [vmem:[%s3102_s30 + $0x15c] sm:$0xf0] }
 0x2d9   : > { %v2819_v44 = vpack.c.bf16 %v2005_v43, %v2004_v41  ;;  %v1594_v45 = vpop.f32.mrf.mxu3  ;;  %v2596_v41 = vor.u32 %v2786_v37, %v2593_v38  ;;  %v2575_v43 = vld [vmem:[%s3102_s30 + $0x128] sm:$0xf]  ;;  %v2615_v38 = vld [vmem:[%s3102_s30 + $0x180] sm:$0xf] }
 0x2da   : > { %v1595_v49 = vadd.f32 %v1594_v45, %v1466_v42  ;;  %v3257_v45 = vpop.f32.mrf.mxu1  ;;  %v3280_v8 = vpop.f32.mrf.mxu2 }
 0x2db   : > { %2820 = vst [vmem:[%s3208_s10] sm:$0xff] %v2819_v44   ;;  %1529 = vmatmul.bf16.gmra.mxu2 %v2596_v41  ;;  %v2782_v44 = vld [vmem:[%s3102_s30 + $0x130] sm:$0xf0]  ;;  %v2793_v41 = vld [vmem:[%s3102_s30 + $0x188] sm:$0xf0] }
 0x2dc   : > { %v1862_v57 = vadd.f32 %v3187_v23, %v1595_v49  ;;  %v2592_v49 = vor.u32 %v2787_v48, %v2591_v47  ;;  %v2576_v54 = vor.u32 %v2782_v44, %v2575_v43 }
 0x2de   : > { %v1958_v62 = vmul.f32 0.01, %v1862_v57  ;;  %vm1910_vm2 = vcmp.ge.f32.partialorder %v1862_v57, 0.0  ;;  %1400 = vmatmul.bf16.gmra.mxu1 %v2592_v49 }
 0x2e0   : > { %v2006_v3 = vsel %vm1910_vm2, %v1862_v57, %v1958_v62 }
 0x2e1   : > { %v1596_v59 = vpop.f32.mrf.mxu3 }
 0x2e2   : > { %v1597_v60 = vadd.f32 %v1596_v59, %v1468_v56  ;;  %v3267_v39 = vpop.f32.mrf.mxu1  ;;  %v1481_v59 = vadd.f32 %v3217_v53, %v3215_v52  ;;  %v1483_v52 = vadd.f32 %v3227_v2, %v3225_v1  ;;  %v3290_v2 = vpop.f32.mrf.mxu2 }
 0x2e4   : > { %v1863_v63 = vadd.f32 %v3187_v23, %v1597_v60 }
 0x2e6   : > { %vm1911_vm3 = vcmp.ge.f32.partialorder %v1863_v63, 0.0  ;;  %v1959_v0 = vmul.f32 0.01, %v1863_v63  ;;  %1638 = vmatmul.bf16.gmra.mxu3 %v2552_v61 }
 0x2e8   : > { %v2007_v5 = vsel %vm1911_vm3, %v1863_v63, %v1959_v0  ;;  %v2789_v63 = vld [vmem:[%s3102_s30 + $0x16c] sm:$0xf]  ;;  %v2605_v0 = vld [vmem:[%s3102_s30 + $0x174] sm:$0xf0] }
 0x2e9   : > { %v2824_v6 = vpack.c.bf16 %v2007_v5, %v2006_v3  ;;  %v1599_v7 = vpop.f32.mrf.mxu3  ;;  %v2608_v3 = vor.u32 %v2789_v63, %v2605_v0  ;;  %v2587_v5 = vld [vmem:[%s3102_s30 + $0x140] sm:$0xf]  ;;  %v2627_v0 = vld [vmem:[%s3102_s30 + $0x198] sm:$0xf] }
 0x2ea   : > { %v1600_v13 = vadd.f32 %v1599_v7, %v1471_v4  ;;  %v3278_v7 = vpop.f32.mrf.mxu1  ;;  %v3301_v37 = vpop.f32.mrf.mxu2 }
 0x2eb   : > { %2936 = vst [vmem:[%s3208_s10 + $0x8] sm:$0xff] %v2824_v6   ;;  %1534 = vmatmul.bf16.gmra.mxu2 %v2608_v3  ;;  %v2785_v6 = vld [vmem:[%s3102_s30 + $0x148] sm:$0xf0]  ;;  %v2796_v3 = vld [vmem:[%s3102_s30 + $0x1a0] sm:$0xf0] }
 0x2ec   : > { %v1864_v10 = vadd.f32 %v3187_v23, %v1600_v13  ;;  %v2604_v13 = vor.u32 %v2790_v12, %v2603_v11  ;;  %v2588_v20 = vor.u32 %v2785_v6, %v2587_v5 }
 0x2ee   : > { %v1960_v29 = vmul.f32 0.01, %v1864_v10  ;;  %vm1912_vm4 = vcmp.ge.f32.partialorder %v1864_v10, 0.0  ;;  %1405 = vmatmul.bf16.gmra.mxu1 %v2604_v13 }
 0x2f0   : > { %v2008_v32 = vsel %vm1912_vm4, %v1864_v10, %v1960_v29 }
 0x2f1   : > { %v1601_v24 = vpop.f32.mrf.mxu3 }
 0x2f2   : > { %v1602_v25 = vadd.f32 %v1601_v24, %v1473_v9  ;;  %v3288_v1 = vpop.f32.mrf.mxu1  ;;  %v1486_v24 = vadd.f32 %v3238_v19, %v3236_v18  ;;  %v1488_v18 = vadd.f32 %v3248_v16, %v3246_v15  ;;  %v3311_v16 = vpop.f32.mrf.mxu2 }
 0x2f4   : > { %v1865_v30 = vadd.f32 %v3187_v23, %v1602_v25 }
 0x2f6   : > { %vm1913_vm5 = vcmp.ge.f32.partialorder %v1865_v30, 0.0  ;;  %v1961_v31 = vmul.f32 0.01, %v1865_v30  ;;  %1643 = vmatmul.bf16.gmra.mxu3 %v2564_v28 }
 0x2f8   : > { %v2009_v34 = vsel %vm1913_vm5, %v1865_v30, %v1961_v31  ;;  %v2792_v30 = vld [vmem:[%s3102_s30 + $0x184] sm:$0xf]  ;;  %v2617_v31 = vld [vmem:[%s3102_s30 + $0x18c] sm:$0xf0] }
 0x2f9   : > { %v2829_v35 = vpack.c.bf16 %v2009_v34, %v2008_v32  ;;  %v1604_v36 = vpop.f32.mrf.mxu3  ;;  %v2620_v32 = vor.u32 %v2792_v30, %v2617_v31  ;;  %v2599_v34 = vld [vmem:[%s3102_s30 + $0x158] sm:$0xf]  ;;  %v2639_v31 = vld [vmem:[%s3102_s30 + $0x1b0] sm:$0xf] }
 0x2fa   : > { %v1605_v42 = vadd.f32 %v1604_v36, %v1476_v33  ;;  %v3299_v36 = vpop.f32.mrf.mxu1  ;;  %v3322_v63 = vpop.f32.mrf.mxu2 }
 0x2fb   : > { %2937 = vst [vmem:[%s3208_s10 + $0x10] sm:$0xff] %v2829_v35   ;;  %1539 = vmatmul.bf16.gmra.mxu2 %v2620_v32  ;;  %v2788_v35 = vld [vmem:[%s3102_s30 + $0x160] sm:$0xf0]  ;;  %v2799_v32 = vld [vmem:[%s3102_s30 + $0x1b8] sm:$0xf0] }
 0x2fc   : > { %v1866_v27 = vadd.f32 %v3187_v23, %v1605_v42  ;;  %v2616_v42 = vor.u32 %v2793_v41, %v2615_v38  ;;  %v2600_v47 = vor.u32 %v2788_v35, %v2599_v34 }
 0x2fe   : > { %v1962_v55 = vmul.f32 0.01, %v1866_v27  ;;  %vm1914_vm6 = vcmp.ge.f32.partialorder %v1866_v27, 0.0  ;;  %1410 = vmatmul.bf16.gmra.mxu1 %v2616_v42 }
 0x300   : > { %v2010_v58 = vsel %vm1914_vm6, %v1866_v27, %v1962_v55 }
 0x301   : > { %v1606_v50 = vpop.f32.mrf.mxu3 }
 0x302   : > { %v1607_v51 = vadd.f32 %v1606_v50, %v1478_v26  ;;  %v3309_v15 = vpop.f32.mrf.mxu1  ;;  %v1491_v50 = vadd.f32 %v3259_v46, %v3257_v45  ;;  %v1493_v45 = vadd.f32 %v3269_v40, %v3267_v39  ;;  %v3332_v40 = vpop.f32.mrf.mxu2 }
 0x304   : > { %v1867_v56 = vadd.f32 %v3187_v23, %v1607_v51 }
 0x306   : > { %vm1915_vm7 = vcmp.ge.f32.partialorder %v1867_v56, 0.0  ;;  %v1963_v57 = vmul.f32 0.01, %v1867_v56  ;;  %1648 = vmatmul.bf16.gmra.mxu3 %v2576_v54 }
 0x308   : > { %v2011_v60 = vsel %vm1915_vm7, %v1867_v56, %v1963_v57  ;;  %v2795_v56 = vld [vmem:[%s3102_s30 + $0x19c] sm:$0xf]  ;;  %v2629_v57 = vld [vmem:[%s3102_s30 + $0x1a4] sm:$0xf0] }
 0x309   : > { %v2834_v61 = vpack.c.bf16 %v2011_v60, %v2010_v58  ;;  %v1609_v62 = vpop.f32.mrf.mxu3  ;;  %v2632_v58 = vor.u32 %v2795_v56, %v2629_v57  ;;  %v2611_v60 = vld [vmem:[%s3102_s30 + $0x170] sm:$0xf]  ;;  %v2651_v57 = vld [vmem:[%s3102_s30 + $0x1c8] sm:$0xf] }
 0x30a   : > { %v1610_v4 = vadd.f32 %v1609_v62, %v1481_v59  ;;  %v3320_v62 = vpop.f32.mrf.mxu1  ;;  %v3343_v30 = vpop.f32.mrf.mxu2 }
 0x30b   : > { %2938 = vst [vmem:[%s3208_s10 + $0x18] sm:$0xff] %v2834_v61   ;;  %1544 = vmatmul.bf16.gmra.mxu2 %v2632_v58  ;;  %v2791_v61 = vld [vmem:[%s3102_s30 + $0x178] sm:$0xf0]  ;;  %v2802_v58 = vld [vmem:[%s3102_s30 + $0x1d0] sm:$0xf0] }
 0x30c   : > { %v1868_v53 = vadd.f32 %v3187_v23, %v1610_v4  ;;  %v2628_v4 = vor.u32 %v2796_v3, %v2627_v0  ;;  %v2612_v11 = vor.u32 %v2791_v61, %v2611_v60 }
 0x30e   : > { %v1964_v21 = vmul.f32 0.01, %v1868_v53  ;;  %vm1916_vm8 = vcmp.ge.f32.partialorder %v1868_v53, 0.0  ;;  %1415 = vmatmul.bf16.gmra.mxu1 %v2628_v4 }
 0x310   : > { %v2012_v22 = vsel %vm1916_vm8, %v1868_v53, %v1964_v21 }
 0x311   : > { %v1611_v14 = vpop.f32.mrf.mxu3 }
 0x312   : > { %v1612_v17 = vadd.f32 %v1611_v14, %v1483_v52  ;;  %v3330_v39 = vpop.f32.mrf.mxu1  ;;  %v1496_v14 = vadd.f32 %v3280_v8, %v3278_v7  ;;  %v1498_v7 = vadd.f32 %v3290_v2, %v3288_v1  ;;  %v3353_v2 = vpop.f32.mrf.mxu2 }
 0x314   : > { %v1869_v9 = vadd.f32 %v3187_v23, %v1612_v17 }
 0x316   : > { %vm1917_vm9 = vcmp.ge.f32.partialorder %v1869_v9, 0.0  ;;  %v1965_v10 = vmul.f32 0.01, %v1869_v9  ;;  %1653 = vmatmul.bf16.gmra.mxu3 %v2588_v20 }
 0x318   : > { %v2013_v25 = vsel %vm1917_vm9, %v1869_v9, %v1965_v10  ;;  %v2798_v9 = vld [vmem:[%s3102_s30 + $0x1b4] sm:$0xf]  ;;  %v2641_v10 = vld [vmem:[%s3102_s30 + $0x1bc] sm:$0xf0] }
 0x319   : > { %v2839_v28 = vpack.c.bf16 %v2013_v25, %v2012_v22  ;;  %v1614_v29 = vpop.f32.mrf.mxu3  ;;  %v2644_v22 = vor.u32 %v2798_v9, %v2641_v10  ;;  %v2623_v25 = vld [vmem:[%s3102_s30 + $0x188] sm:$0xf]  ;;  %v2663_v10 = vld [vmem:[%s3102_s30 + $0x1e0] sm:$0xf] }
 0x31a   : > { %v1615_v33 = vadd.f32 %v1614_v29, %v1486_v24  ;;  %v3341_v29 = vpop.f32.mrf.mxu1  ;;  %v3364_v56 = vpop.f32.mrf.mxu2 }
 0x31b   : > { %2939 = vst [vmem:[%s3208_s10 + $0x20] sm:$0xff] %v2839_v28   ;;  %1549 = vmatmul.bf16.gmra.mxu2 %v2644_v22  ;;  %v2794_v28 = vld [vmem:[%s3102_s30 + $0x190] sm:$0xf0]  ;;  %v2805_v22 = vld [vmem:[%s3102_s30 + $0x1e8] sm:$0xf0] }
 0x31c   : > { %v1870_v19 = vadd.f32 %v3187_v23, %v1615_v33  ;;  %v2640_v33 = vor.u32 %v2799_v32, %v2639_v31  ;;  %v2624_v38 = vor.u32 %v2794_v28, %v2623_v25 }
 0x31e   : > { %v1966_v48 = vmul.f32 0.01, %v1870_v19  ;;  %vm1918_vm10 = vcmp.ge.f32.partialorder %v1870_v19, 0.0  ;;  %1420 = vmatmul.bf16.gmra.mxu1 %v2640_v33 }
 0x320   : > { %v2014_v49 = vsel %vm1918_vm10, %v1870_v19, %v1966_v48 }
 0x321   : > { %v1616_v43 = vpop.f32.mrf.mxu3 }
 0x322   : > { %v1617_v44 = vadd.f32 %v1616_v43, %v1488_v18  ;;  %v3351_v1 = vpop.f32.mrf.mxu1  ;;  %v1501_v43 = vadd.f32 %v3301_v37, %v3299_v36  ;;  %v1503_v36 = vadd.f32 %v3311_v16, %v3309_v15  ;;  %v3374_v16 = vpop.f32.mrf.mxu2 }
 0x324   : > { %v1871_v26 = vadd.f32 %v3187_v23, %v1617_v44 }
 0x326   : > { %vm1919_vm11 = vcmp.ge.f32.partialorder %v1871_v26, 0.0  ;;  %v1967_v27 = vmul.f32 0.01, %v1871_v26  ;;  %1658 = vmatmul.bf16.gmra.mxu3 %v2600_v47 }
 0x328   : > { %v2015_v51 = vsel %vm1919_vm11, %v1871_v26, %v1967_v27  ;;  %v2801_v26 = vld [vmem:[%s3102_s30 + $0x1cc] sm:$0xf]  ;;  %v2653_v27 = vld [vmem:[%s3102_s30 + $0x1d4] sm:$0xf0] }
 0x329   : > { %v2844_v54 = vpack.c.bf16 %v2015_v51, %v2014_v49  ;;  %v1619_v55 = vpop.f32.mrf.mxu3  ;;  %v2656_v49 = vor.u32 %v2801_v26, %v2653_v27  ;;  %v2635_v51 = vld [vmem:[%s3102_s30 + $0x1a0] sm:$0xf]  ;;  %v2675_v27 = vld [vmem:[%s3102_s30 + $0x1f8] sm:$0xf] }
 0x32a   : > { %v1620_v59 = vadd.f32 %v1619_v55, %v1491_v50  ;;  %v3362_v55 = vpop.f32.mrf.mxu1  ;;  %v3385_v9 = vpop.f32.mrf.mxu2 }
 0x32b   : > { %2940 = vst [vmem:[%s3208_s10 + $0x28] sm:$0xff] %v2844_v54   ;;  %1554 = vmatmul.bf16.gmra.mxu2 %v2656_v49  ;;  %v2797_v54 = vld [vmem:[%s3102_s30 + $0x1a8] sm:$0xf0]  ;;  %v2808_v49 = vld [vmem:[%s3102_s30 + $0x200] sm:$0xf0] }
 0x32c   : > { %v1872_v46 = vadd.f32 %v3187_v23, %v1620_v59  ;;  %v2652_v59 = vor.u32 %v2802_v58, %v2651_v57  ;;  %v2636_v0 = vor.u32 %v2797_v54, %v2635_v51 }
 0x32e   : > { %v1968_v12 = vmul.f32 0.01, %v1872_v46  ;;  %vm1920_vm12 = vcmp.ge.f32.partialorder %v1872_v46, 0.0  ;;  %1425 = vmatmul.bf16.gmra.mxu1 %v2652_v59 }
 0x330   : > { %v2016_v13 = vsel %vm1920_vm12, %v1872_v46, %v1968_v12 }
 0x331   : > { %v1621_v5 = vpop.f32.mrf.mxu3 }
 0x332   : > { %v1622_v6 = vadd.f32 %v1621_v5, %v1493_v45  ;;  %v3372_v15 = vpop.f32.mrf.mxu1  ;;  %v1506_v5 = vadd.f32 %v3322_v63, %v3320_v62  ;;  %v1508_v62 = vadd.f32 %v3332_v40, %v3330_v39  ;;  %v3395_v40 = vpop.f32.mrf.mxu2 }
 0x334   : > { %v1873_v52 = vadd.f32 %v3187_v23, %v1622_v6 }
 0x336   : > { %vm1921_vm13 = vcmp.ge.f32.partialorder %v1873_v52, 0.0  ;;  %v1969_v53 = vmul.f32 0.01, %v1873_v52  ;;  %1663 = vmatmul.bf16.gmra.mxu3 %v2612_v11 }
 0x338   : > { %v2017_v17 = vsel %vm1921_vm13, %v1873_v52, %v1969_v53  ;;  %v2804_v52 = vld [vmem:[%s3102_s30 + $0x1e4] sm:$0xf]  ;;  %v2665_v53 = vld [vmem:[%s3102_s30 + $0x1ec] sm:$0xf0] }
 0x339   : > { %v2849_v20 = vpack.c.bf16 %v2017_v17, %v2016_v13  ;;  %v1624_v21 = vpop.f32.mrf.mxu3  ;;  %v2668_v13 = vor.u32 %v2804_v52, %v2665_v53  ;;  %v2647_v17 = vld [vmem:[%s3102_s30 + $0x1b8] sm:$0xf]  ;;  %v2687_v53 = vld [vmem:[%s3102_s30 + $0x210] sm:$0xf] }
 0x33a   : > { %v1625_v24 = vadd.f32 %v1624_v21, %v1496_v14  ;;  %v3383_v21 = vpop.f32.mrf.mxu1  ;;  %v3406_v26 = vpop.f32.mrf.mxu2 }
 0x33b   : > { %2941 = vst [vmem:[%s3208_s10 + $0x30] sm:$0xff] %v2849_v20   ;;  %1559 = vmatmul.bf16.gmra.mxu2 %v2668_v13  ;;  %v2800_v20 = vld [vmem:[%s3102_s30 + $0x1c0] sm:$0xf0]  ;;  %v2811_v13 = vld [vmem:[%s3102_s30 + $0x218] sm:$0xf0] }
 0x33c   : > { %v1874_v8 = vadd.f32 %v3187_v23, %v1625_v24  ;;  %v2664_v24 = vor.u32 %v2805_v22, %v2663_v10  ;;  %v2648_v31 = vor.u32 %v2800_v20, %v2647_v17 }
 0x33e   : > { %v1970_v41 = vmul.f32 0.01, %v1874_v8  ;;  %vm1922_vm14 = vcmp.ge.f32.partialorder %v1874_v8, 0.0  ;;  %1430 = vmatmul.bf16.gmra.mxu1 %v2664_v24 }
 0x340   : > { %v2018_v42 = vsel %vm1922_vm14, %v1874_v8, %v1970_v41 }
 0x341   : > { %v1626_v34 = vpop.f32.mrf.mxu3 }
 0x342   : > { %v1627_v35 = vadd.f32 %v1626_v34, %v1498_v7  ;;  %v3393_v39 = vpop.f32.mrf.mxu1  ;;  %v1511_v34 = vadd.f32 %v3343_v30, %v3341_v29  ;;  %v1513_v29 = vadd.f32 %v3353_v2, %v3351_v1  ;;  %v3416_v2 = vpop.f32.mrf.mxu2 }
 0x344   : > { %v1875_v18 = vadd.f32 %v3187_v23, %v1627_v35 }
 0x346   : > { %vm1923_vm15 = vcmp.ge.f32.partialorder %v1875_v18, 0.0  ;;  %v1971_v19 = vmul.f32 0.01, %v1875_v18  ;;  %1668 = vmatmul.bf16.gmra.mxu3 %v2624_v38 }
 0x348   : > { %v2019_v44 = vsel %vm1923_vm15, %v1875_v18, %v1971_v19  ;;  %v2807_v18 = vld [vmem:[%s3102_s30 + $0x1fc] sm:$0xf]  ;;  %v2677_v19 = vld [vmem:[%s3102_s30 + $0x204] sm:$0xf0] }
 0x349   : > { %v2854_v47 = vpack.c.bf16 %v2019_v44, %v2018_v42  ;;  %v1629_v48 = vpop.f32.mrf.mxu3  ;;  %v2680_v42 = vor.u32 %v2807_v18, %v2677_v19  ;;  %v2659_v44 = vld [vmem:[%s3102_s30 + $0x1d0] sm:$0xf]  ;;  %v2814_v18 = vld [vmem:[%s3102_s30 + $0x230] sm:$0xf0]  ;;  %v1523_v19 = vadd.f32 %v3395_v40, %v3393_v39 }
 0x34a   : > { %v1630_v50 = vadd.f32 %v1629_v48, %v1501_v43 }
 0x34b   : > { %2942 = vst [vmem:[%s3208_s10 + $0x38] sm:$0xff] %v2854_v47   ;;  %1564 = vmatmul.bf16.gmra.mxu2 %v2680_v42  ;;  %v2803_v47 = vld [vmem:[%s3102_s30 + $0x1d8] sm:$0xf0]  ;;  %v3404_v48 = vpop.f32.mrf.mxu1 }
 0x34c   : > { %v1876_v37 = vadd.f32 %v3187_v23, %v1630_v50  ;;  %v2676_v50 = vor.u32 %v2808_v49, %v2675_v27  ;;  %v2660_v57 = vor.u32 %v2803_v47, %v2659_v44  ;;  %v1526_v40 = vadd.f32 %v3406_v26, %v3404_v48 }
 0x34e   : > { %v1972_v3 = vmul.f32 0.01, %v1876_v37  ;;  %vm1924_vm0 = vcmp.ge.f32.partialorder %v1876_v37, 0.0  ;;  %1435 = vmatmul.bf16.gmra.mxu1 %v2676_v50 }
 0x350   : > { %v2020_v4 = vsel %vm1924_vm0, %v1876_v37, %v1972_v3 }
 0x351   : > { %v1631_v60 = vpop.f32.mrf.mxu3 }
 0x352   : > { %v1632_v61 = vadd.f32 %v1631_v60, %v1503_v36  ;;  %v1516_v60 = vadd.f32 %v3364_v56, %v3362_v55  ;;  %v1518_v55 = vadd.f32 %v3374_v16, %v3372_v15  ;;  %v1521_v16 = vadd.f32 %v3385_v9, %v3383_v21 }
 0x353   : > { %v3414_v1 = vpop.f32.mrf.mxu1 }
 0x354   : > { %v1877_v45 = vadd.f32 %v3187_v23, %v1632_v61 }
 0x356   : > { %vm1925_vm1 = vcmp.ge.f32.partialorder %v1877_v45, 0.0  ;;  %v1973_v46 = vmul.f32 0.01, %v1877_v45  ;;  %1673 = vmatmul.bf16.gmra.mxu3 %v2636_v0 }
 0x358   : > { %v2021_v6 = vsel %vm1925_vm1, %v1877_v45, %v1973_v46  ;;  %v2810_v45 = vld [vmem:[%s3102_s30 + $0x214] sm:$0xf]  ;;  %v2689_v46 = vld [vmem:[%s3102_s30 + $0x21c] sm:$0xf0] }
 0x359   : > { %v2859_v11 = vpack.c.bf16 %v2021_v6, %v2020_v4  ;;  %v1634_v12 = vpop.f32.mrf.mxu3  ;;  %v2692_v4 = vor.u32 %v2810_v45, %v2689_v46  ;;  %v2671_v6 = vld [vmem:[%s3102_s30 + $0x1e8] sm:$0xf] }
 0x35a   : > { %v1635_v14 = vadd.f32 %v1634_v12, %v1506_v5 }
 0x35b   : > { %2943 = vst [vmem:[%s3208_s10 + $0x40] sm:$0xff] %v2859_v11   ;;  %1569 = vmatmul.bf16.gmra.mxu2 %v2692_v4  ;;  %v2806_v11 = vld [vmem:[%s3102_s30 + $0x1f0] sm:$0xf0]  ;;  %v3425_v12 = vpop.f32.mrf.mxu1 }
 0x35c   : > { %v1878_v63 = vadd.f32 %v3187_v23, %v1635_v14  ;;  %v2688_v14 = vor.u32 %v2811_v13, %v2687_v53  ;;  %v2672_v10 = vor.u32 %v2806_v11, %v2671_v6 }
 0x35e   : > { %v1974_v32 = vmul.f32 0.01, %v1878_v63  ;;  %vm1926_vm2 = vcmp.ge.f32.partialorder %v1878_v63, 0.0  ;;  %v3427_v52 = vpop.f32.mrf.mxu2  ;;  %1440 = vmatmul.bf16.gmra.mxu1 %v2688_v14 }
 0x360   : > { %v2022_v33 = vsel %vm1926_vm2, %v1878_v63, %v1974_v32 }
 0x361   : > { %v1636_v25 = vpop.f32.mrf.mxu3 }
 0x362   : > { %v1637_v28 = vadd.f32 %v1636_v25, %v1508_v62 }
 0x363   : > { %v1403_v25 = vpop.f32.mrf.mxu1 }
 0x364   : > { %v1879_v7 = vadd.f32 %v3187_v23, %v1637_v28 }
 0x366   : > { %vm1927_vm3 = vcmp.ge.f32.partialorder %v1879_v7, 0.0  ;;  %v1975_v8 = vmul.f32 0.01, %v1879_v7  ;;  %1678 = vmatmul.bf16.gmra.mxu3 %v2648_v31  ;;  %v1532_v32 = vpop.f32.mrf.mxu2 }
 0x367   : > { %v1533_v14 = vadd.f32 %v1532_v32, %v1403_v25 }
 0x368   : > { %v2023_v35 = vsel %vm1927_vm3, %v1879_v7, %v1975_v8  ;;  %v2813_v7 = vld [vmem:[%s3102_s30 + $0x22c] sm:$0xf]  ;;  %v2701_v8 = vld [vmem:[%s3102_s30 + $0x234] sm:$0xf0] }
 0x369   : > { %v2864_v38 = vpack.c.bf16 %v2023_v35, %v2022_v33  ;;  %v1639_v41 = vpop.f32.mrf.mxu3  ;;  %v2704_v33 = vor.u32 %v2813_v7, %v2701_v8  ;;  %v2683_v35 = vld [vmem:[%s3102_s30 + $0x200] sm:$0xf] }
 0x36a   : > { %v1640_v43 = vadd.f32 %v1639_v41, %v1511_v34  ;;  %v2699_v41 = vld [vmem:[%s3102_s30 + $0x228] sm:$0xf] }
 0x36b   : > { %2944 = vst [vmem:[%s3208_s10 + $0x48] sm:$0xff] %v2864_v38   ;;  %1574 = vmatmul.bf16.gmra.mxu2 %v2704_v33  ;;  %v2809_v38 = vld [vmem:[%s3102_s30 + $0x208] sm:$0xf0]  ;;  %v2700_v9 = vor.u32 %v2814_v18, %v2699_v41  ;;  %v1406_v47 = vpop.f32.mrf.mxu1 }
 0x36c   : > { %v1880_v30 = vadd.f32 %v3187_v23, %v1640_v43  ;;  %v2684_v44 = vor.u32 %v2809_v38, %v2683_v35 }
 0x36e   : > { %v1976_v58 = vmul.f32 0.01, %v1880_v30  ;;  %vm1928_vm4 = vcmp.ge.f32.partialorder %v1880_v30, 0.0  ;;  %1445 = vmatmul.bf16.gmra.mxu1 %v2700_v9  ;;  %v1535_v27 = vpop.f32.mrf.mxu2 }
 0x370   : > { %v2024_v59 = vsel %vm1928_vm4, %v1880_v30, %v1976_v58 }
 0x371   : > { %v1641_v51 = vpop.f32.mrf.mxu3 }
 0x372   : > { %v1642_v54 = vadd.f32 %v1641_v51, %v1513_v29 }
 0x373   : > { %v1408_v58 = vpop.f32.mrf.mxu1 }
 0x374   : > { %v1881_v36 = vadd.f32 %v3187_v23, %v1642_v54 }
 0x376   : > { %vm1929_vm5 = vcmp.ge.f32.partialorder %v1881_v36, 0.0  ;;  %v1977_v37 = vmul.f32 0.01, %v1881_v36  ;;  %1683 = vmatmul.bf16.gmra.mxu3 %v2660_v57 }
 0x378   : > { %v2025_v61 = vsel %vm1929_vm5, %v1881_v36, %v1977_v37  ;;  %v1537_v36 = vpop.f32.mrf.mxu2  ;;  %v2695_v37 = vld [vmem:[%s3102_s30 + $0x218] sm:$0xf] }
 0x379   : > { %v2869_v0 = vpack.c.bf16 %v2025_v61, %v2024_v59  ;;  %v1644_v3 = vpop.f32.mrf.mxu3  ;;  %v2812_v59 = vld [vmem:[%s3102_s30 + $0x220] sm:$0xf0]  ;;  %v1538_v33 = vadd.f32 %v1537_v36, %v1408_v58 }
 0x37a   : > { %v1645_v5 = vadd.f32 %v1644_v3, %v1516_v60  ;;  %v1528_v60 = vadd.f32 %v3416_v2, %v3414_v1  ;;  %v2696_v45 = vor.u32 %v2812_v59, %v2695_v37  ;;  %v1531_v1 = vadd.f32 %v3427_v52, %v3425_v12 }
 0x37b   : > { %2945 = vst [vmem:[%s3208_s10 + $0x50] sm:$0xff] %v2869_v0   ;;  %v1411_v4 = vpop.f32.mrf.mxu1 }
 0x37c   : > { %v1882_v56 = vadd.f32 %v3187_v23, %v1645_v5 }
 0x37e   : > { %v1978_v22 = vmul.f32 0.01, %v1882_v56  ;;  %vm1930_vm6 = vcmp.ge.f32.partialorder %v1882_v56, 0.0 }
 0x380   : > { %v2026_v15 = vsel %vm1930_vm6, %v1882_v56, %v1978_v22  ;;  %v1540_v5 = vpop.f32.mrf.mxu2  ;;  %v2815_v56 = vld [vmem:[%s3102_s30 + $0x238] sm:$0xf0] }
 0x381   : > { %v1646_v17 = vpop.f32.mrf.mxu3 }
 0x382   : > { %v1647_v20 = vadd.f32 %v1646_v17, %v1518_v55  ;;  %v2707_v55 = vld [vmem:[%s3102_s30 + $0x230] sm:$0xf] }
 0x384   : > { %v1883_v62 = vadd.f32 %v3187_v23, %v1647_v20  ;;  %v1413_v20 = vpop.f32.mrf.mxu1 }
 0x386   : > { %vm1931_vm7 = vcmp.ge.f32.partialorder %v1883_v62, 0.0  ;;  %v1979_v63 = vmul.f32 0.01, %v1883_v62  ;;  %1688 = vmatmul.bf16.gmra.mxu3 %v2672_v10 }
 0x388   : > { %v2027_v24 = vsel %vm1931_vm7, %v1883_v62, %v1979_v63  ;;  %v1542_v22 = vpop.f32.mrf.mxu2  ;;  %v2708_v63 = vor.u32 %v2815_v56, %v2707_v55 }
 0x389   : > { %v2874_v28 = vpack.c.bf16 %v2027_v24, %v2026_v15  ;;  %v1649_v31 = vpop.f32.mrf.mxu3  ;;  %v1536_v24 = vadd.f32 %v1535_v27, %v1406_v47 }
 0x38a   : > { %v1650_v34 = vadd.f32 %v1649_v31, %v1521_v16 }
 0x38b   : > { %2946 = vst [vmem:[%s3208_s10 + $0x58] sm:$0xff] %v2874_v28  }
 0x38c   : > { %v1884_v21 = vadd.f32 %v3187_v23, %v1650_v34  ;;  %v1416_v32 = vpop.f32.mrf.mxu1 }
 0x38e   : > { %v1980_v49 = vmul.f32 0.01, %v1884_v21  ;;  %vm1932_vm8 = vcmp.ge.f32.partialorder %v1884_v21, 0.0 }
 0x390   : > { %v2028_v39 = vsel %vm1932_vm8, %v1884_v21, %v1980_v49  ;;  %v1545_v7 = vpop.f32.mrf.mxu2 }
 0x391   : > { %v1651_v42 = vpop.f32.mrf.mxu3  ;;  %v1546_v37 = vadd.f32 %v1545_v7, %v1416_v32 }
 0x392   : > { %v1652_v43 = vadd.f32 %v1651_v42, %v1523_v19 }
 0x394   : > { %v1885_v29 = vadd.f32 %v3187_v23, %v1652_v43  ;;  %v1418_v19 = vpop.f32.mrf.mxu1  ;;  %v1541_v43 = vadd.f32 %v1540_v5, %v1411_v4 }
 0x396   : > { %vm1933_vm9 = vcmp.ge.f32.partialorder %v1885_v29, 0.0  ;;  %v1981_v30 = vmul.f32 0.01, %v1885_v29  ;;  %1693 = vmatmul.bf16.gmra.mxu3 %v2684_v44 }
 0x398   : > { %v2029_v50 = vsel %vm1933_vm9, %v1885_v29, %v1981_v30  ;;  %v1547_v21 = vpop.f32.mrf.mxu2 }
 0x399   : > { %v2879_v51 = vpack.c.bf16 %v2029_v50, %v2028_v39  ;;  %v1654_v54 = vpop.f32.mrf.mxu3  ;;  %v1543_v39 = vadd.f32 %v1542_v22, %v1413_v20 }
 0x39a   : > { %v1655_v57 = vadd.f32 %v1654_v54, %v1526_v40 }
 0x39b   : > { %2947 = vst [vmem:[%s3208_s10 + $0x60] sm:$0xff] %v2879_v51  }
 0x39c   : > { %v1886_v61 = vadd.f32 %v3187_v23, %v1655_v57  ;;  %v1421_v29 = vpop.f32.mrf.mxu1 }
 0x39e   : > { %v1982_v48 = vmul.f32 0.01, %v1886_v61  ;;  %vm1934_vm10 = vcmp.ge.f32.partialorder %v1886_v61, 0.0 }
 0x3a0   : > { %v2030_v6 = vsel %vm1934_vm10, %v1886_v61, %v1982_v48  ;;  %v1550_v30 = vpop.f32.mrf.mxu2  ;;  %v1548_v48 = vadd.f32 %v1547_v21, %v1418_v19 }
 0x3a1   : > { %v1656_v0 = vpop.f32.mrf.mxu3 }
 0x3a2   : > { %v1657_v3 = vadd.f32 %v1656_v0, %v1528_v60 }
 0x3a4   : > { %v1887_v26 = vadd.f32 %v3187_v23, %v1657_v3  ;;  %v1423_v60 = vpop.f32.mrf.mxu1 }
 0x3a6   : > { %vm1935_vm11 = vcmp.ge.f32.partialorder %v1887_v26, 0.0  ;;  %v1983_v46 = vmul.f32 0.01, %v1887_v26  ;;  %1698 = vmatmul.bf16.gmra.mxu3 %v2696_v45 }
 0x3a8   : > { %v2031_v2 = vsel %vm1935_vm11, %v1887_v26, %v1983_v46  ;;  %v1552_v3 = vpop.f32.mrf.mxu2 }
 0x3a9   : > { %v2884_v11 = vpack.c.bf16 %v2031_v2, %v2030_v6  ;;  %v1659_v53 = vpop.f32.mrf.mxu3  ;;  %v1553_v22 = vadd.f32 %v1552_v3, %v1423_v60 }
 0x3aa   : > { %v1660_v13 = vadd.f32 %v1659_v53, %v1531_v1 }
 0x3ab   : > { %2948 = vst [vmem:[%s3208_s10 + $0x68] sm:$0xff] %v2884_v11  }
 0x3ac   : > { %v1888_v17 = vadd.f32 %v3187_v23, %v1660_v13  ;;  %v1426_v5 = vpop.f32.mrf.mxu1  ;;  %v1551_v13 = vadd.f32 %v1550_v30, %v1421_v29 }
 0x3ae   : > { %v1984_v15 = vmul.f32 0.01, %v1888_v17  ;;  %vm1936_vm12 = vcmp.ge.f32.partialorder %v1888_v17, 0.0 }
 0x3b0   : > { %v2032_v52 = vsel %vm1936_vm12, %v1888_v17, %v1984_v15  ;;  %v1555_v6 = vpop.f32.mrf.mxu2 }
 0x3b1   : > { %v1661_v10 = vpop.f32.mrf.mxu3 }
 0x3b2   : > { %v1662_v62 = vadd.f32 %v1661_v10, %v1533_v14 }
 0x3b4   : > { %v1889_v16 = vadd.f32 %v3187_v23, %v1662_v62  ;;  %v1428_v20 = vpop.f32.mrf.mxu1  ;;  %v3475_v62 = vld [vmem:[%s3124_s7] ss:$0 sm:$0xff] }
 0x3b6   : > { %vm1937_vm13 = vcmp.ge.f32.partialorder %v1889_v16, 0.0  ;;  %v1985_v12 = vmul.f32 0.01, %v1889_v16  ;;  %1703 = vmatmul.bf16.gmra.mxu3 %v2708_v63 }
 0x3b8   : > { %v2033_v28 = vsel %vm1937_vm13, %v1889_v16, %v1985_v12  ;;  %v1557_v10 = vpop.f32.mrf.mxu2 }
 0x3b9   : > { %v2889_v31 = vpack.c.bf16 %v2033_v28, %v2032_v52  ;;  %v1664_v25 = vpop.f32.mrf.mxu3 }
 0x3ba   : > { %v1665_v8 = vadd.f32 %v1664_v25, %v1536_v24  ;;  %v1556_v25 = vadd.f32 %v1555_v6, %v1426_v5 }
 0x3bb   : > { %2949 = vst [vmem:[%s3208_s10 + $0x70] sm:$0xff] %v2889_v31  }
 0x3bc   : > { %v1890_v34 = vadd.f32 %v3187_v23, %v1665_v8  ;;  %v1431_v24 = vpop.f32.mrf.mxu1 }
 0x3be   : > { %v1986_v41 = vmul.f32 0.01, %v1890_v34  ;;  %vm1938_vm14 = vcmp.ge.f32.partialorder %v1890_v34, 0.0 }
 0x3c0   : > { %v2034_v42 = vsel %vm1938_vm14, %v1890_v34, %v1986_v41  ;;  %v1560_v28 = vpop.f32.mrf.mxu2  ;;  %v1558_v34 = vadd.f32 %v1557_v10, %v1428_v20 }
 0x3c1   : > { %v1666_v35 = vpop.f32.mrf.mxu3 }
 0x3c2   : > { %v1667_v38 = vadd.f32 %v1666_v35, %v1538_v33 }
 0x3c4   : > { %v1891_v18 = vadd.f32 %v3187_v23, %v1667_v38  ;;  %v1433_v38 = vpop.f32.mrf.mxu1 }
 0x3c6   : > { %vm1939_vm15 = vcmp.ge.f32.partialorder %v1891_v18, 0.0  ;;  %v1987_v9 = vmul.f32 0.01, %v1891_v18 }
 0x3c8   : > { %v2035_v44 = vsel %vm1939_vm15, %v1891_v18, %v1987_v9  ;;  %v1562_v18 = vpop.f32.mrf.mxu2 }
 0x3c9   : > { %v2894_v47 = vpack.c.bf16 %v2035_v44, %v2034_v42  ;;  %v1669_v27 = vpop.f32.mrf.mxu3  ;;  %v1561_v44 = vadd.f32 %v1560_v28, %v1431_v24 }
 0x3ca   : > { %v1670_v49 = vadd.f32 %v1669_v27, %v1541_v43 }
 0x3cb   : > { %2950 = vst [vmem:[%s3208_s10 + $0x78] sm:$0xff] %v2894_v47  }
 0x3cc   : > { %v1892_v40 = vadd.f32 %v3187_v23, %v1670_v49  ;;  %v1436_v29 = vpop.f32.mrf.mxu1 }
 0x3ce   : > { %v1988_v54 = vmul.f32 0.01, %v1892_v40  ;;  %vm1940_vm0 = vcmp.ge.f32.partialorder %v1892_v40, 0.0 }
 0x3d0   : > { %v2036_v36 = vsel %vm1940_vm0, %v1892_v40, %v1988_v54  ;;  %v1565_v30 = vpop.f32.mrf.mxu2  ;;  %v1563_v40 = vadd.f32 %v1562_v18, %v1433_v38 }
 0x3d1   : > { %v1671_v50 = vpop.f32.mrf.mxu3 }
 0x3d2   : > { %v1672_v51 = vadd.f32 %v1671_v50, %v1543_v39 }
 0x3d4   : > { %v1893_v57 = vadd.f32 %v3187_v23, %v1672_v51 }
 0x3d6   : > { %vm1941_vm1 = vcmp.ge.f32.partialorder %v1893_v57, 0.0  ;;  %v1989_v58 = vmul.f32 0.01, %v1893_v57 }
 0x3d8   : > { %v2037_v59 = vsel %vm1941_vm1, %v1893_v57, %v1989_v58 }
 0x3d9   : > { %v2899_v61 = vpack.c.bf16 %v2037_v59, %v2036_v36  ;;  %v1674_v0 = vpop.f32.mrf.mxu3  ;;  %v1438_v36 = vpop.f32.mrf.mxu1 }
 0x3da   : > { %v1675_v45 = vadd.f32 %v1674_v0, %v1546_v37  ;;  %v1567_v37 = vpop.f32.mrf.mxu2 }
 0x3db   : > { %2951 = vst [vmem:[%s3208_s10 + $0x80] sm:$0xff] %v2899_v61   ;;  %v1566_v61 = vadd.f32 %v1565_v30, %v1436_v29 }
 0x3dc   : > { %v1894_v26 = vadd.f32 %v3187_v23, %v1675_v45 }
 0x3de   : > { %v1990_v1 = vmul.f32 0.01, %v1894_v26  ;;  %vm1942_vm2 = vcmp.ge.f32.partialorder %v1894_v26, 0.0 }
 0x3e0   : > { %v2038_v53 = vsel %vm1942_vm2, %v1894_v26, %v1990_v1 }
 0x3e1   : > { %v1676_v46 = vpop.f32.mrf.mxu3  ;;  %v1441_v26 = vpop.f32.mrf.mxu1 }
 0x3e2   : > { %v1677_v4 = vadd.f32 %v1676_v46, %v1548_v48  ;;  %v1570_v46 = vpop.f32.mrf.mxu2 }
 0x3e4   : > { %v1895_v2 = vadd.f32 %v3187_v23, %v1677_v4  ;;  %v1568_v4 = vadd.f32 %v1567_v37, %v1438_v36 }
 0x3e6   : > { %vm1943_vm3 = vcmp.ge.f32.partialorder %v1895_v2, 0.0  ;;  %v1991_v11 = vmul.f32 0.01, %v1895_v2 }
 0x3e8   : > { %v2039_v55 = vsel %vm1943_vm3, %v1895_v2, %v1991_v11 }
 0x3e9   : > { %v2904_v56 = vpack.c.bf16 %v2039_v55, %v2038_v53  ;;  %v1679_v14 = vpop.f32.mrf.mxu3  ;;  %v1571_v55 = vadd.f32 %v1570_v46, %v1441_v26 }
 0x3ea   : > { %v1680_v17 = vadd.f32 %v1679_v14, %v1551_v13  ;;  %v1443_v14 = vpop.f32.mrf.mxu1  ;;  %v1572_v20 = vpop.f32.mrf.mxu2 }
 0x3eb   : > { %2952 = vst [vmem:[%s3208_s10 + $0x88] sm:$0xff] %v2904_v56  }
 0x3ec   : > { %v1896_v63 = vadd.f32 %v3475_v62, %v1680_v17 }
 0x3ee   : > { %v1992_v16 = vmul.f32 0.01, %v1896_v63  ;;  %vm1944_vm4 = vcmp.ge.f32.partialorder %v1896_v63, 0.0 }
 0x3f0   : > { %v2040_v31 = vsel %vm1944_vm4, %v1896_v63, %v1992_v16  ;;  %v1573_v63 = vadd.f32 %v1572_v20, %v1443_v14 }
 0x3f1   : > { %v1681_v15 = vpop.f32.mrf.mxu3 }
 0x3f2   : > { %v1682_v23 = vadd.f32 %v1681_v15, %v1553_v22 }
 0x3f4   : > { %v1897_v12 = vadd.f32 %v3475_v62, %v1682_v23 }
 0x3f6   : > { %vm1945_vm5 = vcmp.ge.f32.partialorder %v1897_v12, 0.0  ;;  %v1993_v52 = vmul.f32 0.01, %v1897_v12 }
 0x3f8   : > { %v2041_v32 = vsel %vm1945_vm5, %v1897_v12, %v1993_v52  ;;  %v1446_v12 = vpop.f32.mrf.mxu1  ;;  %v1575_v52 = vpop.f32.mrf.mxu2 }
 0x3f9   : > { %v2909_v7 = vpack.c.bf16 %v2041_v32, %v2040_v31  ;;  %v1684_v8 = vpop.f32.mrf.mxu3  ;;  %v1576_v32 = vadd.f32 %v1575_v52, %v1446_v12 }
 0x3fa   : > { %v1685_v33 = vadd.f32 %v1684_v8, %v1556_v25 }
 0x3fb   : > { %2953 = vst [vmem:[%s3208_s10 + $0x90] sm:$0xff] %v2909_v7  }
 0x3fc   : > { %v1898_v35 = vadd.f32 %v3475_v62, %v1685_v33 }
 0x3fe   : > { %v1994_v21 = vmul.f32 0.01, %v1898_v35  ;;  %vm1946_vm6 = vcmp.ge.f32.partialorder %v1898_v35, 0.0 }
 0x400   : > { %v2042_v43 = vsel %vm1946_vm6, %v1898_v35, %v1994_v21  ;;  %v1448_v35 = vpop.f32.mrf.mxu1  ;;  %v1577_v38 = vpop.f32.mrf.mxu2 }
 0x401   : > { %v1686_v41 = vpop.f32.mrf.mxu3 }
 0x402   : > { %v1687_v19 = vadd.f32 %v1686_v41, %v1558_v34  ;;  %v1578_v41 = vadd.f32 %v1577_v38, %v1448_v35 }
 0x404   : > { %v1899_v9 = vadd.f32 %v3475_v62, %v1687_v19 }
 0x406   : > { %vm1947_vm7 = vcmp.ge.f32.partialorder %v1899_v9, 0.0  ;;  %v1995_v42 = vmul.f32 0.01, %v1899_v9 }
 0x408   : > { %v2043_v47 = vsel %vm1947_vm7, %v1899_v9, %v1995_v42 }
 0x409   : > { %v2914_v27 = vpack.c.bf16 %v2043_v47, %v2042_v43  ;;  %v1689_v49 = vpop.f32.mrf.mxu3 }
 0x40a   : > { %v1690_v39 = vadd.f32 %v1689_v49, %v1561_v44 }
 0x40b   : > { %2954 = vst [vmem:[%s3208_s10 + $0x98] sm:$0xff] %v2914_v27  }
 0x40c   : > { %v1900_v50 = vadd.f32 %v3475_v62, %v1690_v39 }
 0x40e   : > { %v1996_v57 = vmul.f32 0.01, %v1900_v50  ;;  %vm1948_vm8 = vcmp.ge.f32.partialorder %v1900_v50, 0.0 }
 0x410   : > { %v2044_v60 = vsel %vm1948_vm8, %v1900_v50, %v1996_v57 }
 0x411   : > { %v1691_v51 = vpop.f32.mrf.mxu3 }
 0x412   : > { %v1692_v54 = vadd.f32 %v1691_v51, %v1563_v40 }
 0x414   : > { %v1901_v58 = vadd.f32 %v3475_v62, %v1692_v54 }
 0x416   : > { %vm1949_vm9 = vcmp.ge.f32.partialorder %v1901_v58, 0.0  ;;  %v1997_v59 = vmul.f32 0.01, %v1901_v58 }
 0x418   : > { %v2045_v0 = vsel %vm1949_vm9, %v1901_v58, %v1997_v59 }
 0x419   : > { %v2919_v3 = vpack.c.bf16 %v2045_v0, %v2044_v60  ;;  %v1694_v45 = vpop.f32.mrf.mxu3 }
 0x41a   : > { %v1695_v48 = vadd.f32 %v1694_v45, %v1566_v61 }
 0x41b   : > { %2955 = vst [vmem:[%s3208_s10 + $0xa0] sm:$0xff] %v2919_v3  }
 0x41c   : > { %v1902_v5 = vadd.f32 %v3475_v62, %v1695_v48 }
 0x41e   : > { %v1998_v2 = vmul.f32 0.01, %v1902_v5  ;;  %vm1950_vm10 = vcmp.ge.f32.partialorder %v1902_v5, 0.0 }
 0x420   : > { %v2046_v13 = vsel %vm1950_vm10, %v1902_v5, %v1998_v2 }
 0x421   : > { %v1696_v6 = vpop.f32.mrf.mxu3 }
 0x422   : > { %v1697_v1 = vadd.f32 %v1696_v6, %v1568_v4 }
 0x424   : > { %v1903_v11 = vadd.f32 %v3475_v62, %v1697_v1 }
 0x426   : > { %vm1951_vm11 = vcmp.ge.f32.partialorder %v1903_v11, 0.0  ;;  %v1999_v53 = vmul.f32 0.01, %v1903_v11 }
 0x428   : > { %v2047_v56 = vsel %vm1951_vm11, %v1903_v11, %v1999_v53 }
 0x429   : > { %v2924_v17 = vpack.c.bf16 %v2047_v56, %v2046_v13  ;;  %v1699_v10 = vpop.f32.mrf.mxu3 }
 0x42a   : > { %v1700_v22 = vadd.f32 %v1699_v10, %v1571_v55 }
 0x42b   : > { %2956 = vst [vmem:[%s3208_s10 + $0xa8] sm:$0xff] %v2924_v17  }
 0x42c   : > { %v1904_v15 = vadd.f32 %v3475_v62, %v1700_v22 }
 0x42e   : > { %v2000_v24 = vmul.f32 0.01, %v1904_v15  ;;  %vm1952_vm12 = vcmp.ge.f32.partialorder %v1904_v15, 0.0 }
 0x430   : > { %v2048_v25 = vsel %vm1952_vm12, %v1904_v15, %v2000_v24 }
 0x431   : > { %v1701_v23 = vpop.f32.mrf.mxu3 }
 0x432   : > { %v1702_v16 = vadd.f32 %v1701_v23, %v1573_v63 }
 0x434   : > { %v1905_v28 = vadd.f32 %v3475_v62, %v1702_v16 }
 0x436   : > { %vm1953_vm13 = vcmp.ge.f32.partialorder %v1905_v28, 0.0  ;;  %v2001_v31 = vmul.f32 0.01, %v1905_v28 }
 0x438   : > { %v2049_v7 = vsel %vm1953_vm13, %v1905_v28, %v2001_v31 }
 0x439   : > { %v2929_v8 = vpack.c.bf16 %v2049_v7, %v2048_v25  ;;  %v1704_v33 = vpop.f32.mrf.mxu3 }
 0x43a   : > { %v1705_v34 = vadd.f32 %v1704_v33, %v1576_v32 }
 0x43b   : > { %2957 = vst [vmem:[%s3208_s10 + $0xb0] sm:$0xff] %v2929_v8  }
 0x43c   : > { %v1906_v18 = vadd.f32 %v3475_v62, %v1705_v34 }
 0x43e   : > { %v2002_v9 = vmul.f32 0.01, %v1906_v18  ;;  %vm1954_vm14 = vcmp.ge.f32.partialorder %v1906_v18, 0.0 }
 0x440   : > { %v2050_v44 = vsel %vm1954_vm14, %v1906_v18, %v2002_v9 }
 0x441   : > { %v1706_v19 = vpop.f32.mrf.mxu3 }
 0x442   : > { %v1707_v21 = vadd.f32 %v1706_v19, %v1578_v41 }
 0x444   : > { %v1907_v42 = vadd.f32 %v3475_v62, %v1707_v21 }
 0x446   : > { %vm1955_vm15 = vcmp.ge.f32.partialorder %v1907_v42, 0.0  ;;  %v2003_v43 = vmul.f32 0.01, %v1907_v42 }
 0x448   : > { %v2051_v47 = vsel %vm1955_vm15, %v1907_v42, %v2003_v43 }
 0x449   : > { %v2934_v27 = vpack.c.bf16 %v2051_v47, %v2050_v44 }
 0x44b   : > { %2958 = vst [vmem:[%s3208_s10 + $0xb8] sm:$0xff] %v2934_v27  }
 0x44c PF: > { %s14_s17 = sadd.s32 1, %s3009_s17   ;;  %s3509_s15 = smov %s3005_s16 }
 0x44d   : > { %p11_p5 = scmp.ge.s32.totalorder %s14_s17, 5   ;;  %s3510_s16 = smov %s3512_s18 }
 0x44f   :  { %13 = sbr.rel (!%p11_p5) target bundleno = 2 (0x2), region = 83 }

</bundles_post_ra>
